<compile_context>
chip_gen: v5e
topology: v5e:2x2
jax: 0.10.0
libtpu: 0.0.40
codegen_flags: <defaults>
</compile_context>

<pallas_src>
import math
import jax
import jax.numpy as jnp
from jax.experimental import pallas as pl
from jax.experimental.pallas import tpu as pltpu

# ---------------- small synthetic "roberta" config ----------------
VOCAB = 100
MAX_POS = 64
HIDDEN = 32
N_HEADS = 4
HEAD_DIM = HIDDEN // N_HEADS
FFN = 64
N_LAYERS = 2
NUM_LABELS = 2
LANE_PAD = 128          # lane-dense logits slab width (sliced to NUM_LABELS outside)
LN_EPS = 1e-5


def _layernorm(x, gamma, beta):
    mu = jnp.mean(x, axis=-1, keepdims=True)
    var = jnp.mean((x - mu) ** 2, axis=-1, keepdims=True)
    return (x - mu) * jax.lax.rsqrt(var + LN_EPS) * gamma + beta


# ---------------- Pallas kernel: fused full forward (per batch element) ----------------
def fused_forward_kernel(x_ref, maskb_ref, embg_ref, embb_ref,
                         wqh_ref, bqh_ref, wkh_ref, bkh_ref, wvh_ref, bvh_ref,
                         woh_ref, bo_ref, g1_ref, be1_ref,
                         w1_ref, bf1_ref, w2_ref, bf2_ref, g2_ref, be2_ref,
                         aw1_ref, ab1_ref, aw2_ref, ab2_ref, cwp_ref, cbp_ref,
                         out_ref):
    """One grid step == one batch element; all layers + pooling head fused."""
    x = x_ref[0]                              # [S, H]
    mask_bias = maskb_ref[0]                  # [1, S] additive attention-mask bias

    # Embedding LayerNorm (fused into the kernel).
    x = _layernorm(x, embg_ref[...], embb_ref[...])

    scale = 1.0 / math.sqrt(HEAD_DIM)
    for l in range(N_LAYERS):                 # static unroll over layers (weights stay in VMEM)
        acc = None
        for h in range(N_HEADS):              # static unroll over heads; per-head weights are
            # pre-split on the host, so no lane-axis slicing or concatenation here.
            qh = jnp.dot(x, wqh_ref[l, h], preferred_element_type=jnp.float32) + bqh_ref[l, h]
            kh = jnp.dot(x, wkh_ref[l, h], preferred_element_type=jnp.float32) + bkh_ref[l, h]
            vh = jnp.dot(x, wvh_ref[l, h], preferred_element_type=jnp.float32) + bvh_ref[l, h]
            scores = jax.lax.dot_general(
                qh, kh, (((1,), (1,)), ((), ())),
                preferred_element_type=jnp.float32) * scale          # [S, S]
            scores = scores + mask_bias                              # broadcast over query rows
            m = jnp.max(scores, axis=-1, keepdims=True)
            p = jnp.exp(scores - m)
            p = p * pl.reciprocal(jnp.sum(p, axis=-1, keepdims=True), approx=True)
            ctx = jnp.dot(p, vh, preferred_element_type=jnp.float32)               # [S, HD]
            contrib = jnp.dot(ctx, woh_ref[l, h], preferred_element_type=jnp.float32)  # [S, H]
            acc = contrib if acc is None else acc + contrib
        attn = acc + bo_ref[l]                                       # == concat(heads) @ Wo + bo
        x1 = _layernorm(x + attn, g1_ref[l], be1_ref[l])

        hdn = jnp.dot(x1, w1_ref[l], preferred_element_type=jnp.float32) + bf1_ref[l]
        hdn = jax.nn.gelu(hdn)
        ffn = jnp.dot(hdn, w2_ref[l], preferred_element_type=jnp.float32) + bf2_ref[l]
        x = _layernorm(x1 + ffn, g2_ref[l], be2_ref[l])

    # Attention pooling + classifier head.
    # NOTE: the reference PyTorch module applies torch.softmax over the whole
    # sequence WITHOUT the attention mask, so we mirror that exactly (padded
    # positions receive pooling weight, just like the original module).
    t = jnp.tanh(jnp.dot(x, aw1_ref[...], preferred_element_type=jnp.float32) + ab1_ref[...])   # [S, H]
    s = jnp.dot(t, aw2_ref[...], preferred_element_type=jnp.float32) + ab2_ref[...]             # [S, 1]
    m = jnp.max(s, axis=0, keepdims=True)
    e = jnp.exp(s - m)
    w = e * pl.reciprocal(jnp.sum(e, axis=0, keepdims=True), approx=True)    # softmax over seq
    context = jnp.sum(w * x, axis=0, keepdims=True)                          # bmm(w^T, hs) -> [1, H]
    # TODO(synk): nn.Dropout(0.3) is identity at inference; training-mode dropout not modeled.
    logits = jnp.dot(context, cwp_ref[...], preferred_element_type=jnp.float32) + cbp_ref[...]  # [1, 128]
    out_ref[0] = logits                                                       # lane-dense store


def _const_spec(a):
    """Full-array block whose block index is constant across the grid (fetched once)."""
    nd = a.ndim
    return pl.BlockSpec(a.shape, lambda b, _nd=nd: (0,) * _nd)


# ---------------- parameter init (deterministic, synthetic) ----------------
def init_params(key):
    ks = iter(jax.random.split(key, 32))
    nrm = lambda shp: (0.02 * jax.random.normal(next(ks), shp)).astype(jnp.float32)
    zeros = lambda shp: jnp.zeros(shp, jnp.float32)
    ones = lambda shp: jnp.ones(shp, jnp.float32)
    L, H = N_LAYERS, HIDDEN
    return {
        "tok_emb": nrm((VOCAB, H)),
        "pos_emb": nrm((MAX_POS, H)),
        "emb_g": ones((1, H)), "emb_b": zeros((1, H)),
        # encoder layers, stacked along a leading layer axis
        "wq": nrm((L, H, H)), "bq": zeros((L, 1, H)),
        "wk": nrm((L, H, H)), "bk": zeros((L, 1, H)),
        "wv": nrm((L, H, H)), "bv": zeros((L, 1, H)),
        "wo": nrm((L, H, H)), "bo": zeros((L, 1, H)),
        "g1": ones((L, 1, H)), "be1": zeros((L, 1, H)),
        "w1": nrm((L, H, FFN)), "bf1": zeros((L, 1, FFN)),
        "w2": nrm((L, FFN, H)), "bf2": zeros((L, 1, H)),
        "g2": ones((L, 1, H)), "be2": zeros((L, 1, H)),
        # attention-pooling head: Linear(H,H) -> Tanh -> Linear(H,1)
        "attn_w1": nrm((H, H)), "attn_b1": zeros((1, H)),
        "attn_w2": nrm((H, 1)), "attn_b2": zeros((1, 1)),
        # classifier: Linear(H, num_labels)
        "cls_w": nrm((H, NUM_LABELS)), "cls_b": zeros((1, NUM_LABELS)),
    }


# ---------------- forward pass (glue + single fused Pallas kernel) ----------------
def roberta_classifier_forward(params, input_ids, attention_mask):
    B, S = input_ids.shape
    L, H, NH, HD = N_LAYERS, HIDDEN, N_HEADS, HEAD_DIM

    # Embedding gather (host-side glue; table lookup has no clean Pallas equivalent here).
    positions = jnp.arange(S)
    x = (params["tok_emb"][input_ids] +
         params["pos_emb"][positions][None, :, :]).astype(jnp.float32)

    # Additive attention-mask bias, computed once on the host (f32, stays f32 in-kernel).
    mask_bias = ((1.0 - attention_mask.astype(jnp.float32)) * -1e9).reshape(B, 1, S)

    # Pre-split Q/K/V/O weights per head so the kernel never slices the lane axis
    # of activations; the head concat becomes a sum of per-head output projections.
    wqh = params["wq"].reshape(L, H, NH, HD).transpose(0, 2, 1, 3)   # [L, NH, H, HD]
    wkh = params["wk"].reshape(L, H, NH, HD).transpose(0, 2, 1, 3)
    wvh = params["wv"].reshape(L, H, NH, HD).transpose(0, 2, 1, 3)
    bqh = params["bq"].reshape(L, 1, NH, HD).transpose(0, 2, 1, 3)   # [L, NH, 1, HD]
    bkh = params["bk"].reshape(L, 1, NH, HD).transpose(0, 2, 1, 3)
    bvh = params["bv"].reshape(L, 1, NH, HD).transpose(0, 2, 1, 3)
    woh = params["wo"].reshape(L, NH, HD, H)                          # [L, NH, HD, H]

    # Lane-dense classifier weights / bias (padded to 128 lanes; pad cols are zero).
    cwp = jnp.zeros((H, LANE_PAD), jnp.float32).at[:, :NUM_LABELS].set(params["cls_w"])
    cbp = jnp.zeros((1, LANE_PAD), jnp.float32).at[:, :NUM_LABELS].set(params["cls_b"])

    args = [x, mask_bias, params["emb_g"], params["emb_b"],
            wqh, bqh, wkh, bkh, wvh, bvh, woh, params["bo"],
            params["g1"], params["be1"], params["w1"], params["bf1"],
            params["w2"], params["bf2"], params["g2"], params["be2"],
            params["attn_w1"], params["attn_b1"], params["attn_w2"], params["attn_b2"],
            cwp, cbp]

    in_specs = [pl.BlockSpec((1, S, H), lambda b: (b, 0, 0)),
                pl.BlockSpec((1, 1, S), lambda b: (b, 0, 0))]
    in_specs += [_const_spec(a) for a in args[2:]]

    out = pl.pallas_call(
        fused_forward_kernel,
        out_shape=jax.ShapeDtypeStruct((B, 1, LANE_PAD), jnp.float32),
        grid=(B,),
        in_specs=in_specs,
        out_specs=pl.BlockSpec((1, 1, LANE_PAD), lambda b: (b, 0, 0)),
        compiler_params=pltpu.CompilerParams(dimension_semantics=("parallel",)),
    )(*args)

    logits = out.reshape(B, LANE_PAD)[:, :NUM_LABELS]
    # The PyTorch module returns (logits, outputs.attentions); attentions are None
    # unless output_attentions=True, so we mirror that.
    return logits, None


if __name__ == "__main__":
    key = jax.random.PRNGKey(0)
    pkey, dkey = jax.random.split(key)
    params = init_params(pkey)

    B, S = 2, 8
    input_ids = jax.random.randint(dkey, (B, S), 0, VOCAB, dtype=jnp.int32)
    attention_mask = jnp.array([[1, 1, 1, 1, 1, 1, 1, 1],
                                [1, 1, 1, 1, 1, 1, 0, 0]], dtype=jnp.int32)

    logits, attns = roberta_classifier_forward(params, input_ids, attention_mask)
    logits = jax.block_until_ready(logits)
    assert logits.shape == (B, NUM_LABELS)
    assert jnp.all(jnp.isfinite(logits))
    print("KERNEL_OK")
</pallas_src>

<mosaic_0001>
module attributes {stable_mosaic.version = 11 : i64} {
  func.func @fused_forward_kernel(%arg0: i32, %arg1: memref<1x8x32xf32, #tpu.memory_space<vmem>>, %arg2: memref<1x1x8xf32, #tpu.memory_space<vmem>>, %arg3: memref<1x32xf32, #tpu.memory_space<vmem>>, %arg4: memref<1x32xf32, #tpu.memory_space<vmem>>, %arg5: memref<2x4x32x8xf32, #tpu.memory_space<vmem>>, %arg6: memref<2x4x1x8xf32, #tpu.memory_space<vmem>>, %arg7: memref<2x4x32x8xf32, #tpu.memory_space<vmem>>, %arg8: memref<2x4x1x8xf32, #tpu.memory_space<vmem>>, %arg9: memref<2x4x32x8xf32, #tpu.memory_space<vmem>>, %arg10: memref<2x4x1x8xf32, #tpu.memory_space<vmem>>, %arg11: memref<2x4x8x32xf32, #tpu.memory_space<vmem>>, %arg12: memref<2x1x32xf32, #tpu.memory_space<vmem>>, %arg13: memref<2x1x32xf32, #tpu.memory_space<vmem>>, %arg14: memref<2x1x32xf32, #tpu.memory_space<vmem>>, %arg15: memref<2x32x64xf32, #tpu.memory_space<vmem>>, %arg16: memref<2x1x64xf32, #tpu.memory_space<vmem>>, %arg17: memref<2x64x32xf32, #tpu.memory_space<vmem>>, %arg18: memref<2x1x32xf32, #tpu.memory_space<vmem>>, %arg19: memref<2x1x32xf32, #tpu.memory_space<vmem>>, %arg20: memref<2x1x32xf32, #tpu.memory_space<vmem>>, %arg21: memref<32x32xf32, #tpu.memory_space<vmem>>, %arg22: memref<1x32xf32, #tpu.memory_space<vmem>>, %arg23: memref<32x1xf32, #tpu.memory_space<vmem>>, %arg24: memref<1x1xf32, #tpu.memory_space<vmem>>, %arg25: memref<32x128xf32, #tpu.memory_space<vmem>>, %arg26: memref<1x128xf32, #tpu.memory_space<vmem>>, %arg27: memref<1x1x128xf32, #tpu.memory_space<vmem>>) attributes {dimension_semantics = [#tpu.dimension_semantics<parallel>], iteration_bounds = array<i64: 2>, scalar_prefetch = 0 : i64, scratch_operands = 0 : i64, tpu.core_type = #tpu.core_type<tc>, window_params = [{transform_indices = @transform_0, window_bounds = array<i64: 1, 8, 32>}, {transform_indices = @transform_1, window_bounds = array<i64: 1, 1, 8>}, {pipeline_mode = #tpu.pipeline_mode<synchronous>, transform_indices = @transform_2, window_bounds = array<i64: 1, 32>}, {pipeline_mode = #tpu.pipeline_mode<synchronous>, transform_indices = @transform_3, window_bounds = array<i64: 1, 32>}, {pipeline_mode = #tpu.pipeline_mode<synchronous>, transform_indices = @transform_4, window_bounds = array<i64: 2, 4, 32, 8>}, {pipeline_mode = #tpu.pipeline_mode<synchronous>, transform_indices = @transform_5, window_bounds = array<i64: 2, 4, 1, 8>}, {pipeline_mode = #tpu.pipeline_mode<synchronous>, transform_indices = @transform_6, window_bounds = array<i64: 2, 4, 32, 8>}, {pipeline_mode = #tpu.pipeline_mode<synchronous>, transform_indices = @transform_7, window_bounds = array<i64: 2, 4, 1, 8>}, {pipeline_mode = #tpu.pipeline_mode<synchronous>, transform_indices = @transform_8, window_bounds = array<i64: 2, 4, 32, 8>}, {pipeline_mode = #tpu.pipeline_mode<synchronous>, transform_indices = @transform_9, window_bounds = array<i64: 2, 4, 1, 8>}, {pipeline_mode = #tpu.pipeline_mode<synchronous>, transform_indices = @transform_10, window_bounds = array<i64: 2, 4, 8, 32>}, {pipeline_mode = #tpu.pipeline_mode<synchronous>, transform_indices = @transform_11, window_bounds = array<i64: 2, 1, 32>}, {pipeline_mode = #tpu.pipeline_mode<synchronous>, transform_indices = @transform_12, window_bounds = array<i64: 2, 1, 32>}, {pipeline_mode = #tpu.pipeline_mode<synchronous>, transform_indices = @transform_13, window_bounds = array<i64: 2, 1, 32>}, {pipeline_mode = #tpu.pipeline_mode<synchronous>, transform_indices = @transform_14, window_bounds = array<i64: 2, 32, 64>}, {pipeline_mode = #tpu.pipeline_mode<synchronous>, transform_indices = @transform_15, window_bounds = array<i64: 2, 1, 64>}, {pipeline_mode = #tpu.pipeline_mode<synchronous>, transform_indices = @transform_16, window_bounds = array<i64: 2, 64, 32>}, {pipeline_mode = #tpu.pipeline_mode<synchronous>, transform_indices = @transform_17, window_bounds = array<i64: 2, 1, 32>}, {pipeline_mode = #tpu.pipeline_mode<synchronous>, transform_indices = @transform_18, window_bounds = array<i64: 2, 1, 32>}, {pipeline_mode = #tpu.pipeline_mode<synchronous>, transform_indices = @transform_19, window_bounds = array<i64: 2, 1, 32>}, {pipeline_mode = #tpu.pipeline_mode<synchronous>, transform_indices = @transform_20, window_bounds = array<i64: 32, 32>}, {pipeline_mode = #tpu.pipeline_mode<synchronous>, transform_indices = @transform_21, window_bounds = array<i64: 1, 32>}, {pipeline_mode = #tpu.pipeline_mode<synchronous>, transform_indices = @transform_22, window_bounds = array<i64: 32, 1>}, {pipeline_mode = #tpu.pipeline_mode<synchronous>, transform_indices = @transform_23, window_bounds = array<i64: 1, 1>}, {pipeline_mode = #tpu.pipeline_mode<synchronous>, transform_indices = @transform_24, window_bounds = array<i64: 32, 128>}, {pipeline_mode = #tpu.pipeline_mode<synchronous>, transform_indices = @transform_25, window_bounds = array<i64: 1, 128>}, {transform_indices = @transform_26, window_bounds = array<i64: 1, 1, 128>}]} {
    %c0 = arith.constant 0 : index
    %c0_0 = arith.constant 0 : index
    %c0_1 = arith.constant 0 : index
    %0 = vector.load %arg1[%c0, %c0_0, %c0_1] : memref<1x8x32xf32, #tpu.memory_space<vmem>>, vector<1x8x32xf32>
    %1 = vector.shape_cast %0 : vector<1x8x32xf32> to vector<8x32xf32>
    %c0_2 = arith.constant 0 : index
    %c0_3 = arith.constant 0 : index
    %c0_4 = arith.constant 0 : index
    %2 = vector.load %arg2[%c0_2, %c0_3, %c0_4] : memref<1x1x8xf32, #tpu.memory_space<vmem>>, vector<1x1x8xf32>
    %3 = vector.shape_cast %2 : vector<1x1x8xf32> to vector<1x8xf32>
    %c0_5 = arith.constant 0 : index
    %c0_6 = arith.constant 0 : index
    %4 = vector.load %arg3[%c0_5, %c0_6] : memref<1x32xf32, #tpu.memory_space<vmem>>, vector<1x32xf32>
    %c0_7 = arith.constant 0 : index
    %c0_8 = arith.constant 0 : index
    %5 = vector.load %arg4[%c0_7, %c0_8] : memref<1x32xf32, #tpu.memory_space<vmem>>, vector<1x32xf32>
    %cst = arith.constant dense<0.000000e+00> : vector<8xf32>
    %6 = vector.multi_reduction <add>, %1, %cst [1] : vector<8x32xf32> to vector<8xf32>
    %7 = vector.shape_cast %6 : vector<8xf32> to vector<8x1xf32>
    %cst_9 = arith.constant 3.200000e+01 : f32
    %8 = vector.broadcast %cst_9 : f32 to vector<8x1xf32>
    %9 = arith.divf %7, %8 : vector<8x1xf32>
    %10 = vector.broadcast %9 : vector<8x1xf32> to vector<8x32xf32>
    %11 = arith.subf %1, %10 : vector<8x32xf32>
    %12 = arith.mulf %11, %11 : vector<8x32xf32>
    %cst_10 = arith.constant dense<0.000000e+00> : vector<8xf32>
    %13 = vector.multi_reduction <add>, %12, %cst_10 [1] : vector<8x32xf32> to vector<8xf32>
    %14 = vector.shape_cast %13 : vector<8xf32> to vector<8x1xf32>
    %cst_11 = arith.constant 3.200000e+01 : f32
    %15 = vector.broadcast %cst_11 : f32 to vector<8x1xf32>
    %16 = arith.divf %14, %15 : vector<8x1xf32>
    %17 = vector.broadcast %9 : vector<8x1xf32> to vector<8x32xf32>
    %18 = arith.subf %1, %17 : vector<8x32xf32>
    %cst_12 = arith.constant 9.99999974E-6 : f32
    %19 = vector.broadcast %cst_12 : f32 to vector<8x1xf32>
    %20 = arith.addf %16, %19 : vector<8x1xf32>
    %21 = math.rsqrt %20 : vector<8x1xf32>
    %22 = vector.broadcast %21 : vector<8x1xf32> to vector<8x32xf32>
    %23 = arith.mulf %18, %22 : vector<8x32xf32>
    %24 = vector.broadcast %4 : vector<1x32xf32> to vector<8x32xf32>
    %25 = arith.mulf %23, %24 : vector<8x32xf32>
    %26 = vector.broadcast %5 : vector<1x32xf32> to vector<8x32xf32>
    %27 = arith.addf %25, %26 : vector<8x32xf32>
    %c0_13 = arith.constant 0 : index
    %c0_14 = arith.constant 0 : index
    %c0_15 = arith.constant 0 : index
    %c0_16 = arith.constant 0 : index
    %28 = vector.load %arg5[%c0_13, %c0_14, %c0_15, %c0_16] : memref<2x4x32x8xf32, #tpu.memory_space<vmem>>, vector<1x1x32x8xf32>
    %29 = vector.shape_cast %28 : vector<1x1x32x8xf32> to vector<32x8xf32>
    %cst_17 = arith.constant dense<0.000000e+00> : vector<8x8xf32>
    %30 = tpu.matmul %27, %29, %cst_17 {dimension_numbers = #tpu.dot_dimension_numbers<[1], [0], [0], [1], [0, 0, 1, 1], [], []>} : vector<8x32xf32>, vector<32x8xf32>, vector<8x8xf32> -> vector<8x8xf32>
    %c0_18 = arith.constant 0 : index
    %c0_19 = arith.constant 0 : index
    %c0_20 = arith.constant 0 : index
    %c0_21 = arith.constant 0 : index
    %31 = vector.load %arg6[%c0_18, %c0_19, %c0_20, %c0_21] : memref<2x4x1x8xf32, #tpu.memory_space<vmem>>, vector<1x1x1x8xf32>
    %32 = vector.shape_cast %31 : vector<1x1x1x8xf32> to vector<1x8xf32>
    %33 = vector.broadcast %32 : vector<1x8xf32> to vector<8x8xf32>
    %34 = arith.addf %30, %33 : vector<8x8xf32>
    %c0_22 = arith.constant 0 : index
    %c0_23 = arith.constant 0 : index
    %c0_24 = arith.constant 0 : index
    %c0_25 = arith.constant 0 : index
    %35 = vector.load %arg7[%c0_22, %c0_23, %c0_24, %c0_25] : memref<2x4x32x8xf32, #tpu.memory_space<vmem>>, vector<1x1x32x8xf32>
    %36 = vector.shape_cast %35 : vector<1x1x32x8xf32> to vector<32x8xf32>
    %cst_26 = arith.constant dense<0.000000e+00> : vector<8x8xf32>
    %37 = tpu.matmul %27, %36, %cst_26 {dimension_numbers = #tpu.dot_dimension_numbers<[1], [0], [0], [1], [0, 0, 1, 1], [], []>} : vector<8x32xf32>, vector<32x8xf32>, vector<8x8xf32> -> vector<8x8xf32>
    %c0_27 = arith.constant 0 : index
    %c0_28 = arith.constant 0 : index
    %c0_29 = arith.constant 0 : index
    %c0_30 = arith.constant 0 : index
    %38 = vector.load %arg8[%c0_27, %c0_28, %c0_29, %c0_30] : memref<2x4x1x8xf32, #tpu.memory_space<vmem>>, vector<1x1x1x8xf32>
    %39 = vector.shape_cast %38 : vector<1x1x1x8xf32> to vector<1x8xf32>
    %40 = vector.broadcast %39 : vector<1x8xf32> to vector<8x8xf32>
    %41 = arith.addf %37, %40 : vector<8x8xf32>
    %c0_31 = arith.constant 0 : index
    %c0_32 = arith.constant 0 : index
    %c0_33 = arith.constant 0 : index
    %c0_34 = arith.constant 0 : index
    %42 = vector.load %arg9[%c0_31, %c0_32, %c0_33, %c0_34] : memref<2x4x32x8xf32, #tpu.memory_space<vmem>>, vector<1x1x32x8xf32>
    %43 = vector.shape_cast %42 : vector<1x1x32x8xf32> to vector<32x8xf32>
    %cst_35 = arith.constant dense<0.000000e+00> : vector<8x8xf32>
    %44 = tpu.matmul %27, %43, %cst_35 {dimension_numbers = #tpu.dot_dimension_numbers<[1], [0], [0], [1], [0, 0, 1, 1], [], []>} : vector<8x32xf32>, vector<32x8xf32>, vector<8x8xf32> -> vector<8x8xf32>
    %c0_36 = arith.constant 0 : index
    %c0_37 = arith.constant 0 : index
    %c0_38 = arith.constant 0 : index
    %c0_39 = arith.constant 0 : index
    %45 = vector.load %arg10[%c0_36, %c0_37, %c0_38, %c0_39] : memref<2x4x1x8xf32, #tpu.memory_space<vmem>>, vector<1x1x1x8xf32>
    %46 = vector.shape_cast %45 : vector<1x1x1x8xf32> to vector<1x8xf32>
    %47 = vector.broadcast %46 : vector<1x8xf32> to vector<8x8xf32>
    %48 = arith.addf %44, %47 : vector<8x8xf32>
    %cst_40 = arith.constant dense<0.000000e+00> : vector<8x8xf32>
    %49 = tpu.matmul %34, %41, %cst_40 {dimension_numbers = #tpu.dot_dimension_numbers<[1], [1], [0], [0], [0, 0, 1, 0], [], []>} : vector<8x8xf32>, vector<8x8xf32>, vector<8x8xf32> -> vector<8x8xf32>
    %cst_41 = arith.constant 0.353553385 : f32
    %50 = vector.broadcast %cst_41 : f32 to vector<8x8xf32>
    %51 = arith.mulf %49, %50 : vector<8x8xf32>
    %52 = vector.broadcast %3 : vector<1x8xf32> to vector<8x8xf32>
    %53 = arith.addf %51, %52 : vector<8x8xf32>
    %cst_42 = arith.constant dense<0xFF800000> : vector<8xf32>
    %54 = vector.multi_reduction <maximumf>, %53, %cst_42 [1] : vector<8x8xf32> to vector<8xf32>
    %55 = vector.shape_cast %54 : vector<8xf32> to vector<8x1xf32>
    %56 = vector.broadcast %55 : vector<8x1xf32> to vector<8x8xf32>
    %57 = arith.subf %53, %56 : vector<8x8xf32>
    %58 = math.exp %57 : vector<8x8xf32>
    %cst_43 = arith.constant dense<0.000000e+00> : vector<8xf32>
    %59 = vector.multi_reduction <add>, %58, %cst_43 [1] : vector<8x8xf32> to vector<8xf32>
    %60 = vector.shape_cast %59 : vector<8xf32> to vector<8x1xf32>
    %61 = tpu.reciprocal %60 {approx = true} : vector<8x1xf32> -> vector<8x1xf32>
    %62 = vector.broadcast %61 : vector<8x1xf32> to vector<8x8xf32>
    %63 = arith.mulf %58, %62 : vector<8x8xf32>
    %cst_44 = arith.constant dense<0.000000e+00> : vector<8x8xf32>
    %64 = tpu.matmul %63, %48, %cst_44 {dimension_numbers = #tpu.dot_dimension_numbers<[1], [0], [0], [1], [0, 0, 1, 1], [], []>} : vector<8x8xf32>, vector<8x8xf32>, vector<8x8xf32> -> vector<8x8xf32>
    %c0_45 = arith.constant 0 : index
    %c0_46 = arith.constant 0 : index
    %c0_47 = arith.constant 0 : index
    %c0_48 = arith.constant 0 : index
    %65 = vector.load %arg11[%c0_45, %c0_46, %c0_47, %c0_48] : memref<2x4x8x32xf32, #tpu.memory_space<vmem>>, vector<1x1x8x32xf32>
    %66 = vector.shape_cast %65 : vector<1x1x8x32xf32> to vector<8x32xf32>
    %cst_49 = arith.constant dense<0.000000e+00> : vector<8x32xf32>
    %67 = tpu.matmul %64, %66, %cst_49 {dimension_numbers = #tpu.dot_dimension_numbers<[1], [0], [0], [1], [0, 0, 1, 1], [], []>} : vector<8x8xf32>, vector<8x32xf32>, vector<8x32xf32> -> vector<8x32xf32>
    %c0_50 = arith.constant 0 : index
    %c1 = arith.constant 1 : index
    %c0_51 = arith.constant 0 : index
    %c0_52 = arith.constant 0 : index
    %68 = vector.load %arg5[%c0_50, %c1, %c0_51, %c0_52] : memref<2x4x32x8xf32, #tpu.memory_space<vmem>>, vector<1x1x32x8xf32>
    %69 = vector.shape_cast %68 : vector<1x1x32x8xf32> to vector<32x8xf32>
    %cst_53 = arith.constant dense<0.000000e+00> : vector<8x8xf32>
    %70 = tpu.matmul %27, %69, %cst_53 {dimension_numbers = #tpu.dot_dimension_numbers<[1], [0], [0], [1], [0, 0, 1, 1], [], []>} : vector<8x32xf32>, vector<32x8xf32>, vector<8x8xf32> -> vector<8x8xf32>
    %c0_54 = arith.constant 0 : index
    %c1_55 = arith.constant 1 : index
    %c0_56 = arith.constant 0 : index
    %c0_57 = arith.constant 0 : index
    %71 = vector.load %arg6[%c0_54, %c1_55, %c0_56, %c0_57] : memref<2x4x1x8xf32, #tpu.memory_space<vmem>>, vector<1x1x1x8xf32>
    %72 = vector.shape_cast %71 : vector<1x1x1x8xf32> to vector<1x8xf32>
    %73 = vector.broadcast %72 : vector<1x8xf32> to vector<8x8xf32>
    %74 = arith.addf %70, %73 : vector<8x8xf32>
    %c0_58 = arith.constant 0 : index
    %c1_59 = arith.constant 1 : index
    %c0_60 = arith.constant 0 : index
    %c0_61 = arith.constant 0 : index
    %75 = vector.load %arg7[%c0_58, %c1_59, %c0_60, %c0_61] : memref<2x4x32x8xf32, #tpu.memory_space<vmem>>, vector<1x1x32x8xf32>
    %76 = vector.shape_cast %75 : vector<1x1x32x8xf32> to vector<32x8xf32>
    %cst_62 = arith.constant dense<0.000000e+00> : vector<8x8xf32>
    %77 = tpu.matmul %27, %76, %cst_62 {dimension_numbers = #tpu.dot_dimension_numbers<[1], [0], [0], [1], [0, 0, 1, 1], [], []>} : vector<8x32xf32>, vector<32x8xf32>, vector<8x8xf32> -> vector<8x8xf32>
    %c0_63 = arith.constant 0 : index
    %c1_64 = arith.constant 1 : index
    %c0_65 = arith.constant 0 : index
    %c0_66 = arith.constant 0 : index
    %78 = vector.load %arg8[%c0_63, %c1_64, %c0_65, %c0_66] : memref<2x4x1x8xf32, #tpu.memory_space<vmem>>, vector<1x1x1x8xf32>
    %79 = vector.shape_cast %78 : vector<1x1x1x8xf32> to vector<1x8xf32>
    %80 = vector.broadcast %79 : vector<1x8xf32> to vector<8x8xf32>
    %81 = arith.addf %77, %80 : vector<8x8xf32>
    %c0_67 = arith.constant 0 : index
    %c1_68 = arith.constant 1 : index
    %c0_69 = arith.constant 0 : index
    %c0_70 = arith.constant 0 : index
    %82 = vector.load %arg9[%c0_67, %c1_68, %c0_69, %c0_70] : memref<2x4x32x8xf32, #tpu.memory_space<vmem>>, vector<1x1x32x8xf32>
    %83 = vector.shape_cast %82 : vector<1x1x32x8xf32> to vector<32x8xf32>
    %cst_71 = arith.constant dense<0.000000e+00> : vector<8x8xf32>
    %84 = tpu.matmul %27, %83, %cst_71 {dimension_numbers = #tpu.dot_dimension_numbers<[1], [0], [0], [1], [0, 0, 1, 1], [], []>} : vector<8x32xf32>, vector<32x8xf32>, vector<8x8xf32> -> vector<8x8xf32>
    %c0_72 = arith.constant 0 : index
    %c1_73 = arith.constant 1 : index
    %c0_74 = arith.constant 0 : index
    %c0_75 = arith.constant 0 : index
    %85 = vector.load %arg10[%c0_72, %c1_73, %c0_74, %c0_75] : memref<2x4x1x8xf32, #tpu.memory_space<vmem>>, vector<1x1x1x8xf32>
    %86 = vector.shape_cast %85 : vector<1x1x1x8xf32> to vector<1x8xf32>
    %87 = vector.broadcast %86 : vector<1x8xf32> to vector<8x8xf32>
    %88 = arith.addf %84, %87 : vector<8x8xf32>
    %cst_76 = arith.constant dense<0.000000e+00> : vector<8x8xf32>
    %89 = tpu.matmul %74, %81, %cst_76 {dimension_numbers = #tpu.dot_dimension_numbers<[1], [1], [0], [0], [0, 0, 1, 0], [], []>} : vector<8x8xf32>, vector<8x8xf32>, vector<8x8xf32> -> vector<8x8xf32>
    %cst_77 = arith.constant 0.353553385 : f32
    %90 = vector.broadcast %cst_77 : f32 to vector<8x8xf32>
    %91 = arith.mulf %89, %90 : vector<8x8xf32>
    %92 = vector.broadcast %3 : vector<1x8xf32> to vector<8x8xf32>
    %93 = arith.addf %91, %92 : vector<8x8xf32>
    %cst_78 = arith.constant dense<0xFF800000> : vector<8xf32>
    %94 = vector.multi_reduction <maximumf>, %93, %cst_78 [1] : vector<8x8xf32> to vector<8xf32>
    %95 = vector.shape_cast %94 : vector<8xf32> to vector<8x1xf32>
    %96 = vector.broadcast %95 : vector<8x1xf32> to vector<8x8xf32>
    %97 = arith.subf %93, %96 : vector<8x8xf32>
    %98 = math.exp %97 : vector<8x8xf32>
    %cst_79 = arith.constant dense<0.000000e+00> : vector<8xf32>
    %99 = vector.multi_reduction <add>, %98, %cst_79 [1] : vector<8x8xf32> to vector<8xf32>
    %100 = vector.shape_cast %99 : vector<8xf32> to vector<8x1xf32>
    %101 = tpu.reciprocal %100 {approx = true} : vector<8x1xf32> -> vector<8x1xf32>
    %102 = vector.broadcast %101 : vector<8x1xf32> to vector<8x8xf32>
    %103 = arith.mulf %98, %102 : vector<8x8xf32>
    %cst_80 = arith.constant dense<0.000000e+00> : vector<8x8xf32>
    %104 = tpu.matmul %103, %88, %cst_80 {dimension_numbers = #tpu.dot_dimension_numbers<[1], [0], [0], [1], [0, 0, 1, 1], [], []>} : vector<8x8xf32>, vector<8x8xf32>, vector<8x8xf32> -> vector<8x8xf32>
    %c0_81 = arith.constant 0 : index
    %c1_82 = arith.constant 1 : index
    %c0_83 = arith.constant 0 : index
    %c0_84 = arith.constant 0 : index
    %105 = vector.load %arg11[%c0_81, %c1_82, %c0_83, %c0_84] : memref<2x4x8x32xf32, #tpu.memory_space<vmem>>, vector<1x1x8x32xf32>
    %106 = vector.shape_cast %105 : vector<1x1x8x32xf32> to vector<8x32xf32>
    %cst_85 = arith.constant dense<0.000000e+00> : vector<8x32xf32>
    %107 = tpu.matmul %104, %106, %cst_85 {dimension_numbers = #tpu.dot_dimension_numbers<[1], [0], [0], [1], [0, 0, 1, 1], [], []>} : vector<8x8xf32>, vector<8x32xf32>, vector<8x32xf32> -> vector<8x32xf32>
    %108 = arith.addf %67, %107 : vector<8x32xf32>
    %c0_86 = arith.constant 0 : index
    %c2 = arith.constant 2 : index
    %c0_87 = arith.constant 0 : index
    %c0_88 = arith.constant 0 : index
    %109 = vector.load %arg5[%c0_86, %c2, %c0_87, %c0_88] : memref<2x4x32x8xf32, #tpu.memory_space<vmem>>, vector<1x1x32x8xf32>
    %110 = vector.shape_cast %109 : vector<1x1x32x8xf32> to vector<32x8xf32>
    %cst_89 = arith.constant dense<0.000000e+00> : vector<8x8xf32>
    %111 = tpu.matmul %27, %110, %cst_89 {dimension_numbers = #tpu.dot_dimension_numbers<[1], [0], [0], [1], [0, 0, 1, 1], [], []>} : vector<8x32xf32>, vector<32x8xf32>, vector<8x8xf32> -> vector<8x8xf32>
    %c0_90 = arith.constant 0 : index
    %c2_91 = arith.constant 2 : index
    %c0_92 = arith.constant 0 : index
    %c0_93 = arith.constant 0 : index
    %112 = vector.load %arg6[%c0_90, %c2_91, %c0_92, %c0_93] : memref<2x4x1x8xf32, #tpu.memory_space<vmem>>, vector<1x1x1x8xf32>
    %113 = vector.shape_cast %112 : vector<1x1x1x8xf32> to vector<1x8xf32>
    %114 = vector.broadcast %113 : vector<1x8xf32> to vector<8x8xf32>
    %115 = arith.addf %111, %114 : vector<8x8xf32>
    %c0_94 = arith.constant 0 : index
    %c2_95 = arith.constant 2 : index
    %c0_96 = arith.constant 0 : index
    %c0_97 = arith.constant 0 : index
    %116 = vector.load %arg7[%c0_94, %c2_95, %c0_96, %c0_97] : memref<2x4x32x8xf32, #tpu.memory_space<vmem>>, vector<1x1x32x8xf32>
    %117 = vector.shape_cast %116 : vector<1x1x32x8xf32> to vector<32x8xf32>
    %cst_98 = arith.constant dense<0.000000e+00> : vector<8x8xf32>
    %118 = tpu.matmul %27, %117, %cst_98 {dimension_numbers = #tpu.dot_dimension_numbers<[1], [0], [0], [1], [0, 0, 1, 1], [], []>} : vector<8x32xf32>, vector<32x8xf32>, vector<8x8xf32> -> vector<8x8xf32>
    %c0_99 = arith.constant 0 : index
    %c2_100 = arith.constant 2 : index
    %c0_101 = arith.constant 0 : index
    %c0_102 = arith.constant 0 : index
    %119 = vector.load %arg8[%c0_99, %c2_100, %c0_101, %c0_102] : memref<2x4x1x8xf32, #tpu.memory_space<vmem>>, vector<1x1x1x8xf32>
    %120 = vector.shape_cast %119 : vector<1x1x1x8xf32> to vector<1x8xf32>
    %121 = vector.broadcast %120 : vector<1x8xf32> to vector<8x8xf32>
    %122 = arith.addf %118, %121 : vector<8x8xf32>
    %c0_103 = arith.constant 0 : index
    %c2_104 = arith.constant 2 : index
    %c0_105 = arith.constant 0 : index
    %c0_106 = arith.constant 0 : index
    %123 = vector.load %arg9[%c0_103, %c2_104, %c0_105, %c0_106] : memref<2x4x32x8xf32, #tpu.memory_space<vmem>>, vector<1x1x32x8xf32>
    %124 = vector.shape_cast %123 : vector<1x1x32x8xf32> to vector<32x8xf32>
    %cst_107 = arith.constant dense<0.000000e+00> : vector<8x8xf32>
    %125 = tpu.matmul %27, %124, %cst_107 {dimension_numbers = #tpu.dot_dimension_numbers<[1], [0], [0], [1], [0, 0, 1, 1], [], []>} : vector<8x32xf32>, vector<32x8xf32>, vector<8x8xf32> -> vector<8x8xf32>
    %c0_108 = arith.constant 0 : index
    %c2_109 = arith.constant 2 : index
    %c0_110 = arith.constant 0 : index
    %c0_111 = arith.constant 0 : index
    %126 = vector.load %arg10[%c0_108, %c2_109, %c0_110, %c0_111] : memref<2x4x1x8xf32, #tpu.memory_space<vmem>>, vector<1x1x1x8xf32>
    %127 = vector.shape_cast %126 : vector<1x1x1x8xf32> to vector<1x8xf32>
    %128 = vector.broadcast %127 : vector<1x8xf32> to vector<8x8xf32>
    %129 = arith.addf %125, %128 : vector<8x8xf32>
    %cst_112 = arith.constant dense<0.000000e+00> : vector<8x8xf32>
    %130 = tpu.matmul %115, %122, %cst_112 {dimension_numbers = #tpu.dot_dimension_numbers<[1], [1], [0], [0], [0, 0, 1, 0], [], []>} : vector<8x8xf32>, vector<8x8xf32>, vector<8x8xf32> -> vector<8x8xf32>
    %cst_113 = arith.constant 0.353553385 : f32
    %131 = vector.broadcast %cst_113 : f32 to vector<8x8xf32>
    %132 = arith.mulf %130, %131 : vector<8x8xf32>
    %133 = vector.broadcast %3 : vector<1x8xf32> to vector<8x8xf32>
    %134 = arith.addf %132, %133 : vector<8x8xf32>
    %cst_114 = arith.constant dense<0xFF800000> : vector<8xf32>
    %135 = vector.multi_reduction <maximumf>, %134, %cst_114 [1] : vector<8x8xf32> to vector<8xf32>
    %136 = vector.shape_cast %135 : vector<8xf32> to vector<8x1xf32>
    %137 = vector.broadcast %136 : vector<8x1xf32> to vector<8x8xf32>
    %138 = arith.subf %134, %137 : vector<8x8xf32>
    %139 = math.exp %138 : vector<8x8xf32>
    %cst_115 = arith.constant dense<0.000000e+00> : vector<8xf32>
    %140 = vector.multi_reduction <add>, %139, %cst_115 [1] : vector<8x8xf32> to vector<8xf32>
    %141 = vector.shape_cast %140 : vector<8xf32> to vector<8x1xf32>
    %142 = tpu.reciprocal %141 {approx = true} : vector<8x1xf32> -> vector<8x1xf32>
    %143 = vector.broadcast %142 : vector<8x1xf32> to vector<8x8xf32>
    %144 = arith.mulf %139, %143 : vector<8x8xf32>
    %cst_116 = arith.constant dense<0.000000e+00> : vector<8x8xf32>
    %145 = tpu.matmul %144, %129, %cst_116 {dimension_numbers = #tpu.dot_dimension_numbers<[1], [0], [0], [1], [0, 0, 1, 1], [], []>} : vector<8x8xf32>, vector<8x8xf32>, vector<8x8xf32> -> vector<8x8xf32>
    %c0_117 = arith.constant 0 : index
    %c2_118 = arith.constant 2 : index
    %c0_119 = arith.constant 0 : index
    %c0_120 = arith.constant 0 : index
    %146 = vector.load %arg11[%c0_117, %c2_118, %c0_119, %c0_120] : memref<2x4x8x32xf32, #tpu.memory_space<vmem>>, vector<1x1x8x32xf32>
    %147 = vector.shape_cast %146 : vector<1x1x8x32xf32> to vector<8x32xf32>
    %cst_121 = arith.constant dense<0.000000e+00> : vector<8x32xf32>
    %148 = tpu.matmul %145, %147, %cst_121 {dimension_numbers = #tpu.dot_dimension_numbers<[1], [0], [0], [1], [0, 0, 1, 1], [], []>} : vector<8x8xf32>, vector<8x32xf32>, vector<8x32xf32> -> vector<8x32xf32>
    %149 = arith.addf %108, %148 : vector<8x32xf32>
    %c0_122 = arith.constant 0 : index
    %c3 = arith.constant 3 : index
    %c0_123 = arith.constant 0 : index
    %c0_124 = arith.constant 0 : index
    %150 = vector.load %arg5[%c0_122, %c3, %c0_123, %c0_124] : memref<2x4x32x8xf32, #tpu.memory_space<vmem>>, vector<1x1x32x8xf32>
    %151 = vector.shape_cast %150 : vector<1x1x32x8xf32> to vector<32x8xf32>
    %cst_125 = arith.constant dense<0.000000e+00> : vector<8x8xf32>
    %152 = tpu.matmul %27, %151, %cst_125 {dimension_numbers = #tpu.dot_dimension_numbers<[1], [0], [0], [1], [0, 0, 1, 1], [], []>} : vector<8x32xf32>, vector<32x8xf32>, vector<8x8xf32> -> vector<8x8xf32>
    %c0_126 = arith.constant 0 : index
    %c3_127 = arith.constant 3 : index
    %c0_128 = arith.constant 0 : index
    %c0_129 = arith.constant 0 : index
    %153 = vector.load %arg6[%c0_126, %c3_127, %c0_128, %c0_129] : memref<2x4x1x8xf32, #tpu.memory_space<vmem>>, vector<1x1x1x8xf32>
    %154 = vector.shape_cast %153 : vector<1x1x1x8xf32> to vector<1x8xf32>
    %155 = vector.broadcast %154 : vector<1x8xf32> to vector<8x8xf32>
    %156 = arith.addf %152, %155 : vector<8x8xf32>
    %c0_130 = arith.constant 0 : index
    %c3_131 = arith.constant 3 : index
    %c0_132 = arith.constant 0 : index
    %c0_133 = arith.constant 0 : index
    %157 = vector.load %arg7[%c0_130, %c3_131, %c0_132, %c0_133] : memref<2x4x32x8xf32, #tpu.memory_space<vmem>>, vector<1x1x32x8xf32>
    %158 = vector.shape_cast %157 : vector<1x1x32x8xf32> to vector<32x8xf32>
    %cst_134 = arith.constant dense<0.000000e+00> : vector<8x8xf32>
    %159 = tpu.matmul %27, %158, %cst_134 {dimension_numbers = #tpu.dot_dimension_numbers<[1], [0], [0], [1], [0, 0, 1, 1], [], []>} : vector<8x32xf32>, vector<32x8xf32>, vector<8x8xf32> -> vector<8x8xf32>
    %c0_135 = arith.constant 0 : index
    %c3_136 = arith.constant 3 : index
    %c0_137 = arith.constant 0 : index
    %c0_138 = arith.constant 0 : index
    %160 = vector.load %arg8[%c0_135, %c3_136, %c0_137, %c0_138] : memref<2x4x1x8xf32, #tpu.memory_space<vmem>>, vector<1x1x1x8xf32>
    %161 = vector.shape_cast %160 : vector<1x1x1x8xf32> to vector<1x8xf32>
    %162 = vector.broadcast %161 : vector<1x8xf32> to vector<8x8xf32>
    %163 = arith.addf %159, %162 : vector<8x8xf32>
    %c0_139 = arith.constant 0 : index
    %c3_140 = arith.constant 3 : index
    %c0_141 = arith.constant 0 : index
    %c0_142 = arith.constant 0 : index
    %164 = vector.load %arg9[%c0_139, %c3_140, %c0_141, %c0_142] : memref<2x4x32x8xf32, #tpu.memory_space<vmem>>, vector<1x1x32x8xf32>
    %165 = vector.shape_cast %164 : vector<1x1x32x8xf32> to vector<32x8xf32>
    %cst_143 = arith.constant dense<0.000000e+00> : vector<8x8xf32>
    %166 = tpu.matmul %27, %165, %cst_143 {dimension_numbers = #tpu.dot_dimension_numbers<[1], [0], [0], [1], [0, 0, 1, 1], [], []>} : vector<8x32xf32>, vector<32x8xf32>, vector<8x8xf32> -> vector<8x8xf32>
    %c0_144 = arith.constant 0 : index
    %c3_145 = arith.constant 3 : index
    %c0_146 = arith.constant 0 : index
    %c0_147 = arith.constant 0 : index
    %167 = vector.load %arg10[%c0_144, %c3_145, %c0_146, %c0_147] : memref<2x4x1x8xf32, #tpu.memory_space<vmem>>, vector<1x1x1x8xf32>
    %168 = vector.shape_cast %167 : vector<1x1x1x8xf32> to vector<1x8xf32>
    %169 = vector.broadcast %168 : vector<1x8xf32> to vector<8x8xf32>
    %170 = arith.addf %166, %169 : vector<8x8xf32>
    %cst_148 = arith.constant dense<0.000000e+00> : vector<8x8xf32>
    %171 = tpu.matmul %156, %163, %cst_148 {dimension_numbers = #tpu.dot_dimension_numbers<[1], [1], [0], [0], [0, 0, 1, 0], [], []>} : vector<8x8xf32>, vector<8x8xf32>, vector<8x8xf32> -> vector<8x8xf32>
    %cst_149 = arith.constant 0.353553385 : f32
    %172 = vector.broadcast %cst_149 : f32 to vector<8x8xf32>
    %173 = arith.mulf %171, %172 : vector<8x8xf32>
    %174 = vector.broadcast %3 : vector<1x8xf32> to vector<8x8xf32>
    %175 = arith.addf %173, %174 : vector<8x8xf32>
    %cst_150 = arith.constant dense<0xFF800000> : vector<8xf32>
    %176 = vector.multi_reduction <maximumf>, %175, %cst_150 [1] : vector<8x8xf32> to vector<8xf32>
    %177 = vector.shape_cast %176 : vector<8xf32> to vector<8x1xf32>
    %178 = vector.broadcast %177 : vector<8x1xf32> to vector<8x8xf32>
    %179 = arith.subf %175, %178 : vector<8x8xf32>
    %180 = math.exp %179 : vector<8x8xf32>
    %cst_151 = arith.constant dense<0.000000e+00> : vector<8xf32>
    %181 = vector.multi_reduction <add>, %180, %cst_151 [1] : vector<8x8xf32> to vector<8xf32>
    %182 = vector.shape_cast %181 : vector<8xf32> to vector<8x1xf32>
    %183 = tpu.reciprocal %182 {approx = true} : vector<8x1xf32> -> vector<8x1xf32>
    %184 = vector.broadcast %183 : vector<8x1xf32> to vector<8x8xf32>
    %185 = arith.mulf %180, %184 : vector<8x8xf32>
    %cst_152 = arith.constant dense<0.000000e+00> : vector<8x8xf32>
    %186 = tpu.matmul %185, %170, %cst_152 {dimension_numbers = #tpu.dot_dimension_numbers<[1], [0], [0], [1], [0, 0, 1, 1], [], []>} : vector<8x8xf32>, vector<8x8xf32>, vector<8x8xf32> -> vector<8x8xf32>
    %c0_153 = arith.constant 0 : index
    %c3_154 = arith.constant 3 : index
    %c0_155 = arith.constant 0 : index
    %c0_156 = arith.constant 0 : index
    %187 = vector.load %arg11[%c0_153, %c3_154, %c0_155, %c0_156] : memref<2x4x8x32xf32, #tpu.memory_space<vmem>>, vector<1x1x8x32xf32>
    %188 = vector.shape_cast %187 : vector<1x1x8x32xf32> to vector<8x32xf32>
    %cst_157 = arith.constant dense<0.000000e+00> : vector<8x32xf32>
    %189 = tpu.matmul %186, %188, %cst_157 {dimension_numbers = #tpu.dot_dimension_numbers<[1], [0], [0], [1], [0, 0, 1, 1], [], []>} : vector<8x8xf32>, vector<8x32xf32>, vector<8x32xf32> -> vector<8x32xf32>
    %190 = arith.addf %149, %189 : vector<8x32xf32>
    %c0_158 = arith.constant 0 : index
    %c0_159 = arith.constant 0 : index
    %c0_160 = arith.constant 0 : index
    %191 = vector.load %arg12[%c0_158, %c0_159, %c0_160] : memref<2x1x32xf32, #tpu.memory_space<vmem>>, vector<1x1x32xf32>
    %192 = vector.shape_cast %191 : vector<1x1x32xf32> to vector<1x32xf32>
    %193 = vector.broadcast %192 : vector<1x32xf32> to vector<8x32xf32>
    %194 = arith.addf %190, %193 : vector<8x32xf32>
    %195 = arith.addf %27, %194 : vector<8x32xf32>
    %c0_161 = arith.constant 0 : index
    %c0_162 = arith.constant 0 : index
    %c0_163 = arith.constant 0 : index
    %196 = vector.load %arg13[%c0_161, %c0_162, %c0_163] : memref<2x1x32xf32, #tpu.memory_space<vmem>>, vector<1x1x32xf32>
    %197 = vector.shape_cast %196 : vector<1x1x32xf32> to vector<1x32xf32>
    %c0_164 = arith.constant 0 : index
    %c0_165 = arith.constant 0 : index
    %c0_166 = arith.constant 0 : index
    %198 = vector.load %arg14[%c0_164, %c0_165, %c0_166] : memref<2x1x32xf32, #tpu.memory_space<vmem>>, vector<1x1x32xf32>
    %199 = vector.shape_cast %198 : vector<1x1x32xf32> to vector<1x32xf32>
    %cst_167 = arith.constant dense<0.000000e+00> : vector<8xf32>
    %200 = vector.multi_reduction <add>, %195, %cst_167 [1] : vector<8x32xf32> to vector<8xf32>
    %201 = vector.shape_cast %200 : vector<8xf32> to vector<8x1xf32>
    %cst_168 = arith.constant 3.200000e+01 : f32
    %202 = vector.broadcast %cst_168 : f32 to vector<8x1xf32>
    %203 = arith.divf %201, %202 : vector<8x1xf32>
    %204 = vector.broadcast %203 : vector<8x1xf32> to vector<8x32xf32>
    %205 = arith.subf %195, %204 : vector<8x32xf32>
    %206 = arith.mulf %205, %205 : vector<8x32xf32>
    %cst_169 = arith.constant dense<0.000000e+00> : vector<8xf32>
    %207 = vector.multi_reduction <add>, %206, %cst_169 [1] : vector<8x32xf32> to vector<8xf32>
    %208 = vector.shape_cast %207 : vector<8xf32> to vector<8x1xf32>
    %cst_170 = arith.constant 3.200000e+01 : f32
    %209 = vector.broadcast %cst_170 : f32 to vector<8x1xf32>
    %210 = arith.divf %208, %209 : vector<8x1xf32>
    %211 = vector.broadcast %203 : vector<8x1xf32> to vector<8x32xf32>
    %212 = arith.subf %195, %211 : vector<8x32xf32>
    %cst_171 = arith.constant 9.99999974E-6 : f32
    %213 = vector.broadcast %cst_171 : f32 to vector<8x1xf32>
    %214 = arith.addf %210, %213 : vector<8x1xf32>
    %215 = math.rsqrt %214 : vector<8x1xf32>
    %216 = vector.broadcast %215 : vector<8x1xf32> to vector<8x32xf32>
    %217 = arith.mulf %212, %216 : vector<8x32xf32>
    %218 = vector.broadcast %197 : vector<1x32xf32> to vector<8x32xf32>
    %219 = arith.mulf %217, %218 : vector<8x32xf32>
    %220 = vector.broadcast %199 : vector<1x32xf32> to vector<8x32xf32>
    %221 = arith.addf %219, %220 : vector<8x32xf32>
    %c0_172 = arith.constant 0 : index
    %c0_173 = arith.constant 0 : index
    %c0_174 = arith.constant 0 : index
    %222 = vector.load %arg15[%c0_172, %c0_173, %c0_174] : memref<2x32x64xf32, #tpu.memory_space<vmem>>, vector<1x32x64xf32>
    %223 = vector.shape_cast %222 : vector<1x32x64xf32> to vector<32x64xf32>
    %cst_175 = arith.constant dense<0.000000e+00> : vector<8x64xf32>
    %224 = tpu.matmul %221, %223, %cst_175 {dimension_numbers = #tpu.dot_dimension_numbers<[1], [0], [0], [1], [0, 0, 1, 1], [], []>} : vector<8x32xf32>, vector<32x64xf32>, vector<8x64xf32> -> vector<8x64xf32>
    %c0_176 = arith.constant 0 : index
    %c0_177 = arith.constant 0 : index
    %c0_178 = arith.constant 0 : index
    %225 = vector.load %arg16[%c0_176, %c0_177, %c0_178] : memref<2x1x64xf32, #tpu.memory_space<vmem>>, vector<1x1x64xf32>
    %226 = vector.shape_cast %225 : vector<1x1x64xf32> to vector<1x64xf32>
    %227 = vector.broadcast %226 : vector<1x64xf32> to vector<8x64xf32>
    %228 = arith.addf %224, %227 : vector<8x64xf32>
    %229 = arith.mulf %228, %228 : vector<8x64xf32>
    %230 = arith.mulf %228, %229 : vector<8x64xf32>
    %cst_179 = arith.constant 4.471500e-02 : f32
    %231 = vector.broadcast %cst_179 : f32 to vector<8x64xf32>
    %232 = arith.mulf %231, %230 : vector<8x64xf32>
    %233 = arith.addf %228, %232 : vector<8x64xf32>
    %cst_180 = arith.constant 0.797884583 : f32
    %234 = vector.broadcast %cst_180 : f32 to vector<8x64xf32>
    %235 = arith.mulf %234, %233 : vector<8x64xf32>
    %236 = math.tanh %235 : vector<8x64xf32>
    %cst_181 = arith.constant 1.000000e+00 : f32
    %237 = vector.broadcast %cst_181 : f32 to vector<8x64xf32>
    %238 = arith.addf %237, %236 : vector<8x64xf32>
    %cst_182 = arith.constant 5.000000e-01 : f32
    %239 = vector.broadcast %cst_182 : f32 to vector<8x64xf32>
    %240 = arith.mulf %239, %238 : vector<8x64xf32>
    %241 = arith.mulf %228, %240 : vector<8x64xf32>
    %c0_183 = arith.constant 0 : index
    %c0_184 = arith.constant 0 : index
    %c0_185 = arith.constant 0 : index
    %242 = vector.load %arg17[%c0_183, %c0_184, %c0_185] : memref<2x64x32xf32, #tpu.memory_space<vmem>>, vector<1x64x32xf32>
    %243 = vector.shape_cast %242 : vector<1x64x32xf32> to vector<64x32xf32>
    %cst_186 = arith.constant dense<0.000000e+00> : vector<8x32xf32>
    %244 = tpu.matmul %241, %243, %cst_186 {dimension_numbers = #tpu.dot_dimension_numbers<[1], [0], [0], [1], [0, 0, 1, 1], [], []>} : vector<8x64xf32>, vector<64x32xf32>, vector<8x32xf32> -> vector<8x32xf32>
    %c0_187 = arith.constant 0 : index
    %c0_188 = arith.constant 0 : index
    %c0_189 = arith.constant 0 : index
    %245 = vector.load %arg18[%c0_187, %c0_188, %c0_189] : memref<2x1x32xf32, #tpu.memory_space<vmem>>, vector<1x1x32xf32>
    %246 = vector.shape_cast %245 : vector<1x1x32xf32> to vector<1x32xf32>
    %247 = vector.broadcast %246 : vector<1x32xf32> to vector<8x32xf32>
    %248 = arith.addf %244, %247 : vector<8x32xf32>
    %249 = arith.addf %221, %248 : vector<8x32xf32>
    %c0_190 = arith.constant 0 : index
    %c0_191 = arith.constant 0 : index
    %c0_192 = arith.constant 0 : index
    %250 = vector.load %arg19[%c0_190, %c0_191, %c0_192] : memref<2x1x32xf32, #tpu.memory_space<vmem>>, vector<1x1x32xf32>
    %251 = vector.shape_cast %250 : vector<1x1x32xf32> to vector<1x32xf32>
    %c0_193 = arith.constant 0 : index
    %c0_194 = arith.constant 0 : index
    %c0_195 = arith.constant 0 : index
    %252 = vector.load %arg20[%c0_193, %c0_194, %c0_195] : memref<2x1x32xf32, #tpu.memory_space<vmem>>, vector<1x1x32xf32>
    %253 = vector.shape_cast %252 : vector<1x1x32xf32> to vector<1x32xf32>
    %cst_196 = arith.constant dense<0.000000e+00> : vector<8xf32>
    %254 = vector.multi_reduction <add>, %249, %cst_196 [1] : vector<8x32xf32> to vector<8xf32>
    %255 = vector.shape_cast %254 : vector<8xf32> to vector<8x1xf32>
    %cst_197 = arith.constant 3.200000e+01 : f32
    %256 = vector.broadcast %cst_197 : f32 to vector<8x1xf32>
    %257 = arith.divf %255, %256 : vector<8x1xf32>
    %258 = vector.broadcast %257 : vector<8x1xf32> to vector<8x32xf32>
    %259 = arith.subf %249, %258 : vector<8x32xf32>
    %260 = arith.mulf %259, %259 : vector<8x32xf32>
    %cst_198 = arith.constant dense<0.000000e+00> : vector<8xf32>
    %261 = vector.multi_reduction <add>, %260, %cst_198 [1] : vector<8x32xf32> to vector<8xf32>
    %262 = vector.shape_cast %261 : vector<8xf32> to vector<8x1xf32>
    %cst_199 = arith.constant 3.200000e+01 : f32
    %263 = vector.broadcast %cst_199 : f32 to vector<8x1xf32>
    %264 = arith.divf %262, %263 : vector<8x1xf32>
    %265 = vector.broadcast %257 : vector<8x1xf32> to vector<8x32xf32>
    %266 = arith.subf %249, %265 : vector<8x32xf32>
    %cst_200 = arith.constant 9.99999974E-6 : f32
    %267 = vector.broadcast %cst_200 : f32 to vector<8x1xf32>
    %268 = arith.addf %264, %267 : vector<8x1xf32>
    %269 = math.rsqrt %268 : vector<8x1xf32>
    %270 = vector.broadcast %269 : vector<8x1xf32> to vector<8x32xf32>
    %271 = arith.mulf %266, %270 : vector<8x32xf32>
    %272 = vector.broadcast %251 : vector<1x32xf32> to vector<8x32xf32>
    %273 = arith.mulf %271, %272 : vector<8x32xf32>
    %274 = vector.broadcast %253 : vector<1x32xf32> to vector<8x32xf32>
    %275 = arith.addf %273, %274 : vector<8x32xf32>
    %c1_201 = arith.constant 1 : index
    %c0_202 = arith.constant 0 : index
    %c0_203 = arith.constant 0 : index
    %c0_204 = arith.constant 0 : index
    %276 = vector.load %arg5[%c1_201, %c0_202, %c0_203, %c0_204] : memref<2x4x32x8xf32, #tpu.memory_space<vmem>>, vector<1x1x32x8xf32>
    %277 = vector.shape_cast %276 : vector<1x1x32x8xf32> to vector<32x8xf32>
    %cst_205 = arith.constant dense<0.000000e+00> : vector<8x8xf32>
    %278 = tpu.matmul %275, %277, %cst_205 {dimension_numbers = #tpu.dot_dimension_numbers<[1], [0], [0], [1], [0, 0, 1, 1], [], []>} : vector<8x32xf32>, vector<32x8xf32>, vector<8x8xf32> -> vector<8x8xf32>
    %c1_206 = arith.constant 1 : index
    %c0_207 = arith.constant 0 : index
    %c0_208 = arith.constant 0 : index
    %c0_209 = arith.constant 0 : index
    %279 = vector.load %arg6[%c1_206, %c0_207, %c0_208, %c0_209] : memref<2x4x1x8xf32, #tpu.memory_space<vmem>>, vector<1x1x1x8xf32>
    %280 = vector.shape_cast %279 : vector<1x1x1x8xf32> to vector<1x8xf32>
    %281 = vector.broadcast %280 : vector<1x8xf32> to vector<8x8xf32>
    %282 = arith.addf %278, %281 : vector<8x8xf32>
    %c1_210 = arith.constant 1 : index
    %c0_211 = arith.constant 0 : index
    %c0_212 = arith.constant 0 : index
    %c0_213 = arith.constant 0 : index
    %283 = vector.load %arg7[%c1_210, %c0_211, %c0_212, %c0_213] : memref<2x4x32x8xf32, #tpu.memory_space<vmem>>, vector<1x1x32x8xf32>
    %284 = vector.shape_cast %283 : vector<1x1x32x8xf32> to vector<32x8xf32>
    %cst_214 = arith.constant dense<0.000000e+00> : vector<8x8xf32>
    %285 = tpu.matmul %275, %284, %cst_214 {dimension_numbers = #tpu.dot_dimension_numbers<[1], [0], [0], [1], [0, 0, 1, 1], [], []>} : vector<8x32xf32>, vector<32x8xf32>, vector<8x8xf32> -> vector<8x8xf32>
    %c1_215 = arith.constant 1 : index
    %c0_216 = arith.constant 0 : index
    %c0_217 = arith.constant 0 : index
    %c0_218 = arith.constant 0 : index
    %286 = vector.load %arg8[%c1_215, %c0_216, %c0_217, %c0_218] : memref<2x4x1x8xf32, #tpu.memory_space<vmem>>, vector<1x1x1x8xf32>
    %287 = vector.shape_cast %286 : vector<1x1x1x8xf32> to vector<1x8xf32>
    %288 = vector.broadcast %287 : vector<1x8xf32> to vector<8x8xf32>
    %289 = arith.addf %285, %288 : vector<8x8xf32>
    %c1_219 = arith.constant 1 : index
    %c0_220 = arith.constant 0 : index
    %c0_221 = arith.constant 0 : index
    %c0_222 = arith.constant 0 : index
    %290 = vector.load %arg9[%c1_219, %c0_220, %c0_221, %c0_222] : memref<2x4x32x8xf32, #tpu.memory_space<vmem>>, vector<1x1x32x8xf32>
    %291 = vector.shape_cast %290 : vector<1x1x32x8xf32> to vector<32x8xf32>
    %cst_223 = arith.constant dense<0.000000e+00> : vector<8x8xf32>
    %292 = tpu.matmul %275, %291, %cst_223 {dimension_numbers = #tpu.dot_dimension_numbers<[1], [0], [0], [1], [0, 0, 1, 1], [], []>} : vector<8x32xf32>, vector<32x8xf32>, vector<8x8xf32> -> vector<8x8xf32>
    %c1_224 = arith.constant 1 : index
    %c0_225 = arith.constant 0 : index
    %c0_226 = arith.constant 0 : index
    %c0_227 = arith.constant 0 : index
    %293 = vector.load %arg10[%c1_224, %c0_225, %c0_226, %c0_227] : memref<2x4x1x8xf32, #tpu.memory_space<vmem>>, vector<1x1x1x8xf32>
    %294 = vector.shape_cast %293 : vector<1x1x1x8xf32> to vector<1x8xf32>
    %295 = vector.broadcast %294 : vector<1x8xf32> to vector<8x8xf32>
    %296 = arith.addf %292, %295 : vector<8x8xf32>
    %cst_228 = arith.constant dense<0.000000e+00> : vector<8x8xf32>
    %297 = tpu.matmul %282, %289, %cst_228 {dimension_numbers = #tpu.dot_dimension_numbers<[1], [1], [0], [0], [0, 0, 1, 0], [], []>} : vector<8x8xf32>, vector<8x8xf32>, vector<8x8xf32> -> vector<8x8xf32>
    %cst_229 = arith.constant 0.353553385 : f32
    %298 = vector.broadcast %cst_229 : f32 to vector<8x8xf32>
    %299 = arith.mulf %297, %298 : vector<8x8xf32>
    %300 = vector.broadcast %3 : vector<1x8xf32> to vector<8x8xf32>
    %301 = arith.addf %299, %300 : vector<8x8xf32>
    %cst_230 = arith.constant dense<0xFF800000> : vector<8xf32>
    %302 = vector.multi_reduction <maximumf>, %301, %cst_230 [1] : vector<8x8xf32> to vector<8xf32>
    %303 = vector.shape_cast %302 : vector<8xf32> to vector<8x1xf32>
    %304 = vector.broadcast %303 : vector<8x1xf32> to vector<8x8xf32>
    %305 = arith.subf %301, %304 : vector<8x8xf32>
    %306 = math.exp %305 : vector<8x8xf32>
    %cst_231 = arith.constant dense<0.000000e+00> : vector<8xf32>
    %307 = vector.multi_reduction <add>, %306, %cst_231 [1] : vector<8x8xf32> to vector<8xf32>
    %308 = vector.shape_cast %307 : vector<8xf32> to vector<8x1xf32>
    %309 = tpu.reciprocal %308 {approx = true} : vector<8x1xf32> -> vector<8x1xf32>
    %310 = vector.broadcast %309 : vector<8x1xf32> to vector<8x8xf32>
    %311 = arith.mulf %306, %310 : vector<8x8xf32>
    %cst_232 = arith.constant dense<0.000000e+00> : vector<8x8xf32>
    %312 = tpu.matmul %311, %296, %cst_232 {dimension_numbers = #tpu.dot_dimension_numbers<[1], [0], [0], [1], [0, 0, 1, 1], [], []>} : vector<8x8xf32>, vector<8x8xf32>, vector<8x8xf32> -> vector<8x8xf32>
    %c1_233 = arith.constant 1 : index
    %c0_234 = arith.constant 0 : index
    %c0_235 = arith.constant 0 : index
    %c0_236 = arith.constant 0 : index
    %313 = vector.load %arg11[%c1_233, %c0_234, %c0_235, %c0_236] : memref<2x4x8x32xf32, #tpu.memory_space<vmem>>, vector<1x1x8x32xf32>
    %314 = vector.shape_cast %313 : vector<1x1x8x32xf32> to vector<8x32xf32>
    %cst_237 = arith.constant dense<0.000000e+00> : vector<8x32xf32>
    %315 = tpu.matmul %312, %314, %cst_237 {dimension_numbers = #tpu.dot_dimension_numbers<[1], [0], [0], [1], [0, 0, 1, 1], [], []>} : vector<8x8xf32>, vector<8x32xf32>, vector<8x32xf32> -> vector<8x32xf32>
    %c1_238 = arith.constant 1 : index
    %c1_239 = arith.constant 1 : index
    %c0_240 = arith.constant 0 : index
    %c0_241 = arith.constant 0 : index
    %316 = vector.load %arg5[%c1_238, %c1_239, %c0_240, %c0_241] : memref<2x4x32x8xf32, #tpu.memory_space<vmem>>, vector<1x1x32x8xf32>
    %317 = vector.shape_cast %316 : vector<1x1x32x8xf32> to vector<32x8xf32>
    %cst_242 = arith.constant dense<0.000000e+00> : vector<8x8xf32>
    %318 = tpu.matmul %275, %317, %cst_242 {dimension_numbers = #tpu.dot_dimension_numbers<[1], [0], [0], [1], [0, 0, 1, 1], [], []>} : vector<8x32xf32>, vector<32x8xf32>, vector<8x8xf32> -> vector<8x8xf32>
    %c1_243 = arith.constant 1 : index
    %c1_244 = arith.constant 1 : index
    %c0_245 = arith.constant 0 : index
    %c0_246 = arith.constant 0 : index
    %319 = vector.load %arg6[%c1_243, %c1_244, %c0_245, %c0_246] : memref<2x4x1x8xf32, #tpu.memory_space<vmem>>, vector<1x1x1x8xf32>
    %320 = vector.shape_cast %319 : vector<1x1x1x8xf32> to vector<1x8xf32>
    %321 = vector.broadcast %320 : vector<1x8xf32> to vector<8x8xf32>
    %322 = arith.addf %318, %321 : vector<8x8xf32>
    %c1_247 = arith.constant 1 : index
    %c1_248 = arith.constant 1 : index
    %c0_249 = arith.constant 0 : index
    %c0_250 = arith.constant 0 : index
    %323 = vector.load %arg7[%c1_247, %c1_248, %c0_249, %c0_250] : memref<2x4x32x8xf32, #tpu.memory_space<vmem>>, vector<1x1x32x8xf32>
    %324 = vector.shape_cast %323 : vector<1x1x32x8xf32> to vector<32x8xf32>
    %cst_251 = arith.constant dense<0.000000e+00> : vector<8x8xf32>
    %325 = tpu.matmul %275, %324, %cst_251 {dimension_numbers = #tpu.dot_dimension_numbers<[1], [0], [0], [1], [0, 0, 1, 1], [], []>} : vector<8x32xf32>, vector<32x8xf32>, vector<8x8xf32> -> vector<8x8xf32>
    %c1_252 = arith.constant 1 : index
    %c1_253 = arith.constant 1 : index
    %c0_254 = arith.constant 0 : index
    %c0_255 = arith.constant 0 : index
    %326 = vector.load %arg8[%c1_252, %c1_253, %c0_254, %c0_255] : memref<2x4x1x8xf32, #tpu.memory_space<vmem>>, vector<1x1x1x8xf32>
    %327 = vector.shape_cast %326 : vector<1x1x1x8xf32> to vector<1x8xf32>
    %328 = vector.broadcast %327 : vector<1x8xf32> to vector<8x8xf32>
    %329 = arith.addf %325, %328 : vector<8x8xf32>
    %c1_256 = arith.constant 1 : index
    %c1_257 = arith.constant 1 : index
    %c0_258 = arith.constant 0 : index
    %c0_259 = arith.constant 0 : index
    %330 = vector.load %arg9[%c1_256, %c1_257, %c0_258, %c0_259] : memref<2x4x32x8xf32, #tpu.memory_space<vmem>>, vector<1x1x32x8xf32>
    %331 = vector.shape_cast %330 : vector<1x1x32x8xf32> to vector<32x8xf32>
    %cst_260 = arith.constant dense<0.000000e+00> : vector<8x8xf32>
    %332 = tpu.matmul %275, %331, %cst_260 {dimension_numbers = #tpu.dot_dimension_numbers<[1], [0], [0], [1], [0, 0, 1, 1], [], []>} : vector<8x32xf32>, vector<32x8xf32>, vector<8x8xf32> -> vector<8x8xf32>
    %c1_261 = arith.constant 1 : index
    %c1_262 = arith.constant 1 : index
    %c0_263 = arith.constant 0 : index
    %c0_264 = arith.constant 0 : index
    %333 = vector.load %arg10[%c1_261, %c1_262, %c0_263, %c0_264] : memref<2x4x1x8xf32, #tpu.memory_space<vmem>>, vector<1x1x1x8xf32>
    %334 = vector.shape_cast %333 : vector<1x1x1x8xf32> to vector<1x8xf32>
    %335 = vector.broadcast %334 : vector<1x8xf32> to vector<8x8xf32>
    %336 = arith.addf %332, %335 : vector<8x8xf32>
    %cst_265 = arith.constant dense<0.000000e+00> : vector<8x8xf32>
    %337 = tpu.matmul %322, %329, %cst_265 {dimension_numbers = #tpu.dot_dimension_numbers<[1], [1], [0], [0], [0, 0, 1, 0], [], []>} : vector<8x8xf32>, vector<8x8xf32>, vector<8x8xf32> -> vector<8x8xf32>
    %cst_266 = arith.constant 0.353553385 : f32
    %338 = vector.broadcast %cst_266 : f32 to vector<8x8xf32>
    %339 = arith.mulf %337, %338 : vector<8x8xf32>
    %340 = vector.broadcast %3 : vector<1x8xf32> to vector<8x8xf32>
    %341 = arith.addf %339, %340 : vector<8x8xf32>
    %cst_267 = arith.constant dense<0xFF800000> : vector<8xf32>
    %342 = vector.multi_reduction <maximumf>, %341, %cst_267 [1] : vector<8x8xf32> to vector<8xf32>
    %343 = vector.shape_cast %342 : vector<8xf32> to vector<8x1xf32>
    %344 = vector.broadcast %343 : vector<8x1xf32> to vector<8x8xf32>
    %345 = arith.subf %341, %344 : vector<8x8xf32>
    %346 = math.exp %345 : vector<8x8xf32>
    %cst_268 = arith.constant dense<0.000000e+00> : vector<8xf32>
    %347 = vector.multi_reduction <add>, %346, %cst_268 [1] : vector<8x8xf32> to vector<8xf32>
    %348 = vector.shape_cast %347 : vector<8xf32> to vector<8x1xf32>
    %349 = tpu.reciprocal %348 {approx = true} : vector<8x1xf32> -> vector<8x1xf32>
    %350 = vector.broadcast %349 : vector<8x1xf32> to vector<8x8xf32>
    %351 = arith.mulf %346, %350 : vector<8x8xf32>
    %cst_269 = arith.constant dense<0.000000e+00> : vector<8x8xf32>
    %352 = tpu.matmul %351, %336, %cst_269 {dimension_numbers = #tpu.dot_dimension_numbers<[1], [0], [0], [1], [0, 0, 1, 1], [], []>} : vector<8x8xf32>, vector<8x8xf32>, vector<8x8xf32> -> vector<8x8xf32>
    %c1_270 = arith.constant 1 : index
    %c1_271 = arith.constant 1 : index
    %c0_272 = arith.constant 0 : index
    %c0_273 = arith.constant 0 : index
    %353 = vector.load %arg11[%c1_270, %c1_271, %c0_272, %c0_273] : memref<2x4x8x32xf32, #tpu.memory_space<vmem>>, vector<1x1x8x32xf32>
    %354 = vector.shape_cast %353 : vector<1x1x8x32xf32> to vector<8x32xf32>
    %cst_274 = arith.constant dense<0.000000e+00> : vector<8x32xf32>
    %355 = tpu.matmul %352, %354, %cst_274 {dimension_numbers = #tpu.dot_dimension_numbers<[1], [0], [0], [1], [0, 0, 1, 1], [], []>} : vector<8x8xf32>, vector<8x32xf32>, vector<8x32xf32> -> vector<8x32xf32>
    %356 = arith.addf %315, %355 : vector<8x32xf32>
    %c1_275 = arith.constant 1 : index
    %c2_276 = arith.constant 2 : index
    %c0_277 = arith.constant 0 : index
    %c0_278 = arith.constant 0 : index
    %357 = vector.load %arg5[%c1_275, %c2_276, %c0_277, %c0_278] : memref<2x4x32x8xf32, #tpu.memory_space<vmem>>, vector<1x1x32x8xf32>
    %358 = vector.shape_cast %357 : vector<1x1x32x8xf32> to vector<32x8xf32>
    %cst_279 = arith.constant dense<0.000000e+00> : vector<8x8xf32>
    %359 = tpu.matmul %275, %358, %cst_279 {dimension_numbers = #tpu.dot_dimension_numbers<[1], [0], [0], [1], [0, 0, 1, 1], [], []>} : vector<8x32xf32>, vector<32x8xf32>, vector<8x8xf32> -> vector<8x8xf32>
    %c1_280 = arith.constant 1 : index
    %c2_281 = arith.constant 2 : index
    %c0_282 = arith.constant 0 : index
    %c0_283 = arith.constant 0 : index
    %360 = vector.load %arg6[%c1_280, %c2_281, %c0_282, %c0_283] : memref<2x4x1x8xf32, #tpu.memory_space<vmem>>, vector<1x1x1x8xf32>
    %361 = vector.shape_cast %360 : vector<1x1x1x8xf32> to vector<1x8xf32>
    %362 = vector.broadcast %361 : vector<1x8xf32> to vector<8x8xf32>
    %363 = arith.addf %359, %362 : vector<8x8xf32>
    %c1_284 = arith.constant 1 : index
    %c2_285 = arith.constant 2 : index
    %c0_286 = arith.constant 0 : index
    %c0_287 = arith.constant 0 : index
    %364 = vector.load %arg7[%c1_284, %c2_285, %c0_286, %c0_287] : memref<2x4x32x8xf32, #tpu.memory_space<vmem>>, vector<1x1x32x8xf32>
    %365 = vector.shape_cast %364 : vector<1x1x32x8xf32> to vector<32x8xf32>
    %cst_288 = arith.constant dense<0.000000e+00> : vector<8x8xf32>
    %366 = tpu.matmul %275, %365, %cst_288 {dimension_numbers = #tpu.dot_dimension_numbers<[1], [0], [0], [1], [0, 0, 1, 1], [], []>} : vector<8x32xf32>, vector<32x8xf32>, vector<8x8xf32> -> vector<8x8xf32>
    %c1_289 = arith.constant 1 : index
    %c2_290 = arith.constant 2 : index
    %c0_291 = arith.constant 0 : index
    %c0_292 = arith.constant 0 : index
    %367 = vector.load %arg8[%c1_289, %c2_290, %c0_291, %c0_292] : memref<2x4x1x8xf32, #tpu.memory_space<vmem>>, vector<1x1x1x8xf32>
    %368 = vector.shape_cast %367 : vector<1x1x1x8xf32> to vector<1x8xf32>
    %369 = vector.broadcast %368 : vector<1x8xf32> to vector<8x8xf32>
    %370 = arith.addf %366, %369 : vector<8x8xf32>
    %c1_293 = arith.constant 1 : index
    %c2_294 = arith.constant 2 : index
    %c0_295 = arith.constant 0 : index
    %c0_296 = arith.constant 0 : index
    %371 = vector.load %arg9[%c1_293, %c2_294, %c0_295, %c0_296] : memref<2x4x32x8xf32, #tpu.memory_space<vmem>>, vector<1x1x32x8xf32>
    %372 = vector.shape_cast %371 : vector<1x1x32x8xf32> to vector<32x8xf32>
    %cst_297 = arith.constant dense<0.000000e+00> : vector<8x8xf32>
    %373 = tpu.matmul %275, %372, %cst_297 {dimension_numbers = #tpu.dot_dimension_numbers<[1], [0], [0], [1], [0, 0, 1, 1], [], []>} : vector<8x32xf32>, vector<32x8xf32>, vector<8x8xf32> -> vector<8x8xf32>
    %c1_298 = arith.constant 1 : index
    %c2_299 = arith.constant 2 : index
    %c0_300 = arith.constant 0 : index
    %c0_301 = arith.constant 0 : index
    %374 = vector.load %arg10[%c1_298, %c2_299, %c0_300, %c0_301] : memref<2x4x1x8xf32, #tpu.memory_space<vmem>>, vector<1x1x1x8xf32>
    %375 = vector.shape_cast %374 : vector<1x1x1x8xf32> to vector<1x8xf32>
    %376 = vector.broadcast %375 : vector<1x8xf32> to vector<8x8xf32>
    %377 = arith.addf %373, %376 : vector<8x8xf32>
    %cst_302 = arith.constant dense<0.000000e+00> : vector<8x8xf32>
    %378 = tpu.matmul %363, %370, %cst_302 {dimension_numbers = #tpu.dot_dimension_numbers<[1], [1], [0], [0], [0, 0, 1, 0], [], []>} : vector<8x8xf32>, vector<8x8xf32>, vector<8x8xf32> -> vector<8x8xf32>
    %cst_303 = arith.constant 0.353553385 : f32
    %379 = vector.broadcast %cst_303 : f32 to vector<8x8xf32>
    %380 = arith.mulf %378, %379 : vector<8x8xf32>
    %381 = vector.broadcast %3 : vector<1x8xf32> to vector<8x8xf32>
    %382 = arith.addf %380, %381 : vector<8x8xf32>
    %cst_304 = arith.constant dense<0xFF800000> : vector<8xf32>
    %383 = vector.multi_reduction <maximumf>, %382, %cst_304 [1] : vector<8x8xf32> to vector<8xf32>
    %384 = vector.shape_cast %383 : vector<8xf32> to vector<8x1xf32>
    %385 = vector.broadcast %384 : vector<8x1xf32> to vector<8x8xf32>
    %386 = arith.subf %382, %385 : vector<8x8xf32>
    %387 = math.exp %386 : vector<8x8xf32>
    %cst_305 = arith.constant dense<0.000000e+00> : vector<8xf32>
    %388 = vector.multi_reduction <add>, %387, %cst_305 [1] : vector<8x8xf32> to vector<8xf32>
    %389 = vector.shape_cast %388 : vector<8xf32> to vector<8x1xf32>
    %390 = tpu.reciprocal %389 {approx = true} : vector<8x1xf32> -> vector<8x1xf32>
    %391 = vector.broadcast %390 : vector<8x1xf32> to vector<8x8xf32>
    %392 = arith.mulf %387, %391 : vector<8x8xf32>
    %cst_306 = arith.constant dense<0.000000e+00> : vector<8x8xf32>
    %393 = tpu.matmul %392, %377, %cst_306 {dimension_numbers = #tpu.dot_dimension_numbers<[1], [0], [0], [1], [0, 0, 1, 1], [], []>} : vector<8x8xf32>, vector<8x8xf32>, vector<8x8xf32> -> vector<8x8xf32>
    %c1_307 = arith.constant 1 : index
    %c2_308 = arith.constant 2 : index
    %c0_309 = arith.constant 0 : index
    %c0_310 = arith.constant 0 : index
    %394 = vector.load %arg11[%c1_307, %c2_308, %c0_309, %c0_310] : memref<2x4x8x32xf32, #tpu.memory_space<vmem>>, vector<1x1x8x32xf32>
    %395 = vector.shape_cast %394 : vector<1x1x8x32xf32> to vector<8x32xf32>
    %cst_311 = arith.constant dense<0.000000e+00> : vector<8x32xf32>
    %396 = tpu.matmul %393, %395, %cst_311 {dimension_numbers = #tpu.dot_dimension_numbers<[1], [0], [0], [1], [0, 0, 1, 1], [], []>} : vector<8x8xf32>, vector<8x32xf32>, vector<8x32xf32> -> vector<8x32xf32>
    %397 = arith.addf %356, %396 : vector<8x32xf32>
    %c1_312 = arith.constant 1 : index
    %c3_313 = arith.constant 3 : index
    %c0_314 = arith.constant 0 : index
    %c0_315 = arith.constant 0 : index
    %398 = vector.load %arg5[%c1_312, %c3_313, %c0_314, %c0_315] : memref<2x4x32x8xf32, #tpu.memory_space<vmem>>, vector<1x1x32x8xf32>
    %399 = vector.shape_cast %398 : vector<1x1x32x8xf32> to vector<32x8xf32>
    %cst_316 = arith.constant dense<0.000000e+00> : vector<8x8xf32>
    %400 = tpu.matmul %275, %399, %cst_316 {dimension_numbers = #tpu.dot_dimension_numbers<[1], [0], [0], [1], [0, 0, 1, 1], [], []>} : vector<8x32xf32>, vector<32x8xf32>, vector<8x8xf32> -> vector<8x8xf32>
    %c1_317 = arith.constant 1 : index
    %c3_318 = arith.constant 3 : index
    %c0_319 = arith.constant 0 : index
    %c0_320 = arith.constant 0 : index
    %401 = vector.load %arg6[%c1_317, %c3_318, %c0_319, %c0_320] : memref<2x4x1x8xf32, #tpu.memory_space<vmem>>, vector<1x1x1x8xf32>
    %402 = vector.shape_cast %401 : vector<1x1x1x8xf32> to vector<1x8xf32>
    %403 = vector.broadcast %402 : vector<1x8xf32> to vector<8x8xf32>
    %404 = arith.addf %400, %403 : vector<8x8xf32>
    %c1_321 = arith.constant 1 : index
    %c3_322 = arith.constant 3 : index
    %c0_323 = arith.constant 0 : index
    %c0_324 = arith.constant 0 : index
    %405 = vector.load %arg7[%c1_321, %c3_322, %c0_323, %c0_324] : memref<2x4x32x8xf32, #tpu.memory_space<vmem>>, vector<1x1x32x8xf32>
    %406 = vector.shape_cast %405 : vector<1x1x32x8xf32> to vector<32x8xf32>
    %cst_325 = arith.constant dense<0.000000e+00> : vector<8x8xf32>
    %407 = tpu.matmul %275, %406, %cst_325 {dimension_numbers = #tpu.dot_dimension_numbers<[1], [0], [0], [1], [0, 0, 1, 1], [], []>} : vector<8x32xf32>, vector<32x8xf32>, vector<8x8xf32> -> vector<8x8xf32>
    %c1_326 = arith.constant 1 : index
    %c3_327 = arith.constant 3 : index
    %c0_328 = arith.constant 0 : index
    %c0_329 = arith.constant 0 : index
    %408 = vector.load %arg8[%c1_326, %c3_327, %c0_328, %c0_329] : memref<2x4x1x8xf32, #tpu.memory_space<vmem>>, vector<1x1x1x8xf32>
    %409 = vector.shape_cast %408 : vector<1x1x1x8xf32> to vector<1x8xf32>
    %410 = vector.broadcast %409 : vector<1x8xf32> to vector<8x8xf32>
    %411 = arith.addf %407, %410 : vector<8x8xf32>
    %c1_330 = arith.constant 1 : index
    %c3_331 = arith.constant 3 : index
    %c0_332 = arith.constant 0 : index
    %c0_333 = arith.constant 0 : index
    %412 = vector.load %arg9[%c1_330, %c3_331, %c0_332, %c0_333] : memref<2x4x32x8xf32, #tpu.memory_space<vmem>>, vector<1x1x32x8xf32>
    %413 = vector.shape_cast %412 : vector<1x1x32x8xf32> to vector<32x8xf32>
    %cst_334 = arith.constant dense<0.000000e+00> : vector<8x8xf32>
    %414 = tpu.matmul %275, %413, %cst_334 {dimension_numbers = #tpu.dot_dimension_numbers<[1], [0], [0], [1], [0, 0, 1, 1], [], []>} : vector<8x32xf32>, vector<32x8xf32>, vector<8x8xf32> -> vector<8x8xf32>
    %c1_335 = arith.constant 1 : index
    %c3_336 = arith.constant 3 : index
    %c0_337 = arith.constant 0 : index
    %c0_338 = arith.constant 0 : index
    %415 = vector.load %arg10[%c1_335, %c3_336, %c0_337, %c0_338] : memref<2x4x1x8xf32, #tpu.memory_space<vmem>>, vector<1x1x1x8xf32>
    %416 = vector.shape_cast %415 : vector<1x1x1x8xf32> to vector<1x8xf32>
    %417 = vector.broadcast %416 : vector<1x8xf32> to vector<8x8xf32>
    %418 = arith.addf %414, %417 : vector<8x8xf32>
    %cst_339 = arith.constant dense<0.000000e+00> : vector<8x8xf32>
    %419 = tpu.matmul %404, %411, %cst_339 {dimension_numbers = #tpu.dot_dimension_numbers<[1], [1], [0], [0], [0, 0, 1, 0], [], []>} : vector<8x8xf32>, vector<8x8xf32>, vector<8x8xf32> -> vector<8x8xf32>
    %cst_340 = arith.constant 0.353553385 : f32
    %420 = vector.broadcast %cst_340 : f32 to vector<8x8xf32>
    %421 = arith.mulf %419, %420 : vector<8x8xf32>
    %422 = vector.broadcast %3 : vector<1x8xf32> to vector<8x8xf32>
    %423 = arith.addf %421, %422 : vector<8x8xf32>
    %cst_341 = arith.constant dense<0xFF800000> : vector<8xf32>
    %424 = vector.multi_reduction <maximumf>, %423, %cst_341 [1] : vector<8x8xf32> to vector<8xf32>
    %425 = vector.shape_cast %424 : vector<8xf32> to vector<8x1xf32>
    %426 = vector.broadcast %425 : vector<8x1xf32> to vector<8x8xf32>
    %427 = arith.subf %423, %426 : vector<8x8xf32>
    %428 = math.exp %427 : vector<8x8xf32>
    %cst_342 = arith.constant dense<0.000000e+00> : vector<8xf32>
    %429 = vector.multi_reduction <add>, %428, %cst_342 [1] : vector<8x8xf32> to vector<8xf32>
    %430 = vector.shape_cast %429 : vector<8xf32> to vector<8x1xf32>
    %431 = tpu.reciprocal %430 {approx = true} : vector<8x1xf32> -> vector<8x1xf32>
    %432 = vector.broadcast %431 : vector<8x1xf32> to vector<8x8xf32>
    %433 = arith.mulf %428, %432 : vector<8x8xf32>
    %cst_343 = arith.constant dense<0.000000e+00> : vector<8x8xf32>
    %434 = tpu.matmul %433, %418, %cst_343 {dimension_numbers = #tpu.dot_dimension_numbers<[1], [0], [0], [1], [0, 0, 1, 1], [], []>} : vector<8x8xf32>, vector<8x8xf32>, vector<8x8xf32> -> vector<8x8xf32>
    %c1_344 = arith.constant 1 : index
    %c3_345 = arith.constant 3 : index
    %c0_346 = arith.constant 0 : index
    %c0_347 = arith.constant 0 : index
    %435 = vector.load %arg11[%c1_344, %c3_345, %c0_346, %c0_347] : memref<2x4x8x32xf32, #tpu.memory_space<vmem>>, vector<1x1x8x32xf32>
    %436 = vector.shape_cast %435 : vector<1x1x8x32xf32> to vector<8x32xf32>
    %cst_348 = arith.constant dense<0.000000e+00> : vector<8x32xf32>
    %437 = tpu.matmul %434, %436, %cst_348 {dimension_numbers = #tpu.dot_dimension_numbers<[1], [0], [0], [1], [0, 0, 1, 1], [], []>} : vector<8x8xf32>, vector<8x32xf32>, vector<8x32xf32> -> vector<8x32xf32>
    %438 = arith.addf %397, %437 : vector<8x32xf32>
    %c1_349 = arith.constant 1 : index
    %c0_350 = arith.constant 0 : index
    %c0_351 = arith.constant 0 : index
    %439 = vector.load %arg12[%c1_349, %c0_350, %c0_351] : memref<2x1x32xf32, #tpu.memory_space<vmem>>, vector<1x1x32xf32>
    %440 = vector.shape_cast %439 : vector<1x1x32xf32> to vector<1x32xf32>
    %441 = vector.broadcast %440 : vector<1x32xf32> to vector<8x32xf32>
    %442 = arith.addf %438, %441 : vector<8x32xf32>
    %443 = arith.addf %275, %442 : vector<8x32xf32>
    %c1_352 = arith.constant 1 : index
    %c0_353 = arith.constant 0 : index
    %c0_354 = arith.constant 0 : index
    %444 = vector.load %arg13[%c1_352, %c0_353, %c0_354] : memref<2x1x32xf32, #tpu.memory_space<vmem>>, vector<1x1x32xf32>
    %445 = vector.shape_cast %444 : vector<1x1x32xf32> to vector<1x32xf32>
    %c1_355 = arith.constant 1 : index
    %c0_356 = arith.constant 0 : index
    %c0_357 = arith.constant 0 : index
    %446 = vector.load %arg14[%c1_355, %c0_356, %c0_357] : memref<2x1x32xf32, #tpu.memory_space<vmem>>, vector<1x1x32xf32>
    %447 = vector.shape_cast %446 : vector<1x1x32xf32> to vector<1x32xf32>
    %cst_358 = arith.constant dense<0.000000e+00> : vector<8xf32>
    %448 = vector.multi_reduction <add>, %443, %cst_358 [1] : vector<8x32xf32> to vector<8xf32>
    %449 = vector.shape_cast %448 : vector<8xf32> to vector<8x1xf32>
    %cst_359 = arith.constant 3.200000e+01 : f32
    %450 = vector.broadcast %cst_359 : f32 to vector<8x1xf32>
    %451 = arith.divf %449, %450 : vector<8x1xf32>
    %452 = vector.broadcast %451 : vector<8x1xf32> to vector<8x32xf32>
    %453 = arith.subf %443, %452 : vector<8x32xf32>
    %454 = arith.mulf %453, %453 : vector<8x32xf32>
    %cst_360 = arith.constant dense<0.000000e+00> : vector<8xf32>
    %455 = vector.multi_reduction <add>, %454, %cst_360 [1] : vector<8x32xf32> to vector<8xf32>
    %456 = vector.shape_cast %455 : vector<8xf32> to vector<8x1xf32>
    %cst_361 = arith.constant 3.200000e+01 : f32
    %457 = vector.broadcast %cst_361 : f32 to vector<8x1xf32>
    %458 = arith.divf %456, %457 : vector<8x1xf32>
    %459 = vector.broadcast %451 : vector<8x1xf32> to vector<8x32xf32>
    %460 = arith.subf %443, %459 : vector<8x32xf32>
    %cst_362 = arith.constant 9.99999974E-6 : f32
    %461 = vector.broadcast %cst_362 : f32 to vector<8x1xf32>
    %462 = arith.addf %458, %461 : vector<8x1xf32>
    %463 = math.rsqrt %462 : vector<8x1xf32>
    %464 = vector.broadcast %463 : vector<8x1xf32> to vector<8x32xf32>
    %465 = arith.mulf %460, %464 : vector<8x32xf32>
    %466 = vector.broadcast %445 : vector<1x32xf32> to vector<8x32xf32>
    %467 = arith.mulf %465, %466 : vector<8x32xf32>
    %468 = vector.broadcast %447 : vector<1x32xf32> to vector<8x32xf32>
    %469 = arith.addf %467, %468 : vector<8x32xf32>
    %c1_363 = arith.constant 1 : index
    %c0_364 = arith.constant 0 : index
    %c0_365 = arith.constant 0 : index
    %470 = vector.load %arg15[%c1_363, %c0_364, %c0_365] : memref<2x32x64xf32, #tpu.memory_space<vmem>>, vector<1x32x64xf32>
    %471 = vector.shape_cast %470 : vector<1x32x64xf32> to vector<32x64xf32>
    %cst_366 = arith.constant dense<0.000000e+00> : vector<8x64xf32>
    %472 = tpu.matmul %469, %471, %cst_366 {dimension_numbers = #tpu.dot_dimension_numbers<[1], [0], [0], [1], [0, 0, 1, 1], [], []>} : vector<8x32xf32>, vector<32x64xf32>, vector<8x64xf32> -> vector<8x64xf32>
    %c1_367 = arith.constant 1 : index
    %c0_368 = arith.constant 0 : index
    %c0_369 = arith.constant 0 : index
    %473 = vector.load %arg16[%c1_367, %c0_368, %c0_369] : memref<2x1x64xf32, #tpu.memory_space<vmem>>, vector<1x1x64xf32>
    %474 = vector.shape_cast %473 : vector<1x1x64xf32> to vector<1x64xf32>
    %475 = vector.broadcast %474 : vector<1x64xf32> to vector<8x64xf32>
    %476 = arith.addf %472, %475 : vector<8x64xf32>
    %477 = arith.mulf %476, %476 : vector<8x64xf32>
    %478 = arith.mulf %476, %477 : vector<8x64xf32>
    %cst_370 = arith.constant 4.471500e-02 : f32
    %479 = vector.broadcast %cst_370 : f32 to vector<8x64xf32>
    %480 = arith.mulf %479, %478 : vector<8x64xf32>
    %481 = arith.addf %476, %480 : vector<8x64xf32>
    %cst_371 = arith.constant 0.797884583 : f32
    %482 = vector.broadcast %cst_371 : f32 to vector<8x64xf32>
    %483 = arith.mulf %482, %481 : vector<8x64xf32>
    %484 = math.tanh %483 : vector<8x64xf32>
    %cst_372 = arith.constant 1.000000e+00 : f32
    %485 = vector.broadcast %cst_372 : f32 to vector<8x64xf32>
    %486 = arith.addf %485, %484 : vector<8x64xf32>
    %cst_373 = arith.constant 5.000000e-01 : f32
    %487 = vector.broadcast %cst_373 : f32 to vector<8x64xf32>
    %488 = arith.mulf %487, %486 : vector<8x64xf32>
    %489 = arith.mulf %476, %488 : vector<8x64xf32>
    %c1_374 = arith.constant 1 : index
    %c0_375 = arith.constant 0 : index
    %c0_376 = arith.constant 0 : index
    %490 = vector.load %arg17[%c1_374, %c0_375, %c0_376] : memref<2x64x32xf32, #tpu.memory_space<vmem>>, vector<1x64x32xf32>
    %491 = vector.shape_cast %490 : vector<1x64x32xf32> to vector<64x32xf32>
    %cst_377 = arith.constant dense<0.000000e+00> : vector<8x32xf32>
    %492 = tpu.matmul %489, %491, %cst_377 {dimension_numbers = #tpu.dot_dimension_numbers<[1], [0], [0], [1], [0, 0, 1, 1], [], []>} : vector<8x64xf32>, vector<64x32xf32>, vector<8x32xf32> -> vector<8x32xf32>
    %c1_378 = arith.constant 1 : index
    %c0_379 = arith.constant 0 : index
    %c0_380 = arith.constant 0 : index
    %493 = vector.load %arg18[%c1_378, %c0_379, %c0_380] : memref<2x1x32xf32, #tpu.memory_space<vmem>>, vector<1x1x32xf32>
    %494 = vector.shape_cast %493 : vector<1x1x32xf32> to vector<1x32xf32>
    %495 = vector.broadcast %494 : vector<1x32xf32> to vector<8x32xf32>
    %496 = arith.addf %492, %495 : vector<8x32xf32>
    %497 = arith.addf %469, %496 : vector<8x32xf32>
    %c1_381 = arith.constant 1 : index
    %c0_382 = arith.constant 0 : index
    %c0_383 = arith.constant 0 : index
    %498 = vector.load %arg19[%c1_381, %c0_382, %c0_383] : memref<2x1x32xf32, #tpu.memory_space<vmem>>, vector<1x1x32xf32>
    %499 = vector.shape_cast %498 : vector<1x1x32xf32> to vector<1x32xf32>
    %c1_384 = arith.constant 1 : index
    %c0_385 = arith.constant 0 : index
    %c0_386 = arith.constant 0 : index
    %500 = vector.load %arg20[%c1_384, %c0_385, %c0_386] : memref<2x1x32xf32, #tpu.memory_space<vmem>>, vector<1x1x32xf32>
    %501 = vector.shape_cast %500 : vector<1x1x32xf32> to vector<1x32xf32>
    %cst_387 = arith.constant dense<0.000000e+00> : vector<8xf32>
    %502 = vector.multi_reduction <add>, %497, %cst_387 [1] : vector<8x32xf32> to vector<8xf32>
    %503 = vector.shape_cast %502 : vector<8xf32> to vector<8x1xf32>
    %cst_388 = arith.constant 3.200000e+01 : f32
    %504 = vector.broadcast %cst_388 : f32 to vector<8x1xf32>
    %505 = arith.divf %503, %504 : vector<8x1xf32>
    %506 = vector.broadcast %505 : vector<8x1xf32> to vector<8x32xf32>
    %507 = arith.subf %497, %506 : vector<8x32xf32>
    %508 = arith.mulf %507, %507 : vector<8x32xf32>
    %cst_389 = arith.constant dense<0.000000e+00> : vector<8xf32>
    %509 = vector.multi_reduction <add>, %508, %cst_389 [1] : vector<8x32xf32> to vector<8xf32>
    %510 = vector.shape_cast %509 : vector<8xf32> to vector<8x1xf32>
    %cst_390 = arith.constant 3.200000e+01 : f32
    %511 = vector.broadcast %cst_390 : f32 to vector<8x1xf32>
    %512 = arith.divf %510, %511 : vector<8x1xf32>
    %513 = vector.broadcast %505 : vector<8x1xf32> to vector<8x32xf32>
    %514 = arith.subf %497, %513 : vector<8x32xf32>
    %cst_391 = arith.constant 9.99999974E-6 : f32
    %515 = vector.broadcast %cst_391 : f32 to vector<8x1xf32>
    %516 = arith.addf %512, %515 : vector<8x1xf32>
    %517 = math.rsqrt %516 : vector<8x1xf32>
    %518 = vector.broadcast %517 : vector<8x1xf32> to vector<8x32xf32>
    %519 = arith.mulf %514, %518 : vector<8x32xf32>
    %520 = vector.broadcast %499 : vector<1x32xf32> to vector<8x32xf32>
    %521 = arith.mulf %519, %520 : vector<8x32xf32>
    %522 = vector.broadcast %501 : vector<1x32xf32> to vector<8x32xf32>
    %523 = arith.addf %521, %522 : vector<8x32xf32>
    %c0_392 = arith.constant 0 : index
    %c0_393 = arith.constant 0 : index
    %524 = vector.load %arg21[%c0_392, %c0_393] : memref<32x32xf32, #tpu.memory_space<vmem>>, vector<32x32xf32>
    %cst_394 = arith.constant dense<0.000000e+00> : vector<8x32xf32>
    %525 = tpu.matmul %523, %524, %cst_394 {dimension_numbers = #tpu.dot_dimension_numbers<[1], [0], [0], [1], [0, 0, 1, 1], [], []>} : vector<8x32xf32>, vector<32x32xf32>, vector<8x32xf32> -> vector<8x32xf32>
    %c0_395 = arith.constant 0 : index
    %c0_396 = arith.constant 0 : index
    %526 = vector.load %arg22[%c0_395, %c0_396] : memref<1x32xf32, #tpu.memory_space<vmem>>, vector<1x32xf32>
    %527 = vector.broadcast %526 : vector<1x32xf32> to vector<8x32xf32>
    %528 = arith.addf %525, %527 : vector<8x32xf32>
    %529 = math.tanh %528 : vector<8x32xf32>
    %c0_397 = arith.constant 0 : index
    %c0_398 = arith.constant 0 : index
    %530 = vector.load %arg23[%c0_397, %c0_398] : memref<32x1xf32, #tpu.memory_space<vmem>>, vector<32x1xf32>
    %cst_399 = arith.constant dense<0.000000e+00> : vector<8x1xf32>
    %531 = tpu.matmul %529, %530, %cst_399 {dimension_numbers = #tpu.dot_dimension_numbers<[1], [0], [0], [1], [0, 0, 1, 1], [], []>} : vector<8x32xf32>, vector<32x1xf32>, vector<8x1xf32> -> vector<8x1xf32>
    %c0_400 = arith.constant 0 : index
    %c0_401 = arith.constant 0 : index
    %532 = vector.load %arg24[%c0_400, %c0_401] : memref<1x1xf32, #tpu.memory_space<vmem>>, vector<1x1xf32>
    %533 = vector.broadcast %532 : vector<1x1xf32> to vector<8x1xf32>
    %534 = arith.addf %531, %533 : vector<8x1xf32>
    %cst_402 = arith.constant dense<0xFF800000> : vector<1xf32>
    %535 = vector.multi_reduction <maximumf>, %534, %cst_402 [0] : vector<8x1xf32> to vector<1xf32>
    %536 = vector.shape_cast %535 : vector<1xf32> to vector<1x1xf32>
    %537 = vector.broadcast %536 : vector<1x1xf32> to vector<8x1xf32>
    %538 = arith.subf %534, %537 : vector<8x1xf32>
    %539 = math.exp %538 : vector<8x1xf32>
    %cst_403 = arith.constant dense<0.000000e+00> : vector<1xf32>
    %540 = vector.multi_reduction <add>, %539, %cst_403 [0] : vector<8x1xf32> to vector<1xf32>
    %541 = vector.shape_cast %540 : vector<1xf32> to vector<1x1xf32>
    %542 = tpu.reciprocal %541 {approx = true} : vector<1x1xf32> -> vector<1x1xf32>
    %543 = vector.broadcast %542 : vector<1x1xf32> to vector<8x1xf32>
    %544 = arith.mulf %539, %543 : vector<8x1xf32>
    %545 = vector.broadcast %544 : vector<8x1xf32> to vector<8x32xf32>
    %546 = arith.mulf %545, %523 : vector<8x32xf32>
    %cst_404 = arith.constant dense<0.000000e+00> : vector<32xf32>
    %547 = vector.multi_reduction <add>, %546, %cst_404 [0] : vector<8x32xf32> to vector<32xf32>
    %548 = vector.shape_cast %547 : vector<32xf32> to vector<1x32xf32>
    %c0_405 = arith.constant 0 : index
    %c0_406 = arith.constant 0 : index
    %549 = vector.load %arg25[%c0_405, %c0_406] : memref<32x128xf32, #tpu.memory_space<vmem>>, vector<32x128xf32>
    %cst_407 = arith.constant dense<0.000000e+00> : vector<1x128xf32>
    %550 = tpu.matmul %548, %549, %cst_407 {dimension_numbers = #tpu.dot_dimension_numbers<[1], [0], [0], [1], [0, 0, 1, 1], [], []>} : vector<1x32xf32>, vector<32x128xf32>, vector<1x128xf32> -> vector<1x128xf32>
    %c0_408 = arith.constant 0 : index
    %c0_409 = arith.constant 0 : index
    %551 = vector.load %arg26[%c0_408, %c0_409] : memref<1x128xf32, #tpu.memory_space<vmem>>, vector<1x128xf32>
    %552 = arith.addf %550, %551 : vector<1x128xf32>
    %c0_410 = arith.constant 0 : index
    %c0_411 = arith.constant 0 : index
    %c0_412 = arith.constant 0 : index
    %553 = vector.load %arg27[%c0_410, %c0_411, %c0_412] : memref<1x1x128xf32, #tpu.memory_space<vmem>>, vector<1x1x128xf32>
    %554 = vector.shape_cast %553 : vector<1x1x128xf32> to vector<1x128xf32>
    %555 = vector.shape_cast %552 : vector<1x128xf32> to vector<1x1x128xf32>
    tpu.vector_store %arg27[%c0_410, %c0_411, %c0_412], %555 {strides = array<i32>} : memref<1x1x128xf32, #tpu.memory_space<vmem>>, vector<1x1x128xf32>,
    return
  }
  func.func @transform_0(%arg0: i32) -> (i32, i32, i32) {
    %c0_i32 = arith.constant 0 : i32
    %c0_i32_0 = arith.constant 0 : i32
    %c0_i32_1 = arith.constant 0 : i32
    return %arg0, %c0_i32, %c0_i32_0 : i32, i32, i32
  }
  func.func @transform_1(%arg0: i32) -> (i32, i32, i32) {
    %c0_i32 = arith.constant 0 : i32
    %c0_i32_0 = arith.constant 0 : i32
    %c0_i32_1 = arith.constant 0 : i32
    return %arg0, %c0_i32, %c0_i32_0 : i32, i32, i32
  }
  func.func @transform_2(%arg0: i32) -> (i32, i32) {
    %c0_i32 = arith.constant 0 : i32
    %c0_i32_0 = arith.constant 0 : i32
    %c0_i32_1 = arith.constant 0 : i32
    return %c0_i32, %c0_i32_0 : i32, i32
  }
  func.func @transform_3(%arg0: i32) -> (i32, i32) {
    %c0_i32 = arith.constant 0 : i32
    %c0_i32_0 = arith.constant 0 : i32
    %c0_i32_1 = arith.constant 0 : i32
    return %c0_i32, %c0_i32_0 : i32, i32
  }
  func.func @transform_4(%arg0: i32) -> (i32, i32, i32, i32) {
    %c0_i32 = arith.constant 0 : i32
    %c0_i32_0 = arith.constant 0 : i32
    %c0_i32_1 = arith.constant 0 : i32
    %c0_i32_2 = arith.constant 0 : i32
    %c0_i32_3 = arith.constant 0 : i32
    return %c0_i32, %c0_i32_0, %c0_i32_1, %c0_i32_2 : i32, i32, i32, i32
  }
  func.func @transform_5(%arg0: i32) -> (i32, i32, i32, i32) {
    %c0_i32 = arith.constant 0 : i32
    %c0_i32_0 = arith.constant 0 : i32
    %c0_i32_1 = arith.constant 0 : i32
    %c0_i32_2 = arith.constant 0 : i32
    %c0_i32_3 = arith.constant 0 : i32
    return %c0_i32, %c0_i32_0, %c0_i32_1, %c0_i32_2 : i32, i32, i32, i32
  }
  func.func @transform_6(%arg0: i32) -> (i32, i32, i32, i32) {
    %c0_i32 = arith.constant 0 : i32
    %c0_i32_0 = arith.constant 0 : i32
    %c0_i32_1 = arith.constant 0 : i32
    %c0_i32_2 = arith.constant 0 : i32
    %c0_i32_3 = arith.constant 0 : i32
    return %c0_i32, %c0_i32_0, %c0_i32_1, %c0_i32_2 : i32, i32, i32, i32
  }
  func.func @transform_7(%arg0: i32) -> (i32, i32, i32, i32) {
    %c0_i32 = arith.constant 0 : i32
    %c0_i32_0 = arith.constant 0 : i32
    %c0_i32_1 = arith.constant 0 : i32
    %c0_i32_2 = arith.constant 0 : i32
    %c0_i32_3 = arith.constant 0 : i32
    return %c0_i32, %c0_i32_0, %c0_i32_1, %c0_i32_2 : i32, i32, i32, i32
  }
  func.func @transform_8(%arg0: i32) -> (i32, i32, i32, i32) {
    %c0_i32 = arith.constant 0 : i32
    %c0_i32_0 = arith.constant 0 : i32
    %c0_i32_1 = arith.constant 0 : i32
    %c0_i32_2 = arith.constant 0 : i32
    %c0_i32_3 = arith.constant 0 : i32
    return %c0_i32, %c0_i32_0, %c0_i32_1, %c0_i32_2 : i32, i32, i32, i32
  }
  func.func @transform_9(%arg0: i32) -> (i32, i32, i32, i32) {
    %c0_i32 = arith.constant 0 : i32
    %c0_i32_0 = arith.constant 0 : i32
    %c0_i32_1 = arith.constant 0 : i32
    %c0_i32_2 = arith.constant 0 : i32
    %c0_i32_3 = arith.constant 0 : i32
    return %c0_i32, %c0_i32_0, %c0_i32_1, %c0_i32_2 : i32, i32, i32, i32
  }
  func.func @transform_10(%arg0: i32) -> (i32, i32, i32, i32) {
    %c0_i32 = arith.constant 0 : i32
    %c0_i32_0 = arith.constant 0 : i32
    %c0_i32_1 = arith.constant 0 : i32
    %c0_i32_2 = arith.constant 0 : i32
    %c0_i32_3 = arith.constant 0 : i32
    return %c0_i32, %c0_i32_0, %c0_i32_1, %c0_i32_2 : i32, i32, i32, i32
  }
  func.func @transform_11(%arg0: i32) -> (i32, i32, i32) {
    %c0_i32 = arith.constant 0 : i32
    %c0_i32_0 = arith.constant 0 : i32
    %c0_i32_1 = arith.constant 0 : i32
    %c0_i32_2 = arith.constant 0 : i32
    return %c0_i32, %c0_i32_0, %c0_i32_1 : i32, i32, i32
  }
  func.func @transform_12(%arg0: i32) -> (i32, i32, i32) {
    %c0_i32 = arith.constant 0 : i32
    %c0_i32_0 = arith.constant 0 : i32
    %c0_i32_1 = arith.constant 0 : i32
    %c0_i32_2 = arith.constant 0 : i32
    return %c0_i32, %c0_i32_0, %c0_i32_1 : i32, i32, i32
  }
  func.func @transform_13(%arg0: i32) -> (i32, i32, i32) {
    %c0_i32 = arith.constant 0 : i32
    %c0_i32_0 = arith.constant 0 : i32
    %c0_i32_1 = arith.constant 0 : i32
    %c0_i32_2 = arith.constant 0 : i32
    return %c0_i32, %c0_i32_0, %c0_i32_1 : i32, i32, i32
  }
  func.func @transform_14(%arg0: i32) -> (i32, i32, i32) {
    %c0_i32 = arith.constant 0 : i32
    %c0_i32_0 = arith.constant 0 : i32
    %c0_i32_1 = arith.constant 0 : i32
    %c0_i32_2 = arith.constant 0 : i32
    return %c0_i32, %c0_i32_0, %c0_i32_1 : i32, i32, i32
  }
  func.func @transform_15(%arg0: i32) -> (i32, i32, i32) {
    %c0_i32 = arith.constant 0 : i32
    %c0_i32_0 = arith.constant 0 : i32
    %c0_i32_1 = arith.constant 0 : i32
    %c0_i32_2 = arith.constant 0 : i32
    return %c0_i32, %c0_i32_0, %c0_i32_1 : i32, i32, i32
  }
  func.func @transform_16(%arg0: i32) -> (i32, i32, i32) {
    %c0_i32 = arith.constant 0 : i32
    %c0_i32_0 = arith.constant 0 : i32
    %c0_i32_1 = arith.constant 0 : i32
    %c0_i32_2 = arith.constant 0 : i32
    return %c0_i32, %c0_i32_0, %c0_i32_1 : i32, i32, i32
  }
  func.func @transform_17(%arg0: i32) -> (i32, i32, i32) {
    %c0_i32 = arith.constant 0 : i32
    %c0_i32_0 = arith.constant 0 : i32
    %c0_i32_1 = arith.constant 0 : i32
    %c0_i32_2 = arith.constant 0 : i32
    return %c0_i32, %c0_i32_0, %c0_i32_1 : i32, i32, i32
  }
  func.func @transform_18(%arg0: i32) -> (i32, i32, i32) {
    %c0_i32 = arith.constant 0 : i32
    %c0_i32_0 = arith.constant 0 : i32
    %c0_i32_1 = arith.constant 0 : i32
    %c0_i32_2 = arith.constant 0 : i32
    return %c0_i32, %c0_i32_0, %c0_i32_1 : i32, i32, i32
  }
  func.func @transform_19(%arg0: i32) -> (i32, i32, i32) {
    %c0_i32 = arith.constant 0 : i32
    %c0_i32_0 = arith.constant 0 : i32
    %c0_i32_1 = arith.constant 0 : i32
    %c0_i32_2 = arith.constant 0 : i32
    return %c0_i32, %c0_i32_0, %c0_i32_1 : i32, i32, i32
  }
  func.func @transform_20(%arg0: i32) -> (i32, i32) {
    %c0_i32 = arith.constant 0 : i32
    %c0_i32_0 = arith.constant 0 : i32
    %c0_i32_1 = arith.constant 0 : i32
    return %c0_i32, %c0_i32_0 : i32, i32
  }
  func.func @transform_21(%arg0: i32) -> (i32, i32) {
    %c0_i32 = arith.constant 0 : i32
    %c0_i32_0 = arith.constant 0 : i32
    %c0_i32_1 = arith.constant 0 : i32
    return %c0_i32, %c0_i32_0 : i32, i32
  }
  func.func @transform_22(%arg0: i32) -> (i32, i32) {
    %c0_i32 = arith.constant 0 : i32
    %c0_i32_0 = arith.constant 0 : i32
    %c0_i32_1 = arith.constant 0 : i32
    return %c0_i32, %c0_i32_0 : i32, i32
  }
  func.func @transform_23(%arg0: i32) -> (i32, i32) {
    %c0_i32 = arith.constant 0 : i32
    %c0_i32_0 = arith.constant 0 : i32
    %c0_i32_1 = arith.constant 0 : i32
    return %c0_i32, %c0_i32_0 : i32, i32
  }
  func.func @transform_24(%arg0: i32) -> (i32, i32) {
    %c0_i32 = arith.constant 0 : i32
    %c0_i32_0 = arith.constant 0 : i32
    %c0_i32_1 = arith.constant 0 : i32
    return %c0_i32, %c0_i32_0 : i32, i32
  }
  func.func @transform_25(%arg0: i32) -> (i32, i32) {
    %c0_i32 = arith.constant 0 : i32
    %c0_i32_0 = arith.constant 0 : i32
    %c0_i32_1 = arith.constant 0 : i32
    return %c0_i32, %c0_i32_0 : i32, i32
  }
  func.func @transform_26(%arg0: i32) -> (i32, i32, i32) {
    %c0_i32 = arith.constant 0 : i32
    %c0_i32_0 = arith.constant 0 : i32
    %c0_i32_1 = arith.constant 0 : i32
    return %arg0, %c0_i32, %c0_i32_0 : i32, i32, i32
  }
}

</mosaic_0001>

<bundles_post_ra>
// kernel: tpu_custom_call.1
= control target key start
LH: loop header
LB: loop body
LE: loop exit
PB: predicated region body
PF: predicated region fallthrough
CT: control target
= control target key end

     0   :  { %s4108_s0 = inlined_call_operand.vmem [shape: f32[2,8,32], index: 0, kind: input, shape index: {}]   ;;  %s4109_s1 = inlined_call_operand.vmem [shape: f32[2,1,8], index: 1, kind: input, shape index: {}]   ;;  %s4110_s2 = inlined_call_operand.vmem [shape: f32[1,32], index: 2, kind: input, shape index: {}]   ;;  %s4111_s3 = inlined_call_operand.vmem [shape: f32[1,32], index: 3, kind: input, shape index: {}]   ;;  %s4112_s4 = inlined_call_operand.vmem [shape: f32[2,4,32,8], index: 4, kind: input, shape index: {}]   ;;  %s4113_s5 = inlined_call_operand.vmem [shape: f32[2,4,1,8], index: 5, kind: input, shape index: {}]   ;;  %s4114_s6 = inlined_call_operand.vmem [shape: f32[2,4,32,8], index: 6, kind: input, shape index: {}]   ;;  %s4115_s7 = inlined_call_operand.vmem [shape: f32[2,4,1,8], index: 7, kind: input, shape index: {}]   ;;  %s4116_s8 = inlined_call_operand.vmem [shape: f32[2,4,32,8], index: 8, kind: input, shape index: {}]   ;;  %s4117_s9 = inlined_call_operand.vmem [shape: f32[2,4,1,8], index: 9, kind: input, shape index: {}]   ;;  %s4118_s10 = inlined_call_operand.vmem [shape: f32[2,4,8,32], index: 10, kind: input, shape index: {}]   ;;  %s4119_s11 = inlined_call_operand.vmem [shape: f32[2,1,32], index: 11, kind: input, shape index: {}]   ;;  %s4120_s12 = inlined_call_operand.vmem [shape: f32[2,1,32], index: 12, kind: input, shape index: {}]   ;;  %s4121_s13 = inlined_call_operand.vmem [shape: f32[2,1,32], index: 13, kind: input, shape index: {}]   ;;  %s4122_s14 = inlined_call_operand.vmem [shape: f32[2,32,64], index: 14, kind: input, shape index: {}]   ;;  %s4123_s15 = inlined_call_operand.vmem [shape: f32[2,1,64], index: 15, kind: input, shape index: {}]   ;;  %s4124_s16 = inlined_call_operand.vmem [shape: f32[2,64,32], index: 16, kind: input, shape index: {}]   ;;  %s4125_s17 = inlined_call_operand.vmem [shape: f32[2,1,32], index: 17, kind: input, shape index: {}]   ;;  %s4126_s18 = inlined_call_operand.vmem [shape: f32[2,1,32], index: 18, kind: input, shape index: {}]   ;;  %s4127_s19 = inlined_call_operand.vmem [shape: f32[2,1,32], index: 19, kind: input, shape index: {}]   ;;  %s4128_s20 = inlined_call_operand.vmem [shape: f32[32,32], index: 20, kind: input, shape index: {}]   ;;  %s4129_s21 = inlined_call_operand.vmem [shape: f32[1,32], index: 21, kind: input, shape index: {}]   ;;  %s4130_s22 = inlined_call_operand.vmem [shape: f32[32,1], index: 22, kind: input, shape index: {}]   ;;  %s4131_s23 = inlined_call_operand.<no memory space> [shape: f32[1,1], index: 23, kind: input, shape index: {}]   ;;  %s4132_s24 = inlined_call_operand.vmem [shape: f32[32,128], index: 24, kind: input, shape index: {}]   ;;  %s4133_s25 = inlined_call_operand.vmem [shape: f32[1,128], index: 25, kind: input, shape index: {}]   ;;  %s4134_s26 = inlined_call_operand.hbm [shape: f32[2,1,128], index: 26, kind: output, shape index: {}]  }
   0x1   :  { %4159 = sst [smem:[#allocation15_spill]] %s4108_s0  ;;  %v31_v0 = vstv %s4131_s23 }
   0x2   :  { %4160 = sst [smem:[#allocation16_spill]] %s4109_s1  ;;  %32 = vst [vmem:[#allocation2] sm:$0x1] %v31_v0 }
   0x3   :  { %4161 = sst [smem:[#allocation17_spill]] %s4110_s2 }
   0x4   :  { %4162 = sst [smem:[#allocation18_spill]] %s4111_s3 }
   0x5   :  { %4163 = sst [smem:[#allocation19_spill]] %s4112_s4 }
   0x6   :  { %4164 = sst [smem:[#allocation20_spill]] %s4113_s5 }
   0x7   :  { %4165 = sst [smem:[#allocation21_spill]] %s4114_s6 }
   0x8   :  { %4166 = sst [smem:[#allocation22_spill]] %s4115_s7 }
   0x9   :  { %4167 = sst [smem:[#allocation23_spill]] %s4116_s8 }
   0xa   :  { %4168 = sst [smem:[#allocation24_spill]] %s4117_s9 }
   0xb   :  { %4169 = sst [smem:[#allocation25_spill]] %s4118_s10 }
   0xc   :  { %4170 = sst [smem:[#allocation26_spill]] %s4119_s11 }
   0xd   :  { %4171 = sst [smem:[#allocation27_spill]] %s4133_s25 }
   0xe   :  { %4172 = sst [smem:[#allocation28_spill]] %s4134_s26 }
   0xf   :  { %33 = vsyncpa [#allocation4], 0 }
  0x10   :  { %35 = vsyncpa [#allocation4 + $0x1], 0  ;;  %s3316_s7 = smov 0   ;;  %s3318_s28 = smov 0  }
  0x11   :  { %s3320_s8 = smov 0   ;;  %s3322_s4 = smov 0  }
  0x12 LB: > { %4173 = sst [smem:[#allocation6_spill]] %s3162_s7  ;;  %s3337_s23 = sadd.s32 4294967295, %s3174_s4   ;;  %s3174_s4 = sphi %s3322_s4, %s4207_s4   ;;  %s3170_s8 = sphi %s3320_s8, %s4210_s8   ;;  %s3166_s28 = sphi %s3318_s28, %s4209_s28   ;;  %s3162_s7 = sphi %s3316_s7, %s4208_s7  }
  0x13   : > { %4174 = sst [smem:[#allocation7_spill]] %s3166_s28  ;;  %s2771_s29 = sadd.s32 4294967294, %s3174_s4  }
  0x14   : > { %4175 = sst [smem:[#allocation8_spill]] %s3170_s8  ;;  %s3341_s0 = sadd.s32 1, %s3174_s4  }
  0x15   : > { %4176 = sst [smem:[#allocation9_spill]] %s3174_s4  ;;  %s604_s9 = sadd.s32 1, %s3170_s8 }
  0x16   : > { %4177 = sst [smem:[#allocation10_spill]] %s3337_s23  ;;  %s601_s30 = ssub.s32 %s3174_s4, %s3341_s0 }
  0x17   : > { %4178 = sst [smem:[#allocation11_spill]] %s3341_s0  ;;  %p614_p0 = scmp.ne.s32.totalorder %s3170_s8, %s3166_s28 }
  0x18   : > { %p602_p1 = scmp.eq.s32.totalorder %s601_s30, 0  ;;  %p615_p2 = scmp.eq.s32.totalorder %s3337_s23, 1 }
  0x19   : > { %p620_p3 = scmp.ne.s32.totalorder %s3166_s28, %s3162_s7  ;;  %p621_p4 = scmp.eq.s32.totalorder %s2771_s29, 1 }
  0x1a   : > { %s3352_s2 = scalar_select %p602_p1, %s3170_s8, %s604_s9  }
  0x1b   : > { %p3354_p5 = por %p615_p2, %p614_p0  ;;  %p3358_p6 = por %p621_p4, %p620_p3 }
  0x1c   : > { %4179 = sst [smem:[#allocation12_spill]] %s3352_s2  ;;  %p2774_p7 = scmp.ge.s32.totalorder %s3174_s4, 1 }
  0x1d   : > { %s4180_s5 = scalar_select %p3354_p5, 1, 0 }
  0x1e   : > { %s4182_s10 = scalar_select %p3358_p6, 1, 0 }
  0x1f   : > { %4181 = sst [smem:[#allocation13_spill]] %s4180_s5  ;;  %p724_p8 = scmp.lt.s32.totalorder %s3174_s4, 3 }
  0x20   : > { %4183 = sst [smem:[#allocation14_spill]] %s4182_s10 }
  0x21   : > { %p725_p9 = pnand %p2774_p7, %p724_p8 }
  0x22   : > { %p795_p10 = scmp.lt.s32.totalorder (!%p725_p9), %s3337_s23, 1  ;;  %s4184_s29 = sld [smem:[#allocation16_spill]] (!%p725_p9) }
  0x23   : > { %728 = sbr.rel (%p725_p9) target bundleno = 6989 (0x1b4d), region = 124  ;;  %s4185_s8 = sld [smem:[#allocation15_spill]] (!%p725_p9) }
  0x24   : > { %s4186_s2 = sld [smem:[#allocation19_spill]] (!%p725_p9) }
  0x25   : > { %s4187_s3 = sld [smem:[#allocation21_spill]] (!%p725_p9) }
  0x26   : > { %s4188_s10 = sld [smem:[#allocation23_spill]] (!%p725_p9) }
  0x27   : > { %s4191_s7 = sld [smem:[#allocation22_spill]] (!%p725_p9) }
  0x28   : > { %s3366_s6 = scalar_select %p795_p10, %s3337_s23, 1  ;;  %vm806_vm0 = vcmask 261120   ;;  %v3176_v3 = vmov 32.0   ;;  %vm931_vm5 = vcmask 64512   ;;  %vm1644_vm9 = vcmask 523264  }
  0x29   : > { %3058 = vrcp.f32 %v3176_v3  ;;  %s4195_s26 = sld [smem:[#allocation24_spill]] }
  0x2a   : > { %s2775_s1 = sshll.u32 %s3366_s6, 3  ;;  %v847_v15 = vld [vmem:[%s4186_s2 + $0x18] sm:$0xff]  ;;  %v846_v18 = vld [vmem:[%s4186_s2 + $0x10] sm:$0xff]  ;;  %v845_v21 = vld [vmem:[%s4186_s2 + $0x8] sm:$0xff]  ;;  %s4196_s28 = scalar_lea.vmem %s4184_s29, %s3366_s6 }
  0x2b   : > { %s798_s0 = scalar_lea.vmem %s4185_s8, %s2775_s1  ;;  %v878_v16 = vld [vmem:[%s4187_s3 + $0x18] sm:$0xff]  ;;  %867 = vmatpush.msra.mxu0 %v847_v15  ;;  %v877_v19 = vld [vmem:[%s4187_s3 + $0x10] sm:$0xff]  ;;  %v876_v22 = vld [vmem:[%s4187_s3 + $0x8] sm:$0xff]  ;;  %s4189_s8 = sld [smem:[#allocation17_spill]] }
  0x2c   : > { %v802_v1 = vld [vmem:[%s798_s0] sm:$0xff]  ;;  %v906_v17 = vld [vmem:[%s4188_s10 + $0x18] sm:$0xff]  ;;  %895 = vmatpush.msra.mxu1 %v878_v16  ;;  %v905_v20 = vld [vmem:[%s4188_s10 + $0x10] sm:$0xff]  ;;  %s4190_s1 = sld [smem:[#allocation18_spill]] }
  0x2d   : > { %v807_v2 = vsel %vm806_vm0, %v802_v1, 0.0  ;;  %923 = vmatpush.msra.mxu2 %v906_v17  ;;  %868 = vmatpush.msra.mxu0 %v846_v18  ;;  %v904_v23 = vld [vmem:[%s4188_s10 + $0x8] sm:$0xff]  ;;  %v844_v24 = vld [vmem:[%s4186_s2] sm:$0xff]  ;;  %v2785_v27 = vld [vmem:[%s4186_s2 + $0x38] sm:$0xff]  ;;  %s4192_s25 = smov %s4191_s7  ;;  %s4197_s6 = sld [smem:[#allocation25_spill]] }
  0x2e   : > { %808 = vadd.xlane.f32.xlu0 %v807_v2  ;;  %896 = vmatpush.msra.mxu1 %v877_v19  ;;  %v875_v25 = vld [vmem:[%s4187_s3] sm:$0xff]  ;;  %v2791_v28 = vld [vmem:[%s4187_s3 + $0x38] sm:$0xff]  ;;  %v2784_v30 = vld [vmem:[%s4186_s2 + $0x30] sm:$0xff]  ;;  %s4198_s11 = sld [smem:[#allocation26_spill]] }
  0x2f   : > { %v3059_v4 = vpop.eup %3058  ;;  %924 = vmatpush.msra.mxu2 %v905_v20  ;;  %869 = vmatpush.msra.mxu0 %v845_v21  ;;  %v903_v26 = vld [vmem:[%s4188_s10] sm:$0xff]  ;;  %v2797_v29 = vld [vmem:[%s4188_s10 + $0x38] sm:$0xff]  ;;  %v2790_v31 = vld [vmem:[%s4187_s3 + $0x30] sm:$0xff]  ;;  %s4199_s27 = sld [smem:[#allocation7_spill]] }
  0x30   : > { %v811_v5 = vmul.f32 32.0, %v3059_v4  ;;  %vm815_vm1 = vweird.f32 %v3059_v4  ;;  %897 = vmatpush.msra.mxu1 %v876_v22  ;;  %v2796_v32 = vld [vmem:[%s4188_s10 + $0x30] sm:$0xff]  ;;  %v2783_v34 = vld [vmem:[%s4186_s2 + $0x28] sm:$0xff]  ;;  %v2782_v38 = vld [vmem:[%s4186_s2 + $0x20] sm:$0xff]  ;;  %s4200_s4 = sld [smem:[#allocation10_spill]] }
  0x31   : > { %925 = vmatpush.msra.mxu2 %v904_v23  ;;  %870 = vmatpush.msra.mxu0 %v844_v24  ;;  %v2789_v35 = vld [vmem:[%s4187_s3 + $0x28] sm:$0xff]  ;;  %v2788_v39 = vld [vmem:[%s4187_s3 + $0x20] sm:$0xff]  ;;  %v2809_v19 = vld [vmem:[%s4186_s2 + $0x58] sm:$0xff] }
  0x32   : > { %v812_v6 = vsub.f32 1.0, %v811_v5  ;;  %898 = vmatpush.msra.mxu1 %v875_v25  ;;  %v2795_v37 = vld [vmem:[%s4188_s10 + $0x28] sm:$0xff]  ;;  %v2794_v41 = vld [vmem:[%s4188_s10 + $0x20] sm:$0xff]  ;;  %v2808_v20 = vld [vmem:[%s4186_s2 + $0x50] sm:$0xff] }
  0x33   : > { %926 = vmatpush.msra.mxu2 %v903_v26  ;;  %1020 = vmatpush.msrb.mxu0 %v2785_v27  ;;  %v3016_v48 = vld [vmem:[%s4189_s8] ss:$0 sm:$0xff]  ;;  %s4193_s8 = sld [smem:[#allocation20_spill]]  ;;  %v3022_v61 = vld [vmem:[%s4192_s25 + $0x1] ss:$0 sm:$0xff]  ;;  %v2807_v22 = vld [vmem:[%s4186_s2 + $0x48] sm:$0xff] }
  0x34   : > { %v813_v7 = vmul.f32 %v3059_v4, %v812_v6  ;;  %1050 = vmatpush.msrb.mxu1 %v2791_v28  ;;  %v3017_v50 = vld [vmem:[%s4190_s1] ss:$0 sm:$0xff]  ;;  %v3023_v2 = vld [vmem:[%s4195_s26 + $0x1] ss:$0 sm:$0xff]  ;;  %s4201_s1 = sld [smem:[#allocation28_spill]] }
  0x35   : > { %1080 = vmatpush.msrb.mxu2 %v2797_v29  ;;  %1021 = vmatpush.msrb.mxu0 %v2784_v30  ;;  %v3019_v54 = vld [vmem:[%s4191_s7] ss:$0 sm:$0xff]  ;;  %s793_s5 = sand.u32 1, %s4199_s27  }
  0x36   : > { %v814_v8 = vadd.f32 %v3059_v4, %v813_v7  ;;  %1051 = vmatpush.msrb.mxu1 %v2790_v31  ;;  %v3020_v60 = vld [vmem:[%s4195_s26] ss:$0 sm:$0xff] }
  0x37   : > { %1081 = vmatpush.msrb.mxu2 %v2796_v32  ;;  %1022 = vmatpush.msrb.mxu0 %v2783_v34  ;;  %v3502_v5 = vld [vmem:[%s4196_s28] ss:$0 sm:$0xff] }
  0x38   : > { %v3377_v9 = vsel %vm815_vm1, %v3059_v4, %v814_v8  ;;  %1052 = vmatpush.msrb.mxu1 %v2789_v35  ;;  %v2806_v24 = vld [vmem:[%s4186_s2 + $0x40] sm:$0xff] }
  0x39   : > { %1082 = vmatpush.msrb.mxu2 %v2795_v37  ;;  %1023 = vmatpush.msrb.mxu0 %v2782_v38  ;;  %s4194_s0 = smov %s4193_s8  ;;  %v3018_v55 = vld [vmem:[%s4193_s8] ss:$0 sm:$0xff]  ;;  %v2815_v37 = vld [vmem:[%s4187_s3 + $0x58] sm:$0xff]  ;;  %v2814_v38 = vld [vmem:[%s4187_s3 + $0x50] sm:$0xff] }
  0x3a   : > { %1053 = vmatpush.msrb.mxu1 %v2788_v39  ;;  %v3021_v21 = vld [vmem:[%s4194_s0 + $0x1] ss:$0 sm:$0xff]  ;;  %v2813_v39 = vld [vmem:[%s4187_s3 + $0x48] sm:$0xff]  ;;  %s2703_s7 = scalar_lea.hbm %s4201_s1, %s4200_s4 }
  0x3b   : > { %1083 = vmatpush.msrb.mxu2 %v2794_v41  ;;  %v997_v26 = vld [vmem:[%s4197_s6] sm:$0xff] }
  0xa1   : > { %v809_v10 = vpop.xlane.xlu0 %808 }
  0xa2   : > { %v817_v11 = vmul.f32 %v3377_v9, %v809_v10 }
  0xa4   : > { %v3380_v12 = vsub.f32 %v802_v1, %v817_v11 }
  0xa6   : > { %v819_v13 = vmul.f32 %v3380_v12, %v3380_v12 }
  0xa8   : > { %v820_v14 = vsel %vm806_vm0, %v819_v13, 0.0 }
  0xa9   : > { %821 = vadd.xlane.f32.xlu0 %v820_v14 }
 0x11c   : > { %v822_v33 = vpop.xlane.xlu0 %821 }
 0x11d   : > { %v823_v36 = vmul.f32 %v822_v33, %v3377_v9 }
 0x11f   : > { %v824_v40 = vadd.f32 1e-05, %v823_v36 }
 0x121   : > { %3060 = vrsqrt.f32 %v824_v40  ;;  %vm831_vm3 = vweird.f32 %v824_v40 }
 0x127   : > { %v3061_v42 = vpop.eup %3060 }
 0x128   : > { %v826_v43 = vmul.f32 %v3061_v42, %v824_v40  ;;  %vm832_vm2 = vweird.f32 %v3061_v42  ;;  %v2812_v40 = vld [vmem:[%s4187_s3 + $0x40] sm:$0xff] }
 0x129   : > { %vm833_vm4 = vmor %vm831_vm3, %vm832_vm2 }
 0x12a   : > { %v827_v44 = vmul.f32 %v3061_v42, %v826_v43 }
 0x12c   : > { %v828_v45 = vmul.f32 0.5, %v827_v44  ;;  %v2803_v44 = vld [vmem:[%s4197_s6 + $0x8] sm:$0xff] }
 0x12e   : > { %v829_v46 = vsub.f32 1.5, %v828_v45  ;;  %v2821_v45 = vld [vmem:[%s4188_s10 + $0x58] sm:$0xff] }
 0x130   : > { %v830_v47 = vmul.f32 %v3061_v42, %v829_v46  ;;  %v2820_v46 = vld [vmem:[%s4188_s10 + $0x50] sm:$0xff] }
 0x132   : > { %v834_v49 = vsel %vm833_vm4, %v3061_v42, %v830_v47  ;;  %v2819_v47 = vld [vmem:[%s4188_s10 + $0x48] sm:$0xff]  ;;  %vm2632_vm4 = vcmask 7168  }
 0x133   : > { %v835_v51 = vmul.f32 %v834_v49, %v3380_v12  ;;  %v2832_v49 = vld [vmem:[%s4186_s2 + $0x78] sm:$0xff] }
 0x135   : > { %v839_v52 = vmul.f32 %v3016_v48, %v835_v51  ;;  %v2818_v48 = vld [vmem:[%s4188_s10 + $0x40] sm:$0xff]  ;;  %v2831_v51 = vld [vmem:[%s4186_s2 + $0x70] sm:$0xff] }
 0x137   : > { %v3465_v53 = vadd.f32 %v3017_v50, %v839_v52  ;;  %v2830_v52 = vld [vmem:[%s4186_s2 + $0x68] sm:$0xff] }
 0x139   : > { %2776 = vmatmul.msk.f32.vlgmr.msra.gmra.mxu0 %vm806_vm0, %v3465_v53  ;;  %2777 = vmatmul.msk.f32.vlgmr.msra.gmra.mxu1 %vm806_vm0, %v3465_v53 }
 0x13a   : > { %2778 = vmatmul.msk.f32.vlgmr.msra.gmra.mxu2 %vm806_vm0, %v3465_v53  ;;  %1170 = vmatpush.msra.mxu1 %v2803_v44 }
 0x13b   : > { %1193 = vmatpush.msra.mxu2 %v997_v26 }
 0x141   : > { %2787 = vmatmul.msk.f32.vlgmr.msrb.gmra.mxu0 %vm806_vm0, %v3465_v53  ;;  %2793 = vmatmul.msk.f32.vlgmr.msrb.gmra.mxu1 %vm806_vm0, %v3465_v53 }
 0x142   : > { %2799 = vmatmul.msk.f32.vlgmr.msrb.gmra.mxu2 %vm806_vm0, %v3465_v53  ;;  %1280 = vmatpush.msrb.mxu1 %v2821_v45 }
 0x144   : > { %1281 = vmatpush.msrb.mxu1 %v2820_v46 }
 0x146   : > { %1282 = vmatpush.msrb.mxu1 %v2819_v47  ;;  %v2850_v47 = vld [vmem:[%s4197_s6 + $0x18] sm:$0xff] }
 0x148   : > { %1283 = vmatpush.msrb.mxu1 %v2818_v48 }
 0x1b6   : > { %v900_v56 = vpop.f32.mrf.mxu1  ;;  %v872_v57 = vpop.f32.mrf.mxu0 }
 0x1b7   : > { %v901_v58 = vadd.f32 %v3019_v54, %v900_v56  ;;  %v873_v59 = vadd.f32 %v3018_v55, %v872_v57  ;;  %v3025_v54 = vld [vmem:[%s4192_s25 + $0x2] ss:$0 sm:$0xff] }
 0x1b8   : > { %v2829_v55 = vld [vmem:[%s4186_s2 + $0x60] sm:$0xff] }
 0x1b9   : > { %2779 = vmatpush.xpose.msk.msra.mxu3 %vm931_vm5, %v901_v58  ;;  %v3024_v56 = vld [vmem:[%s4194_s0 + $0x2] ss:$0 sm:$0xff] }
 0x1bc   : > { %2780 = vmatmul.msk.f32.vlgmr.msra.gmra.mxu3 %vm931_vm5, %v873_v59 }
 0x1bd   : > { %v928_v62 = vpop.f32.mrf.mxu2 }
 0x1be   : > { %v929_v63 = vadd.f32 %v3020_v60, %v928_v62  ;;  %v1055_v0 = vpop.f32.mrf.mxu1  ;;  %v1025_v23 = vpop.f32.mrf.mxu0  ;;  %v2838_v60 = vld [vmem:[%s4187_s3 + $0x78] sm:$0xff]  ;;  %v2837_v62 = vld [vmem:[%s4187_s3 + $0x70] sm:$0xff] }
 0x1bf   : > { %v1056_v1 = vadd.f32 %v3022_v61, %v1055_v0  ;;  %v1026_v25 = vadd.f32 %v3021_v21, %v1025_v23  ;;  %v2835_v0 = vld [vmem:[%s4187_s3 + $0x60] sm:$0xff]  ;;  %v2843_v23 = vld [vmem:[%s4188_s10 + $0x70] sm:$0xff] }
 0x1c0   : > { %992 = vmatpush.msrb.mxu3 %v929_v63  ;;  %v2836_v63 = vld [vmem:[%s4187_s3 + $0x68] sm:$0xff] }
 0x1c2   : > { %2800 = vmatpush.xpose.msk.msra.mxu3 %vm931_vm5, %v1056_v1  ;;  %v2827_v1 = vld [vmem:[%s4197_s6 + $0x10] sm:$0xff] }
 0x1c5   : > { %v1085_v3 = vpop.f32.mrf.mxu2 }
 0x1c6   : > { %v1086_v4 = vadd.f32 %v3023_v2, %v1085_v3 }
 0x1c8   : > { %1145 = vmatpush.msra.mxu0 %v1086_v4 }
 0x1ca   : > { %1250 = vmatpush.msrb.mxu0 %v2815_v37 }
 0x1cc   : > { %1251 = vmatpush.msrb.mxu0 %v2814_v38 }
 0x1ce   : > { %1252 = vmatpush.msrb.mxu0 %v2813_v39 }
 0x1d0   : > { %1253 = vmatpush.msrb.mxu0 %v2812_v40 }
 0x23f   : > { %v955_v6 = vpop.f32.mrf.mxu3 }
 0x240   : > { %v958_v7 = vmul.f32 0.35355338, %v955_v6  ;;  %v3026_v6 = vld [vmem:[%s4195_s26 + $0x2] ss:$0 sm:$0xff] }
 0x242   : > { %v962_v8 = vadd.f32 %v3502_v5, %v958_v7 }
 0x244   : > { %v963_v10 = vsel %vm931_vm5, %v962_v8, -inf }
 0x245   : > { %964 = vmax.xlane.f32.xlu1 %v963_v10 }
 0x2b8   : > { %v965_v11 = vpop.xlane.xlu1 %964 }
 0x2b9   : > { %v966_v12 = vsub.f32 %v962_v8, %v965_v11 }
 0x2bb   : > { %v967_v13 = vmul.f32 1.442695, %v966_v12 }
 0x2bd   : > { %3062 = vpow2.f32 %v967_v13 }
 0x2c3   : > { %v3063_v14 = vpop.eup %3062 }
 0x2c4   : > { %v969_v15 = vsel %vm931_vm5, %v3063_v14, 0.0 }
 0x2c5   : > { %970 = vadd.xlane.f32.xlu1 %v969_v15 }
 0x338   : > { %v971_v16 = vpop.xlane.xlu1 %970 }
 0x339   : > { %3064 = vrcp.f32 %v971_v16 }
 0x33f   : > { %v3065_v17 = vpop.eup %3064 }
 0x340   : > { %v973_v18 = vmul.f32 %v3065_v17, %v3063_v14  ;;  %v3028_v14 = vld [vmem:[%s4192_s25 + $0x3] ss:$0 sm:$0xff] }
 0x342   : > { %2781 = vmatmul.msk.f32.vlgmr.msrb.gmra.mxu3 %vm931_vm5, %v973_v18 }
 0x343   : > { %1220 = vmatpush.msrb.mxu3 %v2809_v19 }
 0x345   : > { %1221 = vmatpush.msrb.mxu3 %v2808_v20 }
 0x347   : > { %1222 = vmatpush.msrb.mxu3 %v2807_v22  ;;  %v2844_v22 = vld [vmem:[%s4188_s10 + $0x78] sm:$0xff] }
 0x349   : > { %1223 = vmatpush.msrb.mxu3 %v2806_v24  ;;  %v2842_v24 = vld [vmem:[%s4188_s10 + $0x68] sm:$0xff] }
 0x34a   : > { %2801 = vmatmul.msk.f32.vlgmr.msra.gmra.mxu3 %vm931_vm5, %v1026_v25  ;;  %v2841_v25 = vld [vmem:[%s4188_s10 + $0x60] sm:$0xff] }
 0x352   : > { %2811 = vmatmul.msk.f32.vlgmr.msrb.gmra.mxu3 %vm806_vm0, %v3465_v53 }
 0x3c5   : > { %v994_v27 = vpop.f32.mrf.mxu3 }
 0x3c6   : > { %2805 = vmatmul.msk.f32.vlgmr.msra.gmra.mxu2 %vm931_vm5, %v994_v27 }
 0x3cd   : > { %v1111_v28 = vpop.f32.mrf.mxu3 }
 0x3ce   : > { %v1114_v29 = vmul.f32 0.35355338, %v1111_v28 }
 0x3d0   : > { %v1115_v30 = vadd.f32 %v3502_v5, %v1114_v29 }
 0x3d2   : > { %v1116_v31 = vsel %vm931_vm5, %v1115_v30, -inf }
 0x3d3   : > { %1117 = vmax.xlane.f32.xlu2 %v1116_v31 }
 0x3d5   : > { %v1225_v58 = vpop.f32.mrf.mxu3 }
 0x3d6   : > { %v1226_v61 = vadd.f32 %v3024_v56, %v1225_v58 }
 0x446   : > { %v1118_v32 = vpop.xlane.xlu2 %1117 }
 0x447   : > { %v1119_v33 = vsub.f32 %v1115_v30, %v1118_v32  ;;  %v3027_v30 = vld [vmem:[%s4194_s0 + $0x3] ss:$0 sm:$0xff] }
 0x448   : > { %v3029_v32 = vld [vmem:[%s4195_s26 + $0x3] ss:$0 sm:$0xff] }
 0x449   : > { %v1120_v34 = vmul.f32 1.442695, %v1119_v33  ;;  %v1195_v2 = vpop.f32.mrf.mxu2 }
 0x44b   : > { %3066 = vpow2.f32 %v1120_v34 }
 0x451   : > { %v3067_v35 = vpop.eup %3066 }
 0x452   : > { %v1122_v36 = vsel %vm931_vm5, %v3067_v35, 0.0 }
 0x453   : > { %1123 = vadd.xlane.f32.xlu2 %v1122_v36 }
 0x4c6   : > { %v1124_v41 = vpop.xlane.xlu2 %1123 }
 0x4c7   : > { %3068 = vrcp.f32 %v1124_v41 }
 0x4cd   : > { %v3069_v42 = vpop.eup %3068 }
 0x4ce   : > { %v1126_v43 = vmul.f32 %v3069_v42, %v3067_v35 }
 0x4d0   : > { %2802 = vmatmul.msk.f32.vlgmr.msra.gmra.mxu0 %vm931_vm5, %v1126_v43 }
 0x4d1   : > { %1370 = vmatpush.msra.mxu0 %v2827_v1  ;;  %v1593_v1 = vld [vmem:[%s4122_s14 + $0x8] sm:$0xff] }
 0x4d8   : > { %2817 = vmatmul.msk.f32.vlgmr.msrb.gmra.mxu0 %vm806_vm0, %v3465_v53 }
 0x54d   : > { %v1147_v50 = vpop.f32.mrf.mxu0 }
 0x54e   : > { %2804 = vmatmul.msk.f32.vlgmr.msra.gmra.mxu1 %vm931_vm5, %v1147_v50 }
 0x54f   : > { %1398 = vmatpush.msra.mxu1 %v2832_v49 }
 0x551   : > { %1399 = vmatpush.msra.mxu1 %v2831_v51 }
 0x553   : > { %1400 = vmatpush.msra.mxu1 %v2830_v52  ;;  %v3030_v52 = vld [vmem:[%s4198_s11] ss:$0 sm:$0xff] }
 0x555   : > { %v1255_v57 = vpop.f32.mrf.mxu0  ;;  %1401 = vmatpush.msra.mxu1 %v2829_v55 }
 0x556   : > { %v1256_v59 = vadd.f32 %v3025_v54, %v1255_v57  ;;  %2823 = vmatmul.msk.f32.vlgmr.msrb.gmra.mxu1 %vm806_vm0, %v3465_v53 }
 0x558   : > { %2824 = vmatpush.xpose.msk.msrb.mxu2 %vm931_vm5, %v1256_v59 }
 0x55b   : > { %2825 = vmatmul.msk.f32.vlgmr.msrb.gmra.mxu2 %vm931_vm5, %v1226_v61 }
 0x55c   : > { %1428 = vmatpush.msra.mxu2 %v2838_v60 }
 0x55e   : > { %1429 = vmatpush.msra.mxu2 %v2837_v62  ;;  %2834 = vmatmul.msk.f32.vlgmr.msra.gmra.mxu1 %vm806_vm0, %v3465_v53 }
 0x560   : > { %1430 = vmatpush.msra.mxu2 %v2836_v63 }
 0x562   : > { %1431 = vmatpush.msra.mxu2 %v2835_v0  ;;  %v1595_v0 = vld [vmem:[%s4122_s14 + $0x18] sm:$0xff] }
 0x563   : > { %2840 = vmatmul.msk.f32.vlgmr.msra.gmra.mxu2 %vm806_vm0, %v3465_v53 }
 0x564   : > { %1548 = vmatpush.msrb.mxu2 %v2850_v47 }
 0x5cb   : > { %v1172_v3 = vpop.f32.mrf.mxu1 }
 0x5cc   : > { %v1196_v4 = vadd.f32 %v1195_v2, %v1172_v3  ;;  %v1592_v2 = vld [vmem:[%s4122_s14] sm:$0xff] }
 0x5d3   : > { %v1285_v7 = vpop.f32.mrf.mxu1 }
 0x5d4   : > { %v1286_v8 = vadd.f32 %v3026_v6, %v1285_v7 }
 0x5d6   : > { %1345 = vmatpush.msra.mxu3 %v1286_v8 }
 0x5d8   : > { %1458 = vmatpush.msrb.mxu3 %v2844_v22  ;;  %v1637_v22 = vld [vmem:[%s4124_s16 + $0x28] sm:$0xff] }
 0x5da   : > { %1459 = vmatpush.msrb.mxu3 %v2843_v23  ;;  %v1636_v23 = vld [vmem:[%s4124_s16 + $0x20] sm:$0xff] }
 0x5db   : > { %v1403_v31 = vpop.f32.mrf.mxu1 }
 0x5dc   : > { %1460 = vmatpush.msrb.mxu3 %v2842_v24  ;;  %v1404_v33 = vadd.f32 %v3027_v30, %v1403_v31  ;;  %v1635_v24 = vld [vmem:[%s4124_s16 + $0x18] sm:$0xff] }
 0x5de   : > { %v1311_v10 = vpop.f32.mrf.mxu2  ;;  %1461 = vmatpush.msrb.mxu3 %v2841_v25  ;;  %v1634_v25 = vld [vmem:[%s4124_s16 + $0x10] sm:$0xff] }
 0x5df   : > { %v1314_v11 = vmul.f32 0.35355338, %v1311_v10 }
 0x5e1   : > { %v1315_v12 = vadd.f32 %v3502_v5, %v1314_v11 }
 0x5e3   : > { %v1316_v13 = vsel %vm931_vm5, %v1315_v12, -inf }
 0x5e4   : > { %1317 = vmax.xlane.f32.xlu0 %v1316_v13 }
 0x5e6   : > { %v1433_v15 = vpop.f32.mrf.mxu2 }
 0x5e7   : > { %v1434_v16 = vadd.f32 %v3028_v14, %v1433_v15  ;;  %v3031_v14 = vld [vmem:[%s4120_s12] ss:$0 sm:$0xff] }
 0x5e9   : > { %2847 = vmatpush.xpose.msk.msrb.mxu0 %vm931_vm5, %v1434_v16 }
 0x657   : > { %v1318_v17 = vpop.xlane.xlu0 %1317 }
 0x658   : > { %v1319_v18 = vsub.f32 %v1315_v12, %v1318_v17  ;;  %v3032_v17 = vld [vmem:[%s4121_s13] ss:$0 sm:$0xff] }
 0x65a   : > { %v1320_v19 = vmul.f32 1.442695, %v1319_v18 }
 0x65c   : > { %3070 = vpow2.f32 %v1320_v19 }
 0x662   : > { %v3071_v20 = vpop.eup %3070 }
 0x663   : > { %v1322_v21 = vsel %vm931_vm5, %v3071_v20, 0.0 }
 0x664   : > { %1323 = vadd.xlane.f32.xlu1 %v1322_v21  ;;  %v1638_v21 = vld [vmem:[%s4124_s16 + $0x30] sm:$0xff] }
 0x6d7   : > { %v1324_v26 = vpop.xlane.xlu1 %1323 }
 0x6d8   : > { %3072 = vrcp.f32 %v1324_v26  ;;  %v1633_v26 = vld [vmem:[%s4124_s16 + $0x8] sm:$0xff] }
 0x6de   : > { %v3073_v27 = vpop.eup %3072 }
 0x6df   : > { %v1326_v28 = vmul.f32 %v3073_v27, %v3071_v20  ;;  %v1639_v20 = vld [vmem:[%s4124_s16 + $0x38] sm:$0xff]  ;;  %v1632_v27 = vld [vmem:[%s4124_s16] sm:$0xff] }
 0x6e1   : > { %2826 = vmatmul.msk.f32.vlgmr.msra.gmra.mxu3 %vm931_vm5, %v1326_v28  ;;  %v3033_v28 = vld [vmem:[%s4123_s15] ss:$0 sm:$0xff] }
 0x6e2   : > { %1615 = vmatpush.msra.mxu3 %v1595_v0  ;;  %v2860_v0 = vld [vmem:[%s4187_s3 + $0x80] sm:$0xff] }
 0x6e9   : > { %2846 = vmatmul.msk.f32.vlgmr.msrb.gmra.mxu3 %vm806_vm0, %v3465_v53 }
 0x764   : > { %v1347_v29 = vpop.f32.mrf.mxu3 }
 0x765   : > { %2828 = vmatmul.msk.f32.vlgmr.msra.gmra.mxu0 %vm931_vm5, %v1347_v29 }
 0x766   : > { %1656 = vmatpush.msra.mxu0 %v1639_v20 }
 0x768   : > { %1657 = vmatpush.msra.mxu0 %v1638_v21 }
 0x76a   : > { %1658 = vmatpush.msra.mxu0 %v1637_v22 }
 0x76c   : > { %v1463_v34 = vpop.f32.mrf.mxu3  ;;  %1659 = vmatpush.msra.mxu0 %v1636_v23  ;;  %v3039_v23 = vld [vmem:[%s4192_s25 + $0x4] ss:$0 sm:$0xff] }
 0x76d   : > { %v1464_v35 = vadd.f32 %v3029_v32, %v1463_v34  ;;  %2848 = vmatmul.msk.f32.vlgmr.msrb.gmra.mxu0 %vm931_vm5, %v1404_v33 }
 0x76e   : > { %1660 = vmatpush.msra.mxu0 %v1635_v24  ;;  %v3040_v24 = vld [vmem:[%s4195_s26 + $0x4] ss:$0 sm:$0xff] }
 0x76f   : > { %1523 = vmatpush.msrb.mxu1 %v1464_v35 }
 0x770   : > { %1661 = vmatpush.msra.mxu0 %v1634_v25  ;;  %v3038_v25 = vld [vmem:[%s4192_s25 + $0x5] ss:$0 sm:$0xff] }
 0x772   : > { %1662 = vmatpush.msra.mxu0 %v1633_v26  ;;  %v3037_v26 = vld [vmem:[%s4194_s0 + $0x4] ss:$0 sm:$0xff] }
 0x774   : > { %1663 = vmatpush.msra.mxu0 %v1632_v27 }
 0x7e2   : > { %v1372_v36 = vpop.f32.mrf.mxu0 }
 0x7e3   : > { %v1375_v37 = vadd.f32 %v1372_v36, %v1196_v4 }
 0x7ea   : > { %v1489_v38 = vpop.f32.mrf.mxu0 }
 0x7eb   : > { %v1492_v39 = vmul.f32 0.35355338, %v1489_v38 }
 0x7ed   : > { %v1493_v40 = vadd.f32 %v3502_v5, %v1492_v39 }
 0x7ef   : > { %v1494_v41 = vsel %vm931_vm5, %v1493_v40, -inf }
 0x7f0   : > { %1495 = vmax.xlane.f32.xlu2 %v1494_v41 }
 0x863   : > { %v1496_v42 = vpop.xlane.xlu2 %1495 }
 0x864   : > { %v1497_v43 = vsub.f32 %v1493_v40, %v1496_v42  ;;  %v3034_v40 = vld [vmem:[%s4125_s17] ss:$0 sm:$0xff] }
 0x866   : > { %v1498_v44 = vmul.f32 1.442695, %v1497_v43 }
 0x868   : > { %3074 = vpow2.f32 %v1498_v44 }
 0x86e   : > { %v3075_v45 = vpop.eup %3074 }
 0x86f   : > { %v1500_v46 = vsel %vm931_vm5, %v3075_v45, 0.0 }
 0x870   : > { %1501 = vadd.xlane.f32.xlu0 %v1500_v46 }
 0x8e3   : > { %v1502_v48 = vpop.xlane.xlu0 %1501 }
 0x8e4   : > { %3076 = vrcp.f32 %v1502_v48 }
 0x8ea   : > { %v3077_v49 = vpop.eup %3076 }
 0x8eb   : > { %v1504_v50 = vmul.f32 %v3077_v49, %v3075_v45 }
 0x8ed   : > { %2849 = vmatmul.msk.f32.vlgmr.msrb.gmra.mxu1 %vm931_vm5, %v1504_v50  ;;  %v2857_v50 = vld [vmem:[%s4186_s2 + $0x98] sm:$0xff] }
 0x8ee   : > { %1726 = vmatpush.msra.mxu1 %v2857_v50 }
 0x96a   : > { %v1525_v51 = vpop.f32.mrf.mxu1 }
 0x96b   : > { %2851 = vmatmul.msk.f32.vlgmr.msrb.gmra.mxu2 %vm931_vm5, %v1525_v51  ;;  %v2863_v51 = vld [vmem:[%s4187_s3 + $0x98] sm:$0xff] }
 0x96c   : > { %1756 = vmatpush.msra.mxu2 %v2863_v51 }
 0x9ee   : > { %v1550_v54 = vpop.f32.mrf.mxu2 }
 0x9ef   : > { %v1553_v55 = vadd.f32 %v1550_v54, %v1375_v37  ;;  %v2885_v54 = vld [vmem:[%s4187_s3 + $0xb8] sm:$0xff] }
 0x9f0   : > { %1910 = vmatpush.msrb.mxu0 %v2885_v54 }
 0x9f1   : > { %v1558_v56 = vadd.f32 %v3030_v52, %v1553_v55  ;;  %v2869_v52 = vld [vmem:[%s4188_s10 + $0x98] sm:$0xff]  ;;  %v2856_v55 = vld [vmem:[%s4186_s2 + $0x90] sm:$0xff] }
 0x9f2   : > { %1727 = vmatpush.msra.mxu1 %v2856_v55  ;;  %v2903_v55 = vld [vmem:[%s4186_s2 + $0xd8] sm:$0xff] }
 0x9f3   : > { %v1559_v57 = vadd.f32 %v1558_v56, %v3465_v53  ;;  %v1594_v53 = vld [vmem:[%s4122_s14 + $0x10] sm:$0xff] }
 0x9f4   : > { %1616 = vmatpush.msra.mxu3 %v1594_v53  ;;  %v2862_v56 = vld [vmem:[%s4187_s3 + $0x90] sm:$0xff]  ;;  %v2866_v53 = vld [vmem:[%s4188_s10 + $0x80] sm:$0xff] }
 0x9f5   : > { %v1562_v58 = vsel %vm806_vm0, %v1559_v57, 0.0  ;;  %1757 = vmatpush.msra.mxu2 %v2862_v56  ;;  %v2902_v56 = vld [vmem:[%s4186_s2 + $0xd0] sm:$0xff] }
 0x9f6   : > { %1563 = vadd.xlane.f32.xlu1 %v1562_v58  ;;  %1617 = vmatpush.msra.mxu3 %v1593_v1  ;;  %v2884_v58 = vld [vmem:[%s4187_s3 + $0xb0] sm:$0xff]  ;;  %v2882_v1 = vld [vmem:[%s4187_s3 + $0xa0] sm:$0xff] }
 0x9f7   : > { %1911 = vmatpush.msrb.mxu0 %v2884_v58  ;;  %v2901_v58 = vld [vmem:[%s4186_s2 + $0xc8] sm:$0xff] }
 0x9f8   : > { %1618 = vmatpush.msra.mxu3 %v1592_v2  ;;  %v2879_v2 = vld [vmem:[%s4186_s2 + $0xb8] sm:$0xff] }
 0x9fa   : > { %1786 = vmatpush.msrb.mxu3 %v2869_v52 }
 0xa69   : > { %v1564_v59 = vpop.xlane.xlu1 %1563 }
 0xa6a   : > { %v1565_v60 = vmul.f32 %v1564_v59, %v3377_v9  ;;  %v2855_v59 = vld [vmem:[%s4186_s2 + $0x88] sm:$0xff] }
 0xa6b   : > { %1728 = vmatpush.msra.mxu1 %v2855_v59 }
 0xa6c   : > { %v1566_v61 = vsub.f32 %v1559_v57, %v1565_v60  ;;  %v2868_v57 = vld [vmem:[%s4188_s10 + $0x90] sm:$0xff]  ;;  %v2861_v60 = vld [vmem:[%s4187_s3 + $0x88] sm:$0xff] }
 0xa6d   : > { %1787 = vmatpush.msrb.mxu3 %v2868_v57  ;;  %1758 = vmatpush.msra.mxu2 %v2861_v60  ;;  %v3041_v57 = vld [vmem:[%s4194_s0 + $0x5] ss:$0 sm:$0xff] }
 0xa6e   : > { %v1567_v62 = vmul.f32 %v1566_v61, %v1566_v61  ;;  %v2900_v60 = vld [vmem:[%s4186_s2 + $0xc0] sm:$0xff] }
 0xa6f   : > { %1759 = vmatpush.msra.mxu2 %v2860_v0 }
 0xa70   : > { %v1568_v63 = vsel %vm806_vm0, %v1567_v62, 0.0  ;;  %v2883_v62 = vld [vmem:[%s4187_s3 + $0xa8] sm:$0xff] }
 0xa71   : > { %1569 = vadd.xlane.f32.xlu2 %v1568_v63  ;;  %v2854_v63 = vld [vmem:[%s4186_s2 + $0x80] sm:$0xff]  ;;  %1912 = vmatpush.msrb.mxu0 %v2883_v62 }
 0xa72   : > { %1729 = vmatpush.msra.mxu1 %v2854_v63  ;;  %v2875_v62 = vld [vmem:[%s4197_s6 + $0x20] sm:$0xff] }
 0xa73   : > { %1913 = vmatpush.msrb.mxu0 %v2882_v1 }
 0xae4   : > { %v1570_v3 = vpop.xlane.xlu2 %1569 }
 0xae5   : > { %v1571_v4 = vmul.f32 %v1570_v3, %v3377_v9  ;;  %v2878_v3 = vld [vmem:[%s4186_s2 + $0xb0] sm:$0xff] }
 0xae7   : > { %v1572_v6 = vadd.f32 1e-05, %v1571_v4 }
 0xae9   : > { %3078 = vrsqrt.f32 %v1572_v6  ;;  %vm1579_vm7 = vweird.f32 %v1572_v6 }
 0xaef   : > { %v3079_v7 = vpop.eup %3078 }
 0xaf0   : > { %v1574_v8 = vmul.f32 %v3079_v7, %v1572_v6  ;;  %vm1580_vm6 = vweird.f32 %v3079_v7  ;;  %v2877_v6 = vld [vmem:[%s4186_s2 + $0xa8] sm:$0xff] }
 0xaf1   : > { %vm1581_vm8 = vmor %vm1579_vm7, %vm1580_vm6 }
 0xaf2   : > { %v1575_v10 = vmul.f32 %v3079_v7, %v1574_v8  ;;  %v2876_v8 = vld [vmem:[%s4186_s2 + $0xa0] sm:$0xff] }
 0xaf4   : > { %v1576_v11 = vmul.f32 0.5, %v1575_v10 }
 0xaf6   : > { %v1577_v12 = vsub.f32 1.5, %v1576_v11 }
 0xaf8   : > { %v1578_v13 = vmul.f32 %v3079_v7, %v1577_v12 }
 0xafa   : > { %v1582_v15 = vsel %vm1581_vm8, %v3079_v7, %v1578_v13 }
 0xafb   : > { %v1583_v16 = vmul.f32 %v1582_v15, %v1566_v61  ;;  %v2867_v61 = vld [vmem:[%s4188_s10 + $0x88] sm:$0xff] }
 0xafc   : > { %1788 = vmatpush.msrb.mxu3 %v2867_v61 }
 0xafd   : > { %v1587_v18 = vmul.f32 %v3031_v14, %v1583_v16 }
 0xafe   : > { %1789 = vmatpush.msrb.mxu3 %v2866_v53 }
 0xaff   : > { %v1591_v19 = vadd.f32 %v3032_v17, %v1587_v18  ;;  %v3035_v17 = vld [vmem:[%s4126_s18] ss:$0 sm:$0xff] }
 0xb01   : > { %2852 = vmatmul.msk.f32.vlgmr.msra.gmra.mxu3 %vm806_vm0, %v1591_v19 }
 0xb02   : > { %1880 = vmatpush.msra.mxu3 %v2879_v2 }
 0xb04   : > { %1881 = vmatpush.msra.mxu3 %v2878_v3 }
 0xb06   : > { %1882 = vmatpush.msra.mxu3 %v2877_v6 }
 0xb08   : > { %1883 = vmatpush.msra.mxu3 %v2876_v8 }
 0xb84   : > { %v1620_v29 = vpop.f32.mrf.mxu3 }
 0xb85   : > { %v1621_v30 = vadd.f32 %v3033_v28, %v1620_v29 }
 0xb87   : > { %v1623_v31 = vmul.f32 %v1621_v30, %v1621_v30 }
 0xb89   : > { %v1624_v32 = vmul.f32 %v1623_v31, %v1621_v30 }
 0xb8b   : > { %v1625_v33 = vmul.f32 0.044715, %v1624_v32  ;;  %v2891_v32 = vld [vmem:[%s4188_s10 + $0xb8] sm:$0xff] }
 0xb8d   : > { %v1626_v34 = vadd.f32 %v1625_v33, %v1621_v30 }
 0xb8f   : > { %v1627_v35 = vmul.f32 0.7978846, %v1626_v34 }
 0xb91   : > { %3080 = vtanh.f32 %v1627_v35 }
 0xb97   : > { %v3081_v36 = vpop.eup %3080 }
 0xb98   : > { %v1629_v37 = vadd.f32 1.0, %v3081_v36  ;;  %v2890_v36 = vld [vmem:[%s4188_s10 + $0xb0] sm:$0xff] }
 0xb9a   : > { %v1630_v38 = vmul.f32 0.5, %v1629_v37  ;;  %v2889_v37 = vld [vmem:[%s4188_s10 + $0xa8] sm:$0xff] }
 0xb9c   : > { %v1631_v39 = vmul.f32 %v1630_v38, %v1621_v30  ;;  %v2888_v38 = vld [vmem:[%s4188_s10 + $0xa0] sm:$0xff] }
 0xb9e   : > { %2853 = vmatmul.msk.f32.vlgmr.msra.gmra.mxu0 %vm1644_vm9, %v1631_v39 }
 0xc1b   : > { %v1665_v41 = vpop.f32.mrf.mxu0 }
 0xc1c   : > { %v1666_v42 = vadd.f32 %v3034_v40, %v1665_v41 }
 0xc1e   : > { %v1668_v43 = vadd.f32 %v1666_v42, %v1591_v19  ;;  %v3036_v19 = vld [vmem:[%s4127_s19] ss:$0 sm:$0xff] }
 0xc20   : > { %v1671_v44 = vsel %vm806_vm0, %v1668_v43, 0.0 }
 0xc21   : > { %1672 = vadd.xlane.f32.xlu0 %v1671_v44 }
 0xc94   : > { %v1673_v45 = vpop.xlane.xlu0 %1672 }
 0xc95   : > { %v1674_v46 = vmul.f32 %v1673_v45, %v3377_v9 }
 0xc97   : > { %v1675_v47 = vsub.f32 %v1668_v43, %v1674_v46  ;;  %v3042_v43 = vld [vmem:[%s4195_s26 + $0x5] ss:$0 sm:$0xff] }
 0xc99   : > { %v1676_v48 = vmul.f32 %v1675_v47, %v1675_v47 }
 0xc9b   : > { %v1677_v49 = vsel %vm806_vm0, %v1676_v48, 0.0 }
 0xc9c   : > { %1678 = vadd.xlane.f32.xlu1 %v1677_v49 }
 0xd0f   : > { %v1679_v4 = vpop.xlane.xlu1 %1678 }
 0xd10   : > { %v1680_v7 = vmul.f32 %v1679_v4, %v3377_v9 }
 0xd12   : > { %v1681_v10 = vadd.f32 1e-05, %v1680_v7 }
 0xd14   : > { %3082 = vrsqrt.f32 %v1681_v10  ;;  %vm1688_vm11 = vweird.f32 %v1681_v10 }
 0xd1a   : > { %v3083_v11 = vpop.eup %3082 }
 0xd1b   : > { %v1683_v12 = vmul.f32 %v3083_v11, %v1681_v10  ;;  %vm1689_vm10 = vweird.f32 %v3083_v11  ;;  %v2909_v10 = vld [vmem:[%s4187_s3 + $0xd8] sm:$0xff] }
 0xd1c   : > { %vm1690_vm12 = vmor %vm1688_vm11, %vm1689_vm10 }
 0xd1d   : > { %v1684_v13 = vmul.f32 %v3083_v11, %v1683_v12  ;;  %v2907_v12 = vld [vmem:[%s4187_s3 + $0xc8] sm:$0xff] }
 0xd1f   : > { %v1685_v14 = vmul.f32 0.5, %v1684_v13  ;;  %v2906_v13 = vld [vmem:[%s4187_s3 + $0xc0] sm:$0xff] }
 0xd21   : > { %v1686_v15 = vsub.f32 1.5, %v1685_v14 }
 0xd23   : > { %v1687_v16 = vmul.f32 %v3083_v11, %v1686_v15 }
 0xd25   : > { %v1691_v18 = vsel %vm1690_vm12, %v3083_v11, %v1687_v16  ;;  %v2908_v11 = vld [vmem:[%s4187_s3 + $0xd0] sm:$0xff] }
 0xd26   : > { %v1692_v20 = vmul.f32 %v1691_v18, %v1675_v47  ;;  %v2915_v18 = vld [vmem:[%s4188_s10 + $0xd8] sm:$0xff] }
 0xd28   : > { %v1696_v21 = vmul.f32 %v3035_v17, %v1692_v20  ;;  %v2897_v17 = vld [vmem:[%s4197_s6 + $0x28] sm:$0xff] }
 0xd29   : > { %2030 = vmatpush.msra.mxu0 %v2897_v17  ;;  %v2913_v20 = vld [vmem:[%s4188_s10 + $0xc8] sm:$0xff] }
 0xd2a   : > { %v3774_v22 = vadd.f32 %v3036_v19, %v1696_v21  ;;  %v2914_v19 = vld [vmem:[%s4188_s10 + $0xd0] sm:$0xff]  ;;  %v2912_v21 = vld [vmem:[%s4188_s10 + $0xc0] sm:$0xff] }
 0xd2c   : > { %2859 = vmatmul.msk.f32.vlgmr.msra.gmra.mxu1 %vm806_vm0, %v3774_v22  ;;  %2865 = vmatmul.msk.f32.vlgmr.msra.gmra.mxu2 %vm806_vm0, %v3774_v22 }
 0xd2d   : > { %2871 = vmatmul.msk.f32.vlgmr.msrb.gmra.mxu3 %vm806_vm0, %v3774_v22  ;;  %2887 = vmatmul.msk.f32.vlgmr.msrb.gmra.mxu0 %vm806_vm0, %v3774_v22 }
 0xd2e   : > { %2140 = vmatpush.msrb.mxu0 %v2915_v18 }
 0xd30   : > { %2141 = vmatpush.msrb.mxu0 %v2914_v19 }
 0xd32   : > { %2142 = vmatpush.msrb.mxu0 %v2913_v20  ;;  %v2944_v20 = vld [vmem:[%s4197_s6 + $0x38] sm:$0xff] }
 0xd34   : > { %2143 = vmatpush.msrb.mxu0 %v2912_v21 }
 0xd35   : > { %2881 = vmatmul.msk.f32.vlgmr.msra.gmra.mxu3 %vm806_vm0, %v3774_v22 }
 0xda9   : > { %v1731_v29 = vpop.f32.mrf.mxu1 }
 0xdaa   : > { %v1915_v27 = vpop.f32.mrf.mxu0  ;;  %v1732_v35 = vadd.f32 %v3037_v26, %v1731_v29  ;;  %v2924_v26 = vld [vmem:[%s4186_s2 + $0xe8] sm:$0xff]  ;;  %v3043_v29 = vld [vmem:[%s4194_s0 + $0x6] ss:$0 sm:$0xff] }
 0xdab   : > { %v1916_v34 = vadd.f32 %v3038_v25, %v1915_v27  ;;  %v2925_v25 = vld [vmem:[%s4186_s2 + $0xf0] sm:$0xff]  ;;  %v3044_v27 = vld [vmem:[%s4192_s25 + $0x6] ss:$0 sm:$0xff] }
 0xdaf   : > { %v1761_v28 = vpop.f32.mrf.mxu2 }
 0xdb0   : > { %v1762_v30 = vadd.f32 %v3039_v23, %v1761_v28  ;;  %v1791_v31 = vpop.f32.mrf.mxu3  ;;  %v2926_v23 = vld [vmem:[%s4186_s2 + $0xf8] sm:$0xff]  ;;  %v2923_v28 = vld [vmem:[%s4186_s2 + $0xe0] sm:$0xff]  ;;  %s794_s2 = scalar_lea.vmem [#allocation3], %s793_s5 }
 0xdb1   : > { %v1792_v33 = vadd.f32 %v3040_v24, %v1791_v31 }
 0xdb2   : > { %2872 = vmatpush.xpose.msk.msrb.mxu1 %vm931_vm5, %v1762_v30 }
 0xdb3   : > { %1851 = vmatpush.msrb.mxu2 %v1792_v33  ;;  %v2932_v33 = vld [vmem:[%s4187_s3 + $0xf8] sm:$0xff] }
 0xdb5   : > { %2894 = vmatpush.xpose.msk.msra.mxu2 %vm931_vm5, %v1916_v34  ;;  %2873 = vmatmul.msk.f32.vlgmr.msrb.gmra.mxu1 %vm931_vm5, %v1732_v35  ;;  %v2931_v35 = vld [vmem:[%s4187_s3 + $0xf0] sm:$0xff] }
 0xdb6   : > { %1940 = vmatpush.msra.mxu1 %v2891_v32 }
 0xdb8   : > { %1941 = vmatpush.msra.mxu1 %v2890_v36  ;;  %v1885_v59 = vpop.f32.mrf.mxu3  ;;  %v2930_v36 = vld [vmem:[%s4187_s3 + $0xe8] sm:$0xff] }
 0xdb9   : > { %v1886_v61 = vadd.f32 %v3041_v57, %v1885_v59  ;;  %v2937_v59 = vld [vmem:[%s4188_s10 + $0xf0] sm:$0xff] }
 0xdba   : > { %1942 = vmatpush.msra.mxu1 %v2889_v37  ;;  %v2929_v37 = vld [vmem:[%s4187_s3 + $0xe0] sm:$0xff]  ;;  %s2705_s3 = sshll.u32 %s794_s2, 4  ;;  %s2706_s3 = int_to_ptr.vmem [resolvable:$true] %s2705_s3 }
 0xdbc   : > { %1943 = vmatpush.msra.mxu1 %v2888_v38  ;;  %v2921_v38 = vld [vmem:[%s4197_s6 + $0x30] sm:$0xff]  ;;  %s2707_s6 = sshll.u32 %s2703_s7, 4  ;;  %s2708_s6 = int_to_ptr.hbm [resolvable:$true] %s2707_s6 }
 0xdbd   : > { %2893 = vmatmul.msk.f32.vlgmr.msra.gmra.mxu1 %vm806_vm0, %v3774_v22 }
 0xdbe   : > { %2053 = vmatpush.msrb.mxu1 %v2875_v62 }
 0xe32   : > { %v1817_v39 = vpop.f32.mrf.mxu1 }
 0xe33   : > { %v1820_v40 = vmul.f32 0.35355338, %v1817_v39 }
 0xe35   : > { %v1821_v41 = vadd.f32 %v3502_v5, %v1820_v40 }
 0xe37   : > { %v1822_v42 = vsel %vm931_vm5, %v1821_v41, -inf }
 0xe38   : > { %1823 = vmax.xlane.f32.xlu2 %v1822_v42  ;;  %v3045_v42 = vld [vmem:[%s4195_s26 + $0x6] ss:$0 sm:$0xff] }
 0xe3a   : > { %v1945_v44 = vpop.f32.mrf.mxu1 }
 0xe3b   : > { %v1946_v45 = vadd.f32 %v3042_v43, %v1945_v44 }
 0xe3d   : > { %2005 = vmatpush.msrb.mxu3 %v1946_v45 }
 0xe3f   : > { %2110 = vmatpush.msra.mxu3 %v2909_v10 }
 0xe41   : > { %2111 = vmatpush.msra.mxu3 %v2908_v11 }
 0xe43   : > { %2112 = vmatpush.msra.mxu3 %v2907_v12 }
 0xe45   : > { %2113 = vmatpush.msra.mxu3 %v2906_v13 }
 0xeab   : > { %v1824_v46 = vpop.xlane.xlu2 %1823 }
 0xeac   : > { %v1825_v47 = vsub.f32 %v1821_v41, %v1824_v46 }
 0xeae   : > { %v1826_v48 = vmul.f32 1.442695, %v1825_v47 }
 0xeb0   : > { %3084 = vpow2.f32 %v1826_v48 }
 0xeb6   : > { %v3085_v49 = vpop.eup %3084 }
 0xeb7   : > { %v1828_v50 = vsel %vm931_vm5, %v3085_v49, 0.0 }
 0xeb8   : > { %1829 = vadd.xlane.f32.xlu0 %v1828_v50 }
 0xf2b   : > { %v1830_v51 = vpop.xlane.xlu0 %1829 }
 0xf2c   : > { %3086 = vrcp.f32 %v1830_v51 }
 0xf32   : > { %v3087_v52 = vpop.eup %3086 }
 0xf33   : > { %v1832_v54 = vmul.f32 %v3087_v52, %v3085_v49  ;;  %v3047_v49 = vld [vmem:[%s4192_s25 + $0x7] ss:$0 sm:$0xff] }
 0xf35   : > { %2874 = vmatmul.msk.f32.vlgmr.msrb.gmra.mxu2 %vm931_vm5, %v1832_v54 }
 0xf36   : > { %2080 = vmatpush.msrb.mxu2 %v2903_v55 }
 0xf38   : > { %2081 = vmatpush.msrb.mxu2 %v2902_v56 }
 0xf3a   : > { %2082 = vmatpush.msrb.mxu2 %v2901_v58  ;;  %v2938_v58 = vld [vmem:[%s4188_s10 + $0xf8] sm:$0xff] }
 0xf3c   : > { %2083 = vmatpush.msrb.mxu2 %v2900_v60  ;;  %v2936_v60 = vld [vmem:[%s4188_s10 + $0xe8] sm:$0xff] }
 0xf3d   : > { %2895 = vmatmul.msk.f32.vlgmr.msra.gmra.mxu2 %vm931_vm5, %v1886_v61  ;;  %v2935_v61 = vld [vmem:[%s4188_s10 + $0xe0] sm:$0xff]  ;;  %s2695_s10 = scalar_lea.sflag [#allocation4], %s793_s5 }
 0xf45   : > { %2905 = vmatmul.msk.f32.vlgmr.msrb.gmra.mxu2 %vm806_vm0, %v3774_v22 }
 0xfb8   : > { %v1853_v63 = vpop.f32.mrf.mxu2 }
 0xfb9   : > { %2899 = vmatmul.msk.f32.vlgmr.msrb.gmra.mxu1 %vm931_vm5, %v1853_v63 }
 0xfc0   : > { %v1971_v0 = vpop.f32.mrf.mxu2 }
 0xfc1   : > { %v1974_v53 = vmul.f32 0.35355338, %v1971_v0 }
 0xfc3   : > { %v1975_v1 = vadd.f32 %v3502_v5, %v1974_v53 }
 0xfc5   : > { %v1976_v2 = vsel %vm931_vm5, %v1975_v1, -inf }
 0xfc6   : > { %1977 = vmax.xlane.f32.xlu1 %v1976_v2 }
 0xfc8   : > { %v2085_v31 = vpop.f32.mrf.mxu2 }
 0xfc9   : > { %v2086_v34 = vadd.f32 %v3043_v29, %v2085_v31 }
0x1036   : > { %v2055_v39 = vpop.f32.mrf.mxu1 }
0x1039   : > { %v1978_v3 = vpop.xlane.xlu1 %1977 }
0x103a   : > { %v1979_v4 = vsub.f32 %v1975_v1, %v1978_v3  ;;  %v3046_v1 = vld [vmem:[%s4194_s0 + $0x7] ss:$0 sm:$0xff]  ;;  %s4203_s0 = sld [smem:[#allocation27_spill]] }
0x103b   : > { %v3048_v3 = vld [vmem:[%s4195_s26 + $0x7] ss:$0 sm:$0xff] }
0x103c   : > { %v1980_v6 = vmul.f32 1.442695, %v1979_v4 }
0x103e   : > { %3088 = vpow2.f32 %v1980_v6 }
0x1044   : > { %v3089_v7 = vpop.eup %3088 }
0x1045   : > { %v1982_v8 = vsel %vm931_vm5, %v3089_v7, 0.0 }
0x1046   : > { %1983 = vadd.xlane.f32.xlu2 %v1982_v8 }
0x10b9   : > { %v1984_v14 = vpop.xlane.xlu2 %1983 }
0x10ba   : > { %3090 = vrcp.f32 %v1984_v14 }
0x10c0   : > { %v3091_v15 = vpop.eup %3090 }
0x10c1   : > { %v1986_v16 = vmul.f32 %v3091_v15, %v3089_v7 }
0x10c3   : > { %2896 = vmatmul.msk.f32.vlgmr.msrb.gmra.mxu3 %vm931_vm5, %v1986_v16 }
0x10c4   : > { %2230 = vmatpush.msrb.mxu3 %v2921_v38  ;;  %v2949_v38 = vld [vmem:[%s4122_s14 + $0x20] sm:$0xff] }
0x10cb   : > { %2911 = vmatmul.msk.f32.vlgmr.msra.gmra.mxu3 %vm806_vm0, %v3774_v22 }
0x1146   : > { %v2007_v24 = vpop.f32.mrf.mxu3 }
0x1147   : > { %2898 = vmatmul.msk.f32.vlgmr.msra.gmra.mxu0 %vm931_vm5, %v2007_v24 }
0x1148   : > { %2258 = vmatpush.msra.mxu0 %v2926_v23 }
0x114a   : > { %2259 = vmatpush.msra.mxu0 %v2925_v25  ;;  %v3049_v25 = vld [vmem:[%s4198_s11 + $0x1] ss:$0 sm:$0xff]  ;;  %s3126_s11 = sshra.s32 %s2708_s6, 4  ;;  %s3127_s11 = int_to_ptr.hbm [resolvable:$true] %s3126_s11 }
0x114b   : > { %s3128_s27 = scalar_lea.hbm %s3127_s11, 1  ;;  %p3133_p0 = scmp.lt.s32.totalorder %s3127_s11, %s4201_s1 }
0x114c   : > { %2260 = vmatpush.msra.mxu0 %v2924_v26  ;;  %p3129_p11 = scmp.ne.s32.totalorder %s3127_s11, %s3128_s27 }
0x114e   : > { %v2115_v30 = vpop.f32.mrf.mxu3  ;;  %2261 = vmatpush.msra.mxu0 %v2923_v28  ;;  %p3130_p12 = pnand %p3129_p11, %p3354_p5 }
0x114f   : > { %v2116_v32 = vadd.f32 %v3044_v27, %v2115_v30  ;;  %2917 = vmatmul.msk.f32.vlgmr.msrb.gmra.mxu0 %vm806_vm0, %v3774_v22 }
0x1150   : > { %p3131_p13 = pneg %p3130_p12 }
0x1151   : > { %2918 = vmatpush.xpose.msk.msra.mxu1 %vm931_vm5, %v2116_v32 }
0x1154   : > { %2919 = vmatmul.msk.f32.vlgmr.msra.gmra.mxu1 %vm931_vm5, %v2086_v34 }
0x1155   : > { %2288 = vmatpush.msrb.mxu1 %v2932_v33 }
0x1157   : > { %2289 = vmatpush.msrb.mxu1 %v2931_v35  ;;  %2928 = vmatmul.msk.f32.vlgmr.msra.gmra.mxu0 %vm806_vm0, %v3774_v22 }
0x1159   : > { %2290 = vmatpush.msrb.mxu1 %v2930_v36  ;;  %v2952_v36 = vld [vmem:[%s4122_s14 + $0x38] sm:$0xff] }
0x115b   : > { %2291 = vmatpush.msrb.mxu1 %v2929_v37  ;;  %v2950_v37 = vld [vmem:[%s4122_s14 + $0x28] sm:$0xff] }
0x115c   : > { %2934 = vmatmul.msk.f32.vlgmr.msrb.gmra.mxu1 %vm806_vm0, %v3774_v22 }
0x115d   : > { %2408 = vmatpush.msra.mxu1 %v2944_v20 }
0x11c4   : > { %v2032_v40 = vpop.f32.mrf.mxu0 }
0x11c5   : > { %v2056_v41 = vadd.f32 %v2055_v39, %v2032_v40 }
0x11cc   : > { %v2145_v43 = vpop.f32.mrf.mxu0 }
0x11cd   : > { %v2146_v44 = vadd.f32 %v3045_v42, %v2145_v43 }
0x11cf   : > { %2205 = vmatpush.msra.mxu2 %v2146_v44 }
0x11d1   : > { %v2171_v45 = vpop.f32.mrf.mxu1  ;;  %2318 = vmatpush.msrb.mxu2 %v2938_v58  ;;  %v2959_v58 = vld [vmem:[%s4124_s16 + $0x60] sm:$0xff] }
0x11d2   : > { %v2174_v46 = vmul.f32 0.35355338, %v2171_v45 }
0x11d3   : > { %2319 = vmatpush.msrb.mxu2 %v2937_v59  ;;  %v2958_v59 = vld [vmem:[%s4124_s16 + $0x58] sm:$0xff] }
0x11d4   : > { %v2175_v47 = vadd.f32 %v3502_v5, %v2174_v46  ;;  %v2263_v2 = vpop.f32.mrf.mxu0 }
0x11d5   : > { %2320 = vmatpush.msrb.mxu2 %v2936_v60  ;;  %v2264_v4 = vadd.f32 %v3046_v1, %v2263_v2  ;;  %v2957_v60 = vld [vmem:[%s4124_s16 + $0x50] sm:$0xff] }
0x11d6   : > { %v2176_v48 = vsel %vm931_vm5, %v2175_v47, -inf }
0x11d7   : > { %2177 = vmax.xlane.f32.xlu0 %v2176_v48  ;;  %2321 = vmatpush.msrb.mxu2 %v2935_v61  ;;  %v3050_v48 = vld [vmem:[%s4120_s12 + $0x1] ss:$0 sm:$0xff]  ;;  %v2956_v61 = vld [vmem:[%s4124_s16 + $0x48] sm:$0xff] }
0x11d9   : > { %v2293_v50 = vpop.f32.mrf.mxu1 }
0x11da   : > { %v2294_v51 = vadd.f32 %v3047_v49, %v2293_v50 }
0x11dc   : > { %2941 = vmatpush.xpose.msk.msra.mxu3 %vm931_vm5, %v2294_v51  ;;  %v3051_v51 = vld [vmem:[%s4121_s13 + $0x1] ss:$0 sm:$0xff] }
0x124a   : > { %v2178_v52 = vpop.xlane.xlu0 %2177 }
0x124b   : > { %v2179_v54 = vsub.f32 %v2175_v47, %v2178_v52 }
0x124d   : > { %v2180_v55 = vmul.f32 1.442695, %v2179_v54 }
0x124f   : > { %3092 = vpow2.f32 %v2180_v55  ;;  %v2962_v55 = vld [vmem:[%s4124_s16 + $0x78] sm:$0xff] }
0x1255   : > { %v3093_v56 = vpop.eup %3092 }
0x1256   : > { %v2182_v57 = vsel %vm931_vm5, %v3093_v56, 0.0 }
0x1257   : > { %2183 = vadd.xlane.f32.xlu1 %v2182_v57  ;;  %v2960_v57 = vld [vmem:[%s4124_s16 + $0x68] sm:$0xff] }
0x12ca   : > { %v2184_v62 = vpop.xlane.xlu1 %2183 }
0x12cb   : > { %3094 = vrcp.f32 %v2184_v62  ;;  %v2955_v62 = vld [vmem:[%s4124_s16 + $0x40] sm:$0xff] }
0x12d1   : > { %v3095_v63 = vpop.eup %3094 }
0x12d2   : > { %v2186_v0 = vmul.f32 %v3095_v63, %v3093_v56  ;;  %v2961_v56 = vld [vmem:[%s4124_s16 + $0x70] sm:$0xff]  ;;  %v3052_v63 = vld [vmem:[%s4123_s15 + $0x1] ss:$0 sm:$0xff] }
0x12d4   : > { %2920 = vmatmul.msk.f32.vlgmr.msra.gmra.mxu2 %vm931_vm5, %v2186_v0 }
0x12d5   : > { %2480 = vmatpush.msra.mxu2 %v2952_v36 }
0x12dc   : > { %2940 = vmatmul.msk.f32.vlgmr.msrb.gmra.mxu2 %vm806_vm0, %v3774_v22 }
0x1357   : > { %v2207_v53 = vpop.f32.mrf.mxu2 }
0x1358   : > { %2922 = vmatmul.msk.f32.vlgmr.msrb.gmra.mxu3 %vm931_vm5, %v2207_v53 }
0x1359   : > { %2522 = vmatpush.msrb.mxu3 %v2962_v55  ;;  %v3177_v55 = vmov 0  }
0x135a   : > { %3013 = vset.pattern.permute.xlu2 %v3177_v55  ;;  %3014 = vset.pattern.permute.xlu0 %v3177_v55 }
0x135b   : > { %2523 = vmatpush.msrb.mxu3 %v2961_v56 }
0x135d   : > { %2524 = vmatpush.msrb.mxu3 %v2960_v57 }
0x135f   : > { %v2323_v6 = vpop.f32.mrf.mxu2  ;;  %2525 = vmatpush.msrb.mxu3 %v2959_v58 }
0x1360   : > { %v2324_v7 = vadd.f32 %v3048_v3, %v2323_v6  ;;  %2942 = vmatmul.msk.f32.vlgmr.msra.gmra.mxu3 %vm931_vm5, %v2264_v4 }
0x1361   : > { %2526 = vmatpush.msrb.mxu3 %v2958_v59 }
0x1362   : > { %2383 = vmatpush.msrb.mxu0 %v2324_v7 }
0x1363   : > { %2527 = vmatpush.msrb.mxu3 %v2957_v60 }
0x1365   : > { %2528 = vmatpush.msrb.mxu3 %v2956_v61 }
0x1367   : > { %2529 = vmatpush.msrb.mxu3 %v2955_v62 }
0x13db   : > { %v2232_v8 = vpop.f32.mrf.mxu3 }
0x13dc   : > { %v2235_v10 = vadd.f32 %v2232_v8, %v2056_v41 }
0x13e3   : > { %v2349_v11 = vpop.f32.mrf.mxu3 }
0x13e4   : > { %v2352_v12 = vmul.f32 0.35355338, %v2349_v11 }
0x13e6   : > { %v2353_v13 = vadd.f32 %v3502_v5, %v2352_v12  ;;  %v3053_v12 = vld [vmem:[%s4125_s17 + $0x1] ss:$0 sm:$0xff] }
0x13e8   : > { %v2354_v14 = vsel %vm931_vm5, %v2353_v13, -inf }
0x13e9   : > { %2355 = vmax.xlane.f32.xlu2 %v2354_v14 }
0x145c   : > { %v2356_v15 = vpop.xlane.xlu2 %2355 }
0x145d   : > { %v2357_v16 = vsub.f32 %v2353_v13, %v2356_v15 }
0x145f   : > { %v2358_v17 = vmul.f32 1.442695, %v2357_v16 }
0x1461   : > { %3096 = vpow2.f32 %v2358_v17 }
0x1467   : > { %v3097_v18 = vpop.eup %3096 }
0x1468   : > { %v2360_v19 = vsel %vm931_vm5, %v3097_v18, 0.0 }
0x1469   : > { %2361 = vadd.xlane.f32.xlu0 %v2360_v19 }
0x14dc   : > { %v2362_v21 = vpop.xlane.xlu0 %2361 }
0x14dd   : > { %3098 = vrcp.f32 %v2362_v21 }
0x14e3   : > { %v3099_v23 = vpop.eup %3098 }
0x14e4   : > { %v2364_v5 = vmul.f32 %v3099_v23, %v3097_v18  ;;  %v2572_v23 = vld [vmem:[%s4128_s20 + $0x18] sm:$0xff] }
0x14e5   : > { %2592 = vmatpush.msra.mxu0 %v2572_v23 }
0x14e6   : > { %2943 = vmatmul.msk.f32.vlgmr.msrb.gmra.mxu0 %vm931_vm5, %v2364_v5  ;;  %v2571_v5 = vld [vmem:[%s4128_s20 + $0x10] sm:$0xff] }
0x14e7   : > { %2593 = vmatpush.msra.mxu0 %v2571_v5 }
0x1563   : > { %v2385_v24 = vpop.f32.mrf.mxu0 }
0x1564   : > { %2945 = vmatmul.msk.f32.vlgmr.msra.gmra.mxu1 %vm931_vm5, %v2385_v24  ;;  %v2570_v24 = vld [vmem:[%s4128_s20 + $0x8] sm:$0xff] }
0x1565   : > { %2594 = vmatpush.msra.mxu0 %v2570_v24 }
0x15e1   : > { %v2410_v26 = vpop.f32.mrf.mxu1 }
0x15e2   : > { %v2413_v27 = vadd.f32 %v2410_v26, %v2235_v10 }
0x15e4   : > { %v2419_v28 = vadd.f32 %v3049_v25, %v2413_v27  ;;  %v2569_v25 = vld [vmem:[%s4128_s20] sm:$0xff] }
0x15e5   : > { %2595 = vmatpush.msra.mxu0 %v2569_v25 }
0x15e6   : > { %v2420_v29 = vadd.f32 %v2419_v28, %v3774_v22  ;;  %v2951_v22 = vld [vmem:[%s4122_s14 + $0x30] sm:$0xff] }
0x15e7   : > { %2481 = vmatpush.msra.mxu2 %v2951_v22 }
0x15e8   : > { %v2425_v30 = vsel %vm806_vm0, %v2420_v29, 0.0 }
0x15e9   : > { %2426 = vadd.xlane.f32.xlu1 %v2425_v30  ;;  %2482 = vmatpush.msra.mxu2 %v2950_v37 }
0x15eb   : > { %2483 = vmatpush.msra.mxu2 %v2949_v38 }
0x165c   : > { %v2427_v31 = vpop.xlane.xlu1 %2426 }
0x165d   : > { %v2428_v32 = vmul.f32 %v2427_v31, %v3377_v9 }
0x165f   : > { %v2429_v33 = vsub.f32 %v2420_v29, %v2428_v32 }
0x1661   : > { %v2430_v34 = vmul.f32 %v2429_v33, %v2429_v33 }
0x1663   : > { %v2431_v35 = vsel %vm806_vm0, %v2430_v34, 0.0 }
0x1664   : > { %2432 = vadd.xlane.f32.xlu2 %v2431_v35  ;;  %v3054_v35 = vld [vmem:[%s4126_s18 + $0x1] ss:$0 sm:$0xff] }
0x16d7   : > { %v2433_v39 = vpop.xlane.xlu2 %2432 }
0x16d8   : > { %v2434_v40 = vmul.f32 %v2433_v39, %v3377_v9  ;;  %v2604_v39 = vld [vmem:[%s4130_s22 + $0x18] sm:$0xff] }
0x16d9   : > { %2624 = vmatpush.msrb.mxu1 %v2604_v39 }
0x16da   : > { %v2435_v41 = vadd.f32 1e-05, %v2434_v40  ;;  %v2603_v40 = vld [vmem:[%s4130_s22 + $0x10] sm:$0xff] }
0x16db   : > { %2625 = vmatpush.msrb.mxu1 %v2603_v40 }
0x16dc   : > { %3100 = vrsqrt.f32 %v2435_v41  ;;  %vm2442_vm14 = vweird.f32 %v2435_v41 }
0x16e2   : > { %v3101_v42 = vpop.eup %3100 }
0x16e3   : > { %v2437_v43 = vmul.f32 %v3101_v42, %v2435_v41  ;;  %vm2443_vm13 = vweird.f32 %v3101_v42  ;;  %v2602_v41 = vld [vmem:[%s4130_s22 + $0x8] sm:$0xff] }
0x16e4   : > { %vm2444_vm15 = vmor %vm2442_vm14, %vm2443_vm13  ;;  %2626 = vmatpush.msrb.mxu1 %v2602_v41 }
0x16e5   : > { %v2438_v44 = vmul.f32 %v3101_v42, %v2437_v43  ;;  %v3056_v43 = vld [vmem:[%s4129_s21] ss:$0 sm:$0xff] }
0x16e7   : > { %v2439_v45 = vmul.f32 0.5, %v2438_v44 }
0x16e9   : > { %v2440_v46 = vsub.f32 1.5, %v2439_v45 }
0x16eb   : > { %v2441_v47 = vmul.f32 %v3101_v42, %v2440_v46 }
0x16ed   : > { %v2445_v49 = vsel %vm2444_vm15, %v3101_v42, %v2441_v47  ;;  %v2601_v42 = vld [vmem:[%s4130_s22] sm:$0xff] }
0x16ee   : > { %v2446_v50 = vmul.f32 %v2445_v49, %v2429_v33  ;;  %2627 = vmatpush.msrb.mxu1 %v2601_v42  ;;  %v3057_v47 = vld [vmem:[#allocation2] ss:$0 sm:$0xff] }
0x16f0   : > { %v2450_v52 = vmul.f32 %v3050_v48, %v2446_v50 }
0x16f2   : > { %v2454_v54 = vadd.f32 %v3051_v51, %v2450_v52 }
0x16f4   : > { %2954 = vmatmul.msk.f32.vlgmr.msra.gmra.mxu2 %vm806_vm0, %v2454_v54 }
0x1777   : > { %v2485_v0 = vpop.f32.mrf.mxu2 }
0x1778   : > { %v2486_v53 = vadd.f32 %v3052_v63, %v2485_v0 }
0x177a   : > { %v2488_v1 = vmul.f32 %v2486_v53, %v2486_v53 }
0x177c   : > { %v2489_v2 = vmul.f32 %v2488_v1, %v2486_v53 }
0x177e   : > { %v2490_v3 = vmul.f32 0.044715, %v2489_v2 }
0x1780   : > { %v2491_v4 = vadd.f32 %v2490_v3, %v2486_v53 }
0x1782   : > { %v2492_v6 = vmul.f32 0.7978846, %v2491_v4 }
0x1784   : > { %3102 = vtanh.f32 %v2492_v6 }
0x178a   : > { %v3103_v7 = vpop.eup %3102 }
0x178b   : > { %v2494_v8 = vadd.f32 1.0, %v3103_v7  ;;  %v2668_v7 = vld [vmem:[%s4132_s24 + $0x18] sm:$0xff] }
0x178c   : > { %2685 = vmatpush.msrb.mxu2 %v2668_v7 }
0x178d   : > { %v2495_v10 = vmul.f32 0.5, %v2494_v8  ;;  %v2667_v8 = vld [vmem:[%s4132_s24 + $0x10] sm:$0xff] }
0x178e   : > { %2686 = vmatpush.msrb.mxu2 %v2667_v8 }
0x178f   : > { %v2496_v11 = vmul.f32 %v2495_v10, %v2486_v53  ;;  %v2666_v10 = vld [vmem:[%s4132_s24 + $0x8] sm:$0xff] }
0x1790   : > { %2687 = vmatpush.msrb.mxu2 %v2666_v10 }
0x1791   : > { %2964 = vmatmul.msk.f32.vlgmr.msrb.gmra.mxu3 %vm1644_vm9, %v2496_v11  ;;  %v2665_v11 = vld [vmem:[%s4132_s24] sm:$0xff] }
0x1792   : > { %2688 = vmatpush.msrb.mxu2 %v2665_v11 }
0x1814   : > { %v2531_v13 = vpop.f32.mrf.mxu3 }
0x1815   : > { %v2532_v14 = vadd.f32 %v3053_v12, %v2531_v13 }
0x1817   : > { %v2534_v15 = vadd.f32 %v2532_v14, %v2454_v54 }
0x1819   : > { %v2539_v16 = vsel %vm806_vm0, %v2534_v15, 0.0 }
0x181a   : > { %2540 = vadd.xlane.f32.xlu0 %v2539_v16 }
0x188d   : > { %v2541_v17 = vpop.xlane.xlu0 %2540 }
0x188e   : > { %v2542_v18 = vmul.f32 %v2541_v17, %v3377_v9 }
0x1890   : > { %v2543_v19 = vsub.f32 %v2534_v15, %v2542_v18 }
0x1892   : > { %v2544_v20 = vmul.f32 %v2543_v19, %v2543_v19 }
0x1894   : > { %v2545_v21 = vsel %vm806_vm0, %v2544_v20, 0.0 }
0x1895   : > { %2546 = vadd.xlane.f32.xlu1 %v2545_v21  ;;  %v2669_v21 = vld [vmem:[%s4203_s0] sm:$0x1]  ;;  %s3132_s0 = scalar_lea.hbm %s4201_s1, 2 }
0x1896   : > { %p3134_p1 = scmp.lt.s32.totalorder %s3132_s0, %s3128_s27 }
0x1898   : > { %p3135_p2 = por %p3134_p1, %p3133_p0 }
0x189a   : > { %p3136_p3 = pnand %p3135_p2, %p3131_p13 }
0x1908   : > { %v2547_v26 = vpop.xlane.xlu1 %2546 }
0x1909   : > { %v2548_v27 = vmul.f32 %v2547_v26, %v3377_v9  ;;  %v3055_v9 = vld [vmem:[%s4127_s19 + $0x1] ss:$0 sm:$0xff] }
0x190b   : > { %v2549_v28 = vadd.f32 1e-05, %v2548_v27 }
0x190d   : > { %3104 = vrsqrt.f32 %v2549_v28  ;;  %vm2556_vm2 = vweird.f32 %v2549_v28 }
0x1913   : > { %v3105_v29 = vpop.eup %3104 }
0x1914   : > { %v2551_v30 = vmul.f32 %v3105_v29, %v2549_v28  ;;  %vm2557_vm1 = vweird.f32 %v3105_v29 }
0x1915   : > { %vm2558_vm3 = vmor %vm2556_vm2, %vm2557_vm1 }
0x1916   : > { %v2552_v31 = vmul.f32 %v3105_v29, %v2551_v30 }
0x1918   : > { %v2553_v32 = vmul.f32 0.5, %v2552_v31 }
0x191a   : > { %v2554_v33 = vsub.f32 1.5, %v2553_v32 }
0x191c   : > { %v2555_v34 = vmul.f32 %v3105_v29, %v2554_v33 }
0x191e   : > { %v2559_v36 = vsel %vm2558_vm3, %v3105_v29, %v2555_v34 }
0x191f   : > { %v2560_v22 = vmul.f32 %v2559_v36, %v2543_v19 }
0x1921   : > { %v2564_v37 = vmul.f32 %v3054_v35, %v2560_v22 }
0x1923   : > { %v2568_v38 = vadd.f32 %v3055_v9, %v2564_v37 }
0x1925   : > { %2967 = vmatmul.msk.f32.vlgmr.msra.gmra.mxu0 %vm806_vm0, %v2568_v38 }
0x19a2   : > { %v2597_v44 = vpop.f32.mrf.mxu0 }
0x19a3   : > { %v2598_v45 = vadd.f32 %v3056_v43, %v2597_v44 }
0x19a5   : > { %3106 = vtanh.f32 %v2598_v45 }
0x19ab   : > { %v3107_v46 = vpop.eup %3106 }
0x19ac   : > { %2968 = vmatmul.msk.f32.vlgmr.msrb.gmra.mxu1 %vm806_vm0, %v3107_v46 }
0x1a29   : > { %v2629_v48 = vpop.f32.mrf.mxu1 }
0x1a2a   : > { %v2630_v49 = vadd.f32 %v3057_v47, %v2629_v48 }
0x1a2c   : > { %v2633_v50 = vsel %vm2632_vm4, %v2630_v49, -inf }
0x1a2d   : > { %v2634_v51 = vrot.slane %v2633_v50, 4 }
0x1a2f   : > { %v2635_v52 = vmax.f32 %v2633_v50, %v2634_v51 }
0x1a31   : > { %v2636_v54 = vrot.slane %v2635_v52, 2 }
0x1a33   : > { %v2637_v56 = vmax.f32 %v2635_v52, %v2636_v54 }
0x1a35   : > { %v2638_v57 = vrot.slane %v2637_v56, 1 }
0x1a37   : > { %v2639_v58 = vmax.f32 %v2637_v56, %v2638_v57 }
0x1a39   : > { %v2640_v59 = vsub.f32 %v2630_v49, %v2639_v58 }
0x1a3b   : > { %v2641_v60 = vmul.f32 1.442695, %v2640_v59 }
0x1a3d   : > { %3108 = vpow2.f32 %v2641_v60 }
0x1a43   : > { %v3109_v61 = vpop.eup %3108 }
0x1a44   : > { %v2643_v62 = vsel %vm2632_vm4, %v3109_v61, 0.0 }
0x1a45   : > { %v2644_v63 = vrot.slane %v2643_v62, 4 }
0x1a47   : > { %v2645_v0 = vadd.f32 %v2644_v63, %v2643_v62 }
0x1a49   : > { %v2646_v53 = vrot.slane %v2645_v0, 2 }
0x1a4b   : > { %v2647_v1 = vadd.f32 %v2646_v53, %v2645_v0 }
0x1a4d   : > { %v2648_v2 = vrot.slane %v2647_v1, 1 }
0x1a4f   : > { %v2649_v3 = vadd.f32 %v2648_v2, %v2647_v1 }
0x1a51   : > { %3110 = vrcp.f32 %v2649_v3 }
0x1a57   : > { %v3111_v4 = vpop.eup %3110 }
0x1a58   : > { %v2651_v6 = vmul.f32 %v3111_v4, %v3109_v61 }
0x1a5a   : > { %2654 = vperm.xlu2 %3013, %v2651_v6  }
0x1ab4   : > { %v2655_v12 = vpop.permute.xlu2 %2654 }
0x1ab5   : > { %v2657_v13 = vmul.f32 %v2655_v12, %v2568_v38 }
0x1ab7   : > { %v2658_v14 = vsel %vm806_vm0, %v2657_v13, 0.0 }
0x1ab8   : > { %v2659_v15 = vrot.slane %v2658_v14, 4 }
0x1aba   : > { %v2660_v16 = vadd.f32 %v2659_v15, %v2658_v14 }
0x1abc   : > { %v2661_v17 = vrot.slane %v2660_v16, 2 }
0x1abe   : > { %v2662_v18 = vadd.f32 %v2661_v17, %v2660_v16 }
0x1ac0   : > { %v2663_v19 = vrot.slane %v2662_v18, 1 }
0x1ac2   : > { %v2664_v20 = vadd.f32 %v2663_v19, %v2662_v18 }
0x1ac4   : > { %2969 = vmatmul.msk.f32.vlgmr.msrb.gmra.mxu2 %vm806_vm0, %v2664_v20 }
0x1b47   : > { %v2690_v23 = vpop.f32.mrf.mxu2 }
0x1b48   : > { %v2691_v5 = vadd.f32 %v2690_v23, %v2669_v21 }
0x1b4a   : > { %2693 = vst [vmem:[%s794_s2] sm:$0x1] %v2691_v5 }
0x1b4b   : > { %3139 = shalt.err (!%p3136_p3)
}
0x1b4c   : > { %2972 = dma.vmem_to_hbm [thread:$0]  (%p3354_p5), %s2706_s3, 16, %s2708_s6, %s2695_s10  }
0x1b4d PF: > { %s4204_s2 = sld [smem:[#allocation9_spill]] }
0x1b4e   : > { %s4205_s5 = sld [smem:[#allocation6_spill]] }
0x1b53   : > { %p2978_p4 = scmp.ge.s32.totalorder %s4204_s2, 2 }
0x1b54   : > { %s2719_s23 = sand.u32 1, %s4205_s5  }
0x1b55   : > { %p2975_p7 = pnand %p2978_p4, %p3358_p6  ;;  %s2720_s4 = scalar_lea.sflag [#allocation4], %s2719_s23 }
0x1b57   : > { %p2976_p8 = pneg %p2975_p7 }
0x1b59   : > { %3157 = dma.done.wait (%p2976_p8), %s2720_s4, 16  }
0x1b5a   : > { %3159 = vsyncadd (%p2976_p8), %s2720_s4, 4294967280  ;;  %s4207_s4 = sld [smem:[#allocation11_spill]] }
0x1b5b   : > { %s4208_s7 = sld [smem:[#allocation7_spill]] }
0x1b5c   : > { %s4209_s28 = sld [smem:[#allocation8_spill]] }
0x1b5d   : > { %s4210_s8 = sld [smem:[#allocation12_spill]] }
0x1b60   : > { %p38_p9 = scmp.ge.s32.totalorder %s4207_s4, 4  }
0x1b62   :  { %40 = sbr.rel (!%p38_p9) target bundleno = 18 (0x12), region = 220 }
0x1b67   :  { %2725 = vsyncpa [#allocation4], 1 }
0x1b68   :  { %2727 = vsyncpa [#allocation4 + $0x1], 1 }

</bundles_post_ra>
